<compile_context>
chip_gen: v7x
topology: tpu7x:2x2x1
jax: 0.10.0
libtpu: 0.0.40
codegen_flags: <defaults>
</compile_context>

<pallas_src>
import functools

import jax
import jax.numpy as jnp
from jax.experimental import pallas as pl
from jax.experimental.pallas import tpu as pltpu


HIDDEN = 500  # fixed by the PyTorch module architecture


def _round_up(n, m):
    return ((n + m - 1) // m) * m


def _cdiv(a, b):
    return -(-a // b)


# ---------------------------------------------------------------------------
# Kernel
# ---------------------------------------------------------------------------
def _vae_kernel(x_ref, eps_ref,
                w1_ref, b1_ref, w2_ref, b2_ref, w3_ref, b3_ref, w4_ref, b4_ref,
                recon_ref, head_ref, *, bot):
    # x_ref:   [TM, input_dim] f32 (cast to bf16 here -> no wrapper pad/cast op)
    # eps_ref: [TM, head_pad]  bf16, eps values at lanes [bot, 2*bot), zeros elsewhere
    x = x_ref[...].astype(jnp.bfloat16)

    # ----- encoder -----
    h1 = jnp.dot(x, w1_ref[...], preferred_element_type=jnp.float32) + b1_ref[...]
    h1 = jnp.maximum(h1, 0.0)                                     # relu(fc1(x)), f32

    # fused mu/logvar head (single 128-lane-padded block):
    #   lanes [0,bot) = mu, [bot,2*bot) = logvar, rest exactly 0 for valid rows.
    mulogvar = (jnp.dot(h1.astype(jnp.bfloat16), w2_ref[...],
                        preferred_element_type=jnp.float32) + b2_ref[...])
    head_ref[...] = mulogvar                                      # mu | logvar output slab

    # ----- reparameterize, shift-free -----
    # std lives at lanes [bot,2*bot) of exp(0.5*mulogvar); eps is pre-positioned there.
    # v = [mu | eps*std | 0];  w3 has its rows duplicated at [0,bot) and [bot,2*bot),
    # so v @ w3_dup == (mu + eps*std) @ w3 == z @ w3.
    lane = jax.lax.broadcasted_iota(jnp.int32, mulogvar.shape, dimension=1)
    mu_only = jnp.where(lane < bot, mulogvar, 0.0)
    noise = eps_ref[...].astype(jnp.float32) * jnp.exp(0.5 * mulogvar)
    v = mu_only + noise

    # ----- decoder -----
    h3 = (jnp.dot(v.astype(jnp.bfloat16), w3_ref[...],
                  preferred_element_type=jnp.float32) + b3_ref[...])
    h3 = jnp.maximum(h3, 0.0)                                     # relu(fc3(z))

    logits = (jnp.dot(h3.astype(jnp.bfloat16), w4_ref[...],
                      preferred_element_type=jnp.float32) + b4_ref[...])
    recon_ref[...] = jax.nn.sigmoid(logits).astype(recon_ref.dtype)   # bf16 recon


# ---------------------------------------------------------------------------
# Parameter packing (pad hidden to 512, pack mu/logvar head into one 128-lane
# block, duplicate w3 rows for the shift-free reparameterization, cast to bf16)
# ---------------------------------------------------------------------------
def pack_vae_params(params, input_dim, bottleneck_dim):
    bot = bottleneck_dim
    hid_pad = _round_up(HIDDEN, 128)            # 512
    head_pad = _round_up(2 * bot, 128)          # 128 for bot <= 64

    def pad2(a, rows, cols):
        return jnp.pad(a, ((0, rows - a.shape[0]), (0, cols - a.shape[1])))

    # fc1: [input_dim, hid_pad] -- rows stay at the natural input_dim (block == full dim)
    w1 = pad2(params["w1"], input_dim, hid_pad).astype(jnp.bfloat16)
    b1 = pad2(params["b1"], 1, hid_pad)

    # fused fc21|fc22 head inside one head_pad-wide block
    w2 = jnp.zeros((hid_pad, head_pad), jnp.float32)
    w2 = w2.at[:HIDDEN, :bot].set(params["w21"])
    w2 = w2.at[:HIDDEN, bot:2 * bot].set(params["w22"])
    w2 = w2.astype(jnp.bfloat16)
    b2 = jnp.zeros((1, head_pad), jnp.float32)
    b2 = b2.at[:, :bot].set(params["b21"][0])
    b2 = b2.at[:, bot:2 * bot].set(params["b22"][0])

    # fc3 with rows duplicated at [0,bot) (mu lanes) and [bot,2*bot) (noise lanes)
    w3 = jnp.zeros((head_pad, hid_pad), jnp.float32)
    w3 = w3.at[:bot, :HIDDEN].set(params["w3"])
    w3 = w3.at[bot:2 * bot, :HIDDEN].set(params["w3"])
    w3 = w3.astype(jnp.bfloat16)
    b3 = pad2(params["b3"], 1, hid_pad)

    # fc4: [hid_pad, input_dim] -- output columns stay at natural input_dim
    w4 = pad2(params["w4"], hid_pad, input_dim).astype(jnp.bfloat16)
    b4 = params["b4"]                            # [1, input_dim] f32

    return dict(w1=w1, b1=b1, w2=w2, b2=b2, w3=w3, b3=b3, w4=w4, b4=b4)


# ---------------------------------------------------------------------------
# Wrapper
# ---------------------------------------------------------------------------
@jax.jit
def vae_forward(x, eps, packed):
    """Pallas VAE forward.  x: [B, input_dim] f32, eps: [B, bottleneck_dim] f32.

    Returns (recon [B, input_dim] bf16, mu [B, bot] f32, logvar [B, bot] f32).
    """
    B, input_dim = x.shape
    bot = eps.shape[1]

    hid_pad = packed["w1"].shape[1]
    head_pad = packed["w2"].shape[1]

    # --- batch tiling: minimize padding, keep >=2 equal steps for large B (v7x TCs) ---
    # (on v5e a 128-multiple tm would be marginally better; multiple-of-16 is fine on v6e/v7x)
    n_steps = _cdiv(B, 256)
    tm = _round_up(_cdiv(B, n_steps), 16)
    grid = (_cdiv(B, tm),)

    # eps positioned at lanes [bot, 2*bot) of a head_pad-wide bf16 block (tiny fused op);
    # x is passed un-padded and cast to bf16 inside the kernel.
    eps_p = jnp.pad(eps, ((0, 0), (bot, head_pad - 2 * bot))).astype(jnp.bfloat16)

    # --- VMEM budget / cost hints (python ints at trace time) ---
    param_bytes = sum(int(v.size) * v.dtype.itemsize for v in packed.values())
    io_bytes = 2 * (tm * input_dim * 4 + tm * head_pad * 2      # x, eps blocks (dbl-buf)
                    + tm * input_dim * 2 + tm * head_pad * 4)   # recon, head blocks
    act_bytes = 4 * tm * (2 * hid_pad + 3 * head_pad + 2 * input_dim)
    vmem_limit = int(min(48 * 2**20,
                         max(16 * 2**20, 2 * (2 * param_bytes + io_bytes + act_bytes))))
    flops = 2 * B * (input_dim * hid_pad + hid_pad * head_pad
                     + head_pad * hid_pad + hid_pad * input_dim)
    transcendentals = B * (head_pad + input_dim)
    bytes_accessed = (B * input_dim * 4 + B * head_pad * 2 + param_bytes
                      + B * input_dim * 2 + B * head_pad * 4)

    kernel = functools.partial(_vae_kernel, bot=bot)

    in_specs = [
        pl.BlockSpec((tm, input_dim), lambda i: (i, 0)),         # x (full-width block)
        pl.BlockSpec((tm, head_pad), lambda i: (i, 0)),          # eps (pre-positioned)
        pl.BlockSpec((input_dim, hid_pad), lambda i: (0, 0)),    # w1 (resident)
        pl.BlockSpec((1, hid_pad), lambda i: (0, 0)),            # b1
        pl.BlockSpec((hid_pad, head_pad), lambda i: (0, 0)),     # fused w21|w22
        pl.BlockSpec((1, head_pad), lambda i: (0, 0)),           # fused b21|b22
        pl.BlockSpec((head_pad, hid_pad), lambda i: (0, 0)),     # w3 (rows duplicated)
        pl.BlockSpec((1, hid_pad), lambda i: (0, 0)),            # b3
        pl.BlockSpec((hid_pad, input_dim), lambda i: (0, 0)),    # w4
        pl.BlockSpec((1, input_dim), lambda i: (0, 0)),          # b4
    ]
    out_specs = [
        pl.BlockSpec((tm, input_dim), lambda i: (i, 0)),         # recon (bf16)
        pl.BlockSpec((tm, head_pad), lambda i: (i, 0)),          # mu|logvar slab (f32)
    ]

    recon, head = pl.pallas_call(
        kernel,
        out_shape=(jax.ShapeDtypeStruct((B, input_dim), jnp.bfloat16),
                   jax.ShapeDtypeStruct((B, head_pad), jnp.float32)),
        grid=grid,
        in_specs=in_specs,
        out_specs=out_specs,
        compiler_params=pltpu.CompilerParams(
            dimension_semantics=("parallel",),
            vmem_limit_bytes=vmem_limit),
        cost_estimate=pl.CostEstimate(flops=flops,
                                      transcendentals=transcendentals,
                                      bytes_accessed=bytes_accessed),
    )(x, eps_p,
      packed["w1"], packed["b1"], packed["w2"], packed["b2"],
      packed["w3"], packed["b3"], packed["w4"], packed["b4"])

    mu = head[:, :bot]
    logvar = head[:, bot:2 * bot]
    return recon, mu, logvar


# ---------------------------------------------------------------------------
# Params + pure-JAX f32 reference
# ---------------------------------------------------------------------------
def init_vae_params(key, input_dim, bottleneck_dim):
    """Init mimicking torch.nn.Linear default (U[-1/sqrt(fan_in), +])."""
    def linear(k, fan_in, fan_out):
        kw, kb = jax.random.split(k)
        bound = 1.0 / jnp.sqrt(fan_in)
        # stored as [in, out] (i.e. W.T relative to PyTorch's [out, in])
        w = jax.random.uniform(kw, (fan_in, fan_out), jnp.float32, -bound, bound)
        b = jax.random.uniform(kb, (1, fan_out), jnp.float32, -bound, bound)
        return w, b

    k1, k21, k22, k3, k4 = jax.random.split(key, 5)
    w1, b1 = linear(k1, input_dim, HIDDEN)
    w21, b21 = linear(k21, HIDDEN, bottleneck_dim)
    w22, b22 = linear(k22, HIDDEN, bottleneck_dim)
    w3, b3 = linear(k3, bottleneck_dim, HIDDEN)
    w4, b4 = linear(k4, HIDDEN, input_dim)
    return dict(w1=w1, b1=b1, w21=w21, b21=b21, w22=w22, b22=b22,
                w3=w3, b3=b3, w4=w4, b4=b4)


def vae_forward_ref(x, eps, p):
    """Pure-JAX f32 reference of the PyTorch forward (correctness check)."""
    h1 = jnp.maximum(x @ p["w1"] + p["b1"], 0.0)
    mu = h1 @ p["w21"] + p["b21"]
    logvar = h1 @ p["w22"] + p["b22"]
    z = mu + eps * jnp.exp(0.5 * logvar)
    h3 = jnp.maximum(z @ p["w3"] + p["b3"], 0.0)
    recon = jax.nn.sigmoid(h3 @ p["w4"] + p["b4"])
    return recon, mu, logvar


if __name__ == "__main__":
    B = 300                 # not a multiple of the batch tile -> ragged edge block + 2 grid steps
    INPUT_DIM = 64
    BOTTLENECK_DIM = 16

    root = jax.random.PRNGKey(0)
    k_params, k_x, k_eps = jax.random.split(root, 3)

    params = init_vae_params(k_params, INPUT_DIM, BOTTLENECK_DIM)
    packed = pack_vae_params(params, INPUT_DIM, BOTTLENECK_DIM)

    x = jax.random.normal(k_x, (B, INPUT_DIM), jnp.float32)
    # TODO(synk): eps corresponds to torch.randn_like(std) in _reparameterize; it is
    # generated deterministically outside the kernel (not via pltpu.prng_*) so the
    # pure-JAX reference can reproduce the exact same noise.
    eps = jax.random.normal(k_eps, (B, BOTTLENECK_DIM), jnp.float32)

    recon, mu, logvar = jax.block_until_ready(vae_forward(x, eps, packed))

    # sanity check against the pure-JAX f32 reference (bf16 MXU operands / bf16 recon
    # -> loose tolerance)
    recon_r, mu_r, logvar_r = vae_forward_ref(x, eps, params)
    assert recon.shape == (B, INPUT_DIM)
    assert mu.shape == (B, BOTTLENECK_DIM) and logvar.shape == (B, BOTTLENECK_DIM)
    assert jnp.allclose(recon.astype(jnp.float32), recon_r, atol=5e-2, rtol=5e-2)
    assert jnp.allclose(mu, mu_r, atol=5e-2, rtol=5e-2)
    assert jnp.allclose(logvar, logvar_r, atol=5e-2, rtol=5e-2)

    print("KERNEL_OK")
</pallas_src>

<mosaic_0001>
module attributes {stable_mosaic.version = 11 : i64} {
  func.func @_vae_kernel(%arg0: i32, %arg1: memref<160x64xf32, #tpu.memory_space<vmem>>, %arg2: memref<160x128xbf16, #tpu.memory_space<vmem>>, %arg3: memref<64x512xbf16, #tpu.memory_space<vmem>>, %arg4: memref<1x512xf32, #tpu.memory_space<vmem>>, %arg5: memref<512x128xbf16, #tpu.memory_space<vmem>>, %arg6: memref<1x128xf32, #tpu.memory_space<vmem>>, %arg7: memref<128x512xbf16, #tpu.memory_space<vmem>>, %arg8: memref<1x512xf32, #tpu.memory_space<vmem>>, %arg9: memref<512x64xbf16, #tpu.memory_space<vmem>>, %arg10: memref<1x64xf32, #tpu.memory_space<vmem>>, %arg11: memref<160x64xbf16, #tpu.memory_space<vmem>>, %arg12: memref<160x128xf32, #tpu.memory_space<vmem>>) attributes {dimension_semantics = [#tpu.dimension_semantics<parallel>], iteration_bounds = array<i64: 2>, scalar_prefetch = 0 : i64, scratch_operands = 0 : i64, tpu.core_type = #tpu.core_type<tc>, window_params = [{transform_indices = @transform_0, window_bounds = array<i64: 160, 64>}, {transform_indices = @transform_1, window_bounds = array<i64: 160, 128>}, {pipeline_mode = #tpu.pipeline_mode<synchronous>, transform_indices = @transform_2, window_bounds = array<i64: 64, 512>}, {pipeline_mode = #tpu.pipeline_mode<synchronous>, transform_indices = @transform_3, window_bounds = array<i64: 1, 512>}, {pipeline_mode = #tpu.pipeline_mode<synchronous>, transform_indices = @transform_4, window_bounds = array<i64: 512, 128>}, {pipeline_mode = #tpu.pipeline_mode<synchronous>, transform_indices = @transform_5, window_bounds = array<i64: 1, 128>}, {pipeline_mode = #tpu.pipeline_mode<synchronous>, transform_indices = @transform_6, window_bounds = array<i64: 128, 512>}, {pipeline_mode = #tpu.pipeline_mode<synchronous>, transform_indices = @transform_7, window_bounds = array<i64: 1, 512>}, {pipeline_mode = #tpu.pipeline_mode<synchronous>, transform_indices = @transform_8, window_bounds = array<i64: 512, 64>}, {pipeline_mode = #tpu.pipeline_mode<synchronous>, transform_indices = @transform_9, window_bounds = array<i64: 1, 64>}, {transform_indices = @transform_10, window_bounds = array<i64: 160, 64>}, {transform_indices = @transform_11, window_bounds = array<i64: 160, 128>}]} {
    %c0 = arith.constant 0 : index
    %c0_0 = arith.constant 0 : index
    %0 = vector.load %arg1[%c0, %c0_0] : memref<160x64xf32, #tpu.memory_space<vmem>>, vector<160x64xf32>
    %1 = arith.truncf %0 : vector<160x64xf32> to vector<160x64xbf16>
    %c0_1 = arith.constant 0 : index
    %c0_2 = arith.constant 0 : index
    %2 = vector.load %arg3[%c0_1, %c0_2] : memref<64x512xbf16, #tpu.memory_space<vmem>>, vector<64x512xbf16>
    %cst = arith.constant dense<0.000000e+00> : vector<160x512xf32>
    %3 = tpu.matmul %1, %2, %cst {dimension_numbers = #tpu.dot_dimension_numbers<[1], [0], [0], [1], [0, 0, 1, 1], [], []>} : vector<160x64xbf16>, vector<64x512xbf16>, vector<160x512xf32> -> vector<160x512xf32>
    %c0_3 = arith.constant 0 : index
    %c0_4 = arith.constant 0 : index
    %4 = vector.load %arg4[%c0_3, %c0_4] : memref<1x512xf32, #tpu.memory_space<vmem>>, vector<1x512xf32>
    %5 = vector.broadcast %4 : vector<1x512xf32> to vector<160x512xf32>
    %6 = arith.addf %3, %5 : vector<160x512xf32>
    %cst_5 = arith.constant 0.000000e+00 : f32
    %7 = vector.broadcast %cst_5 : f32 to vector<160x512xf32>
    %8 = arith.maximumf %6, %7 : vector<160x512xf32>
    %9 = arith.truncf %8 : vector<160x512xf32> to vector<160x512xbf16>
    %c0_6 = arith.constant 0 : index
    %c0_7 = arith.constant 0 : index
    %10 = vector.load %arg5[%c0_6, %c0_7] : memref<512x128xbf16, #tpu.memory_space<vmem>>, vector<512x128xbf16>
    %cst_8 = arith.constant dense<0.000000e+00> : vector<160x128xf32>
    %11 = tpu.matmul %9, %10, %cst_8 {dimension_numbers = #tpu.dot_dimension_numbers<[1], [0], [0], [1], [0, 0, 1, 1], [], []>} : vector<160x512xbf16>, vector<512x128xbf16>, vector<160x128xf32> -> vector<160x128xf32>
    %c0_9 = arith.constant 0 : index
    %c0_10 = arith.constant 0 : index
    %12 = vector.load %arg6[%c0_9, %c0_10] : memref<1x128xf32, #tpu.memory_space<vmem>>, vector<1x128xf32>
    %13 = vector.broadcast %12 : vector<1x128xf32> to vector<160x128xf32>
    %14 = arith.addf %11, %13 : vector<160x128xf32>
    %c0_11 = arith.constant 0 : index
    %c0_12 = arith.constant 0 : index
    %15 = vector.load %arg12[%c0_11, %c0_12] : memref<160x128xf32, #tpu.memory_space<vmem>>, vector<160x128xf32>
    tpu.vector_store %arg12[%c0_11, %c0_12], %14 {strides = array<i32>} : memref<160x128xf32, #tpu.memory_space<vmem>>, vector<160x128xf32>,
    %16 = tpu.iota {dimensions = array<i32: 1>} : vector<160x128xi32>
    %c16_i32 = arith.constant 16 : i32
    %17 = vector.broadcast %c16_i32 : i32 to vector<160x128xi32>
    %18 = arith.cmpi slt, %16, %17 : vector<160x128xi32>
    %cst_13 = arith.constant 0.000000e+00 : f32
    %19 = vector.broadcast %cst_13 : f32 to vector<160x128xf32>
    %20 = arith.select %18, %14, %19 : vector<160x128xi1>, vector<160x128xf32>
    %c0_14 = arith.constant 0 : index
    %c0_15 = arith.constant 0 : index
    %21 = vector.load %arg2[%c0_14, %c0_15] : memref<160x128xbf16, #tpu.memory_space<vmem>>, vector<160x128xbf16>
    %22 = arith.extf %21 : vector<160x128xbf16> to vector<160x128xf32>
    %cst_16 = arith.constant 5.000000e-01 : f32
    %23 = vector.broadcast %cst_16 : f32 to vector<160x128xf32>
    %24 = arith.mulf %23, %14 : vector<160x128xf32>
    %25 = math.exp %24 : vector<160x128xf32>
    %26 = arith.mulf %22, %25 : vector<160x128xf32>
    %27 = arith.addf %20, %26 : vector<160x128xf32>
    %28 = arith.truncf %27 : vector<160x128xf32> to vector<160x128xbf16>
    %c0_17 = arith.constant 0 : index
    %c0_18 = arith.constant 0 : index
    %29 = vector.load %arg7[%c0_17, %c0_18] : memref<128x512xbf16, #tpu.memory_space<vmem>>, vector<128x512xbf16>
    %cst_19 = arith.constant dense<0.000000e+00> : vector<160x512xf32>
    %30 = tpu.matmul %28, %29, %cst_19 {dimension_numbers = #tpu.dot_dimension_numbers<[1], [0], [0], [1], [0, 0, 1, 1], [], []>} : vector<160x128xbf16>, vector<128x512xbf16>, vector<160x512xf32> -> vector<160x512xf32>
    %c0_20 = arith.constant 0 : index
    %c0_21 = arith.constant 0 : index
    %31 = vector.load %arg8[%c0_20, %c0_21] : memref<1x512xf32, #tpu.memory_space<vmem>>, vector<1x512xf32>
    %32 = vector.broadcast %31 : vector<1x512xf32> to vector<160x512xf32>
    %33 = arith.addf %30, %32 : vector<160x512xf32>
    %cst_22 = arith.constant 0.000000e+00 : f32
    %34 = vector.broadcast %cst_22 : f32 to vector<160x512xf32>
    %35 = arith.maximumf %33, %34 : vector<160x512xf32>
    %36 = arith.truncf %35 : vector<160x512xf32> to vector<160x512xbf16>
    %c0_23 = arith.constant 0 : index
    %c0_24 = arith.constant 0 : index
    %37 = vector.load %arg9[%c0_23, %c0_24] : memref<512x64xbf16, #tpu.memory_space<vmem>>, vector<512x64xbf16>
    %cst_25 = arith.constant dense<0.000000e+00> : vector<160x64xf32>
    %38 = tpu.matmul %36, %37, %cst_25 {dimension_numbers = #tpu.dot_dimension_numbers<[1], [0], [0], [1], [0, 0, 1, 1], [], []>} : vector<160x512xbf16>, vector<512x64xbf16>, vector<160x64xf32> -> vector<160x64xf32>
    %c0_26 = arith.constant 0 : index
    %c0_27 = arith.constant 0 : index
    %39 = vector.load %arg10[%c0_26, %c0_27] : memref<1x64xf32, #tpu.memory_space<vmem>>, vector<1x64xf32>
    %40 = vector.broadcast %39 : vector<1x64xf32> to vector<160x64xf32>
    %41 = arith.addf %38, %40 : vector<160x64xf32>
    %42 = arith.negf %41 : vector<160x64xf32>
    %43 = math.exp %42 : vector<160x64xf32>
    %cst_28 = arith.constant 1.000000e+00 : f32
    %44 = vector.broadcast %cst_28 : f32 to vector<160x64xf32>
    %45 = arith.addf %44, %43 : vector<160x64xf32>
    %46 = arith.divf %44, %45 : vector<160x64xf32>
    %47 = arith.truncf %46 : vector<160x64xf32> to vector<160x64xbf16>
    %c0_29 = arith.constant 0 : index
    %c0_30 = arith.constant 0 : index
    %48 = vector.load %arg11[%c0_29, %c0_30] : memref<160x64xbf16, #tpu.memory_space<vmem>>, vector<160x64xbf16>
    tpu.vector_store %arg11[%c0_29, %c0_30], %47 {strides = array<i32>} : memref<160x64xbf16, #tpu.memory_space<vmem>>, vector<160x64xbf16>,
    return
  }
  func.func @transform_0(%arg0: i32) -> (i32, i32) {
    %c0_i32 = arith.constant 0 : i32
    %c0_i32_0 = arith.constant 0 : i32
    return %arg0, %c0_i32 : i32, i32
  }
  func.func @transform_1(%arg0: i32) -> (i32, i32) {
    %c0_i32 = arith.constant 0 : i32
    %c0_i32_0 = arith.constant 0 : i32
    return %arg0, %c0_i32 : i32, i32
  }
  func.func @transform_2(%arg0: i32) -> (i32, i32) {
    %c0_i32 = arith.constant 0 : i32
    %c0_i32_0 = arith.constant 0 : i32
    %c0_i32_1 = arith.constant 0 : i32
    return %c0_i32, %c0_i32_0 : i32, i32
  }
  func.func @transform_3(%arg0: i32) -> (i32, i32) {
    %c0_i32 = arith.constant 0 : i32
    %c0_i32_0 = arith.constant 0 : i32
    %c0_i32_1 = arith.constant 0 : i32
    return %c0_i32, %c0_i32_0 : i32, i32
  }
  func.func @transform_4(%arg0: i32) -> (i32, i32) {
    %c0_i32 = arith.constant 0 : i32
    %c0_i32_0 = arith.constant 0 : i32
    %c0_i32_1 = arith.constant 0 : i32
    return %c0_i32, %c0_i32_0 : i32, i32
  }
  func.func @transform_5(%arg0: i32) -> (i32, i32) {
    %c0_i32 = arith.constant 0 : i32
    %c0_i32_0 = arith.constant 0 : i32
    %c0_i32_1 = arith.constant 0 : i32
    return %c0_i32, %c0_i32_0 : i32, i32
  }
  func.func @transform_6(%arg0: i32) -> (i32, i32) {
    %c0_i32 = arith.constant 0 : i32
    %c0_i32_0 = arith.constant 0 : i32
    %c0_i32_1 = arith.constant 0 : i32
    return %c0_i32, %c0_i32_0 : i32, i32
  }
  func.func @transform_7(%arg0: i32) -> (i32, i32) {
    %c0_i32 = arith.constant 0 : i32
    %c0_i32_0 = arith.constant 0 : i32
    %c0_i32_1 = arith.constant 0 : i32
    return %c0_i32, %c0_i32_0 : i32, i32
  }
  func.func @transform_8(%arg0: i32) -> (i32, i32) {
    %c0_i32 = arith.constant 0 : i32
    %c0_i32_0 = arith.constant 0 : i32
    %c0_i32_1 = arith.constant 0 : i32
    return %c0_i32, %c0_i32_0 : i32, i32
  }
  func.func @transform_9(%arg0: i32) -> (i32, i32) {
    %c0_i32 = arith.constant 0 : i32
    %c0_i32_0 = arith.constant 0 : i32
    %c0_i32_1 = arith.constant 0 : i32
    return %c0_i32, %c0_i32_0 : i32, i32
  }
  func.func @transform_10(%arg0: i32) -> (i32, i32) {
    %c0_i32 = arith.constant 0 : i32
    %c0_i32_0 = arith.constant 0 : i32
    return %arg0, %c0_i32 : i32, i32
  }
  func.func @transform_11(%arg0: i32) -> (i32, i32) {
    %c0_i32 = arith.constant 0 : i32
    %c0_i32_0 = arith.constant 0 : i32
    return %arg0, %c0_i32 : i32, i32
  }
}

</mosaic_0001>

<bundles_post_ra>
// kernel: vae_forward.1
= control target key start
LH: loop header
LB: loop body
LE: loop exit
PB: predicated region body
PF: predicated region fallthrough
CT: control target
= control target key end

     0   :  { %s5944_s0 = inlined_call_operand.vmem [shape: f32[300,64], index: 0, kind: input, shape index: {}]   ;;  %s5945_s1 = inlined_call_operand.vmem [shape: bf16[300,128], index: 1, kind: input, shape index: {}]   ;;  %s5946_s2 = inlined_call_operand.vmem [shape: bf16[64,512], index: 2, kind: input, shape index: {}]   ;;  %s5947_s3 = inlined_call_operand.vmem [shape: f32[1,512], index: 3, kind: input, shape index: {}]   ;;  %s5948_s4 = inlined_call_operand.vmem [shape: bf16[512,128], index: 4, kind: input, shape index: {}]   ;;  %s5949_s5 = inlined_call_operand.vmem [shape: f32[1,128], index: 5, kind: input, shape index: {}]   ;;  %s5950_s6 = inlined_call_operand.vmem [shape: bf16[128,512], index: 6, kind: input, shape index: {}]   ;;  %s5951_s7 = inlined_call_operand.vmem [shape: f32[1,512], index: 7, kind: input, shape index: {}]   ;;  %s5952_s8 = inlined_call_operand.vmem [shape: bf16[512,64], index: 8, kind: input, shape index: {}]   ;;  %s5953_s9 = inlined_call_operand.vmem [shape: f32[1,64], index: 9, kind: input, shape index: {}]   ;;  %s5954_s10 = inlined_call_operand.vmem [shape: bf16[300,64], index: 10, kind: output, shape index: {0}]   ;;  %s5955_s11 = inlined_call_operand.vmem [shape: f32[300,128], index: 11, kind: output, shape index: {1}]  }
   0x1   :  { %5956 = sst [smem:[#allocation4_spill]] %s5944_s0 }
   0x2   :  { %5957 = sst [smem:[#allocation5_spill]] %s5945_s1 }
   0x3   :  { %5958 = sst [smem:[#allocation6_spill]] %s5946_s2 }
   0x4   :  { %5959 = sst [smem:[#allocation7_spill]] %s5947_s3 }
   0x5   :  { %5960 = sst [smem:[#allocation8_spill]] %s5948_s4 }
   0x6   :  { %s4805_s17 = smov 0   ;;  %s4807_s18 = smov 0  }
   0x7   :  { %s4809_s19 = smov 0  }
   0x8 LB: > { %s4818_s20 = sadd.s32 4294967295, %s4678_s19   ;;  %s4820_s21 = sadd.s32 1, %s4678_s19   ;;  %s4678_s19 = sphi %s4809_s19, %s5975_s19   ;;  %s4674_s18 = sphi %s4807_s18, %s5974_s18   ;;  %s4670_s17 = sphi %s4805_s17, %s5973_s17  }
   0x9   : > { %s246_s22 = ssub.s32 %s4678_s19, %s4820_s21  ;;  %s249_s23 = sadd.s32 1, %s4674_s18 }
   0xa   : > { %p247_p0 = scmp.eq.s32.totalorder %s246_s22, 0  ;;  %p259_p1 = scmp.ne.s32.totalorder %s4674_s18, %s4670_s17 }
   0xb   : > { %p260_p2 = scmp.eq.s32.totalorder %s4818_s20, 1  ;;  %p3597_p3 = scmp.ge.s32.totalorder %s4678_s19, 1 }
   0xc   : > { %s4828_s24 = scalar_select %p247_p0, %s4674_s18, %s249_s23  }
   0xd   : > { %p4830_p4 = por %p260_p2, %p259_p1  ;;  %p368_p5 = scmp.lt.s32.totalorder %s4678_s19, 3 }
   0xf   : > { %p369_p6 = pnand %p3597_p3, %p368_p5 }
  0x10   : > { %s5962_s2 = sld [smem:[#allocation6_spill]] (!%p369_p6)  ;;  %s4838_s28 = smul.u32 (!%p369_p6), 20, %s4818_s20  ;;  %v4744_v2 = vmov (!%p369_p6), 0   ;;  %vm611_vm0 = vcmask (!%p369_p6), 523264   ;;  %vm2999_vm2 = vcmask (!%p369_p6), 519168  }
  0x11   : > { %372 = sbr.rel (%p369_p6) target bundleno = 1192 (0x4a8), region = 60  ;;  %674 = vmatprep.mubr.bf16.mxu0 (!%p369_p6), %v4744_v2  ;;  %807 = vmatprep.mubr.bf16.mxu1 (!%p369_p6), %v4744_v2  ;;  %s5963_s0 = sld [smem:[#allocation4_spill]] (!%p369_p6) }
  0x12   : > { %p429_p7 = scmp.lt.s32.totalorder (!%p369_p6), %s4838_s28, 37  ;;  %s5964_s4 = sld [smem:[#allocation8_spill]] (!%p369_p6) }
  0x13   : > { %s5965_s3 = sld [smem:[#allocation7_spill]] (!%p369_p6)  ;;  %s415_s26 = sand.u32 (!%p369_p6), 1, %s4670_s17  }
  0x14   : > { %s5966_s1 = sld [smem:[#allocation5_spill]] (!%p369_p6)  ;;  %s4171_s14 = smul.u32 (!%p369_p6), 80, %s415_s26 }
  0x16   : > { %v4328_v0 = vld [vmem:[%s5962_s2 + $0x4] ss:$16 sps:$4 sm:$0xff] (!%p369_p6)   ;;  %v4330_v1 = vld [vmem:[%s5962_s2 + $0xc] ss:$16 sps:$4 sm:$0xff] (!%p369_p6)   ;;  %v4332_v3 = vld [vmem:[%s5962_s2] ss:$16 sps:$4 sm:$0xff] (!%p369_p6)  }
  0x17   : > { %642 = vmatprep.subr.bf16.mxu0 (!%p369_p6), %v4328_v0  ;;  %v4333_v4 = vld [vmem:[%s5962_s2 + $0x8] ss:$16 sps:$4 sm:$0xff] (!%p369_p6)   ;;  %775 = vmatprep.subr.bf16.mxu1 (!%p369_p6), %v4330_v1  ;;  %v4334_v5 = vld [vmem:[%s5962_s2 + $0x24] ss:$16 sps:$4 sm:$0xff] (!%p369_p6)   ;;  %v4336_v6 = vld [vmem:[%s5962_s2 + $0x2c] ss:$16 sps:$4 sm:$0xff] (!%p369_p6)  }
  0x18   : > { %643 = vmatpush1.bf16.msra.mxu0 %v4332_v3  ;;  %776 = vmatpush1.bf16.msra.mxu1 %v4333_v4  ;;  %v4338_v7 = vld [vmem:[%s5962_s2 + $0x20] ss:$16 sps:$4 sm:$0xff]   ;;  %s4862_s29 = scalar_select %p429_p7, %s4838_s28, 37  ;;  %v4339_v8 = vld [vmem:[%s5962_s2 + $0x28] ss:$16 sps:$4 sm:$0xff]  }
  0x19   : > { %644 = vmatprep.subr.bf16.mxu0 %v4334_v5  ;;  %777 = vmatprep.subr.bf16.mxu1 %v4336_v6  ;;  %v4340_v9 = vld [vmem:[%s5962_s2 + $0x44] ss:$16 sps:$4 sm:$0xff]   ;;  %v4342_v10 = vld [vmem:[%s5962_s2 + $0x4c] ss:$16 sps:$4 sm:$0xff]   ;;  %v4344_v11 = vld [vmem:[%s5962_s2 + $0x40] ss:$16 sps:$4 sm:$0xff]  }
  0x1a   : > { %s3598_s15 = sshll.u32 %s4862_s29, 3  ;;  %v4345_v12 = vld [vmem:[%s5962_s2 + $0x48] ss:$16 sps:$4 sm:$0xff]   ;;  %v4346_v13 = vld [vmem:[%s5962_s2 + $0x64] ss:$16 sps:$4 sm:$0xff]   ;;  %s5691_s17 = scalar_lea.vmem [#allocation2], %s4171_s14  }
  0x1b   : > { %v4348_v14 = vld [vmem:[%s5962_s2 + $0x6c] ss:$16 sps:$4 sm:$0xff]   ;;  %s4889_s22 = scalar_lea.vmem %s5963_s0, %s3598_s15  ;;  %v4350_v15 = vld [vmem:[%s5962_s2 + $0x60] ss:$16 sps:$4 sm:$0xff]   ;;  %v4351_v16 = vld [vmem:[%s5962_s2 + $0x68] ss:$16 sps:$4 sm:$0xff]  }
  0x1c   : > { %645 = vmatpush1.bf16.msra.mxu0 %v4338_v7  ;;  %778 = vmatpush1.bf16.msra.mxu1 %v4339_v8  ;;  %v463_v17 = vld [vmem:[%s4889_s22] sm:$0xff]  ;;  %v464_v18 = vld [vmem:[%s4889_s22 + $0x8] sm:$0xff]  ;;  %v465_v20 = vld [vmem:[%s4889_s22 + $0x10] sm:$0xff]  ;;  %s4172_s15 = smul.u32 160, %s415_s26  ;;  %s3032_s26 = ssub.s32 (%p4830_p4), 38, %s4838_s28 }
  0x1d   : > { %646 = vmatprep.subr.bf16.mxu0 %v4340_v9  ;;  %779 = vmatprep.subr.bf16.mxu1 %v4342_v10  ;;  %v483_v19 = vpack.c.bf16 %v464_v18, %v463_v17  ;;  %v466_v21 = vld [vmem:[%s4889_s22 + $0x18] sm:$0xff]  ;;  %v4352_v22 = vld [vmem:[%s5964_s4 + $0x40] sm:$0xff]   ;;  %v4356_v26 = vld [vmem:[%s5964_s4 + $0x48] sm:$0xff]   ;;  %v511_v18 = vlaneseq  ;;  %s3816_s16 = smul.u32 (%p4830_p4), 80, %s4818_s20  ;;  %p3033_p8 = scmp.lt.s32.totalorder (%p4830_p4), %s3032_s26, 20 }
  0x1e   : > { %v4353_v23 = vld [vmem:[%s5964_s4] sm:$0xff]   ;;  %v484_v27 = vpack.c.bf16 %v466_v21, %v465_v20  ;;  %v4357_v28 = vld [vmem:[%s5964_s4 + $0x8] sm:$0xff]   ;;  %v4360_v33 = vld [vmem:[%s5964_s4 + $0x50] sm:$0xff]   ;;  %s5273_s12 = scalar_lea.vmem [#allocation3], %s4172_s15  }
  0x1f   : > { %v4354_v24 = vld [vmem:[%s5964_s4 + $0xc0] sm:$0xff]   ;;  %v4358_v29 = vld [vmem:[%s5964_s4 + $0xc8] sm:$0xff]   ;;  %v4361_v34 = vld [vmem:[%s5964_s4 + $0x10] sm:$0xff]   ;;  %s5752_s27 = scalar_lea.vmem (%p4830_p4), %s5954_s10, %s3816_s16  }
  0x20   : > { %647 = vmatpush1.bf16.msra.mxu0 %v4344_v11  ;;  %780 = vmatpush1.bf16.msra.mxu1 %v4345_v12  ;;  %v4355_v25 = vld [vmem:[%s5964_s4 + $0x80] sm:$0xff]   ;;  %v4359_v30 = vld [vmem:[%s5964_s4 + $0x88] sm:$0xff]   ;;  %v4362_v35 = vld [vmem:[%s5964_s4 + $0xd0] sm:$0xff]  }
  0x21   : > { %648 = vmatprep.subr.bf16.mxu0 %v4346_v13  ;;  %781 = vmatprep.subr.bf16.mxu1 %v4348_v14  ;;  %v467_v31 = vld [vmem:[%s4889_s22 + $0x20] sm:$0xff]  ;;  %v468_v32 = vld [vmem:[%s4889_s22 + $0x28] sm:$0xff]  ;;  %v4363_v36 = vld [vmem:[%s5964_s4 + $0x90] sm:$0xff]  }
  0x22   : > { %v4364_v37 = vld [vmem:[%s5964_s4 + $0x58] sm:$0xff]   ;;  %v485_v38 = vpack.c.bf16 %v468_v32, %v467_v31  ;;  %v469_v42 = vld [vmem:[%s4889_s22 + $0x30] sm:$0xff]  ;;  %v4368_v44 = vld [vmem:[%s5964_s4 + $0x60] sm:$0xff]  }
  0x23   : > { %v4365_v39 = vld [vmem:[%s5964_s4 + $0x18] sm:$0xff]   ;;  %v4369_v45 = vld [vmem:[%s5964_s4 + $0x20] sm:$0xff]   ;;  %v4372_v48 = vld [vmem:[%s5964_s4 + $0x68] sm:$0xff]  }
  0x24   : > { %649 = vmatpush1.bf16.msra.mxu0 %v4350_v15  ;;  %782 = vmatpush1.bf16.msra.mxu1 %v4351_v16  ;;  %v4366_v40 = vld [vmem:[%s5964_s4 + $0xd8] sm:$0xff]   ;;  %v4370_v46 = vld [vmem:[%s5964_s4 + $0xe0] sm:$0xff]   ;;  %v4373_v50 = vld [vmem:[%s5964_s4 + $0x28] sm:$0xff]  }
  0x25   : > { %3867 = vmatprep.subr.bf16.mxu0 %v4352_v22  ;;  %3943 = vmatprep.subr.bf16.mxu1 %v4354_v24  ;;  %v4367_v41 = vld [vmem:[%s5964_s4 + $0x98] sm:$0xff]   ;;  %v4371_v47 = vld [vmem:[%s5964_s4 + $0xa0] sm:$0xff]   ;;  %v4374_v51 = vld [vmem:[%s5964_s4 + $0xe8] sm:$0xff]  }
  0x26   : > { %v470_v43 = vld [vmem:[%s4889_s22 + $0x38] sm:$0xff]  ;;  %v4375_v52 = vld [vmem:[%s5964_s4 + $0xa8] sm:$0xff]   ;;  %v471_v53 = vld [vmem:[%s4889_s22 + $0x40] sm:$0xff] }
  0x27   : > { %3616 = vmatmul.mubr.msk.bf16.vlgmr.msra.gmra.mrb[0].mxu0 %vm611_vm0, %v483_v19  ;;  %3626 = vmatmul.mubr.msk.bf16.vlgmr.msra.gmra.mrb[0].mxu1 %vm611_vm0, %v483_v19  ;;  %v486_v49 = vpack.c.bf16 %v470_v43, %v469_v42  ;;  %v472_v54 = vld [vmem:[%s4889_s22 + $0x48] sm:$0xff]  ;;  %v4376_v55 = vld [vmem:[%s5964_s4 + $0x70] sm:$0xff]   ;;  %v474_v61 = vld [vmem:[%s4889_s22 + $0x58] sm:$0xff]  ;;  %v5058_v19 = vshrl.u32 %v511_v18, 7 }
  0x28   : > { %684 = vmatprep.mubr.bf16.mxu0 %v4744_v2  ;;  %817 = vmatprep.mubr.bf16.mxu1 %v4744_v2  ;;  %v4377_v56 = vld [vmem:[%s5964_s4 + $0x30] sm:$0xff]   ;;  %v487_v59 = vpack.c.bf16 %v472_v54, %v471_v53  ;;  %v475_v63 = vld [vmem:[%s4889_s22 + $0x60] sm:$0xff]  ;;  %v476_v0 = vld [vmem:[%s4889_s22 + $0x68] sm:$0xff] }
  0x29   : > { %3868 = vmatpush3.bf16.msra.mxu0 %v4353_v23  ;;  %3944 = vmatpush3.bf16.msra.mxu1 %v4355_v25  ;;  %v4378_v57 = vld [vmem:[%s5964_s4 + $0xf0] sm:$0xff]   ;;  %v489_v1 = vpack.c.bf16 %v476_v0, %v475_v63  ;;  %v478_v4 = vld [vmem:[%s4889_s22 + $0x78] sm:$0xff]  ;;  %v479_v6 = vld [vmem:[%s4889_s22 + $0x80] sm:$0xff]  ;;  %v513_v20 = vsub.s32 0, %v5058_v19  ;;  %v521_v21 = vsub.s32 2, %v5058_v19  ;;  %v517_v23 = vsub.s32 1, %v5058_v19 }
  0x2a   : > { %3869 = vmatprep.subr.bf16.mxu0 %v4356_v26  ;;  %3945 = vmatprep.subr.bf16.mxu1 %v4358_v29  ;;  %v4379_v58 = vld [vmem:[%s5964_s4 + $0xb0] sm:$0xff]   ;;  %v480_v7 = vld [vmem:[%s4889_s22 + $0x88] sm:$0xff]  ;;  %v482_v10 = vld [vmem:[%s4889_s22 + $0x98] sm:$0xff]  ;;  %v525_v24 = vsub.s32 3, %v5058_v19 }
  0x2b   : > { %v473_v60 = vld [vmem:[%s4889_s22 + $0x50] sm:$0xff]  ;;  %v491_v8 = vpack.c.bf16 %v480_v7, %v479_v6  ;;  %v4380_v12 = vld [vmem:[%s5964_s4 + $0x78] sm:$0xff]   ;;  %v509_v22 = vld [vmem:[%s5965_s3] sm:$0xf] }
  0x2c   : > { %v488_v62 = vpack.c.bf16 %v474_v61, %v473_v60  ;;  %v477_v3 = vld [vmem:[%s4889_s22 + $0x70] sm:$0xff]  ;;  %v4381_v13 = vld [vmem:[%s5964_s4 + $0x38] sm:$0xff]   ;;  %v5069_v25 = vrot.slane %v509_v22, %v513_v20  ;;  %v5073_v26 = vrot.slane %v509_v22, %v521_v21 }
  0x2d   : > { %3870 = vmatpush3.bf16.msra.mxu0 %v4357_v28  ;;  %3946 = vmatpush3.bf16.msra.mxu1 %v4359_v30  ;;  %v490_v5 = vpack.c.bf16 %v478_v4, %v477_v3  ;;  %v481_v9 = vld [vmem:[%s4889_s22 + $0x90] sm:$0xff]  ;;  %v4382_v14 = vld [vmem:[%s5964_s4 + $0xf8] sm:$0xff]   ;;  %v5081_v28 = vrot.slane %v509_v22, %v525_v24  ;;  %s3599_s22 = sshll.u32 %s4862_s29, 2 }
  0x2e   : > { %3871 = vmatprep.subr.bf16.mxu0 %v4360_v33  ;;  %3947 = vmatprep.subr.bf16.mxu1 %v4362_v35  ;;  %v492_v11 = vpack.c.bf16 %v482_v10, %v481_v9  ;;  %v4383_v15 = vld [vmem:[%s5964_s4 + $0xb8] sm:$0xff]   ;;  %v4386_v16 = vld [vmem:[%s5950_s6 + $0x4] ss:$16 sps:$4 sm:$0xff]   ;;  %s5288_s29 = scalar_lea.vmem %s5966_s1, %s3599_s22 }
  0x2f   : > { %3617 = vmatmul.mubr.msk.bf16.gmra.mrb[4].mxu0 %vm611_vm0, %v484_v27  ;;  %3627 = vmatmul.mubr.msk.bf16.gmra.mrb[4].mxu1 %vm611_vm0, %v484_v27  ;;  %v4389_v17 = vld [vmem:[%s5950_s6 + $0xc] ss:$16 sps:$4 sm:$0xff]   ;;  %v5077_v27 = vrot.slane %v509_v22, %v517_v23  ;;  %v4387_v60 = vld [vmem:[%s5950_s6 + $0x8] ss:$16 sps:$4 sm:$0xff]   ;;  %v4398_v22 = vld [vmem:[%s5950_s6 + $0x44] ss:$16 sps:$4 sm:$0xff]  }
  0x30   : > { %694 = vmatprep.mubr.bf16.mxu0 %v4744_v2  ;;  %827 = vmatprep.mubr.bf16.mxu1 %v4744_v2  ;;  %v4395_v3 = vld [vmem:[%s5950_s6 + $0x2c] ss:$16 sps:$4 sm:$0xff]  }
  0x31   : > { %3872 = vmatpush3.bf16.msra.mxu0 %v4361_v34  ;;  %3948 = vmatpush3.bf16.msra.mxu1 %v4363_v36 }
  0x32   : > { %3873 = vmatprep.subr.bf16.mxu0 %v4364_v37  ;;  %3949 = vmatprep.subr.bf16.mxu1 %v4366_v40 }
  0x35   : > { %3874 = vmatpush3.bf16.msra.mxu0 %v4365_v39  ;;  %3950 = vmatpush3.bf16.msra.mxu1 %v4367_v41 }
  0x36   : > { %3875 = vmatprep.subr.bf16.mxu0 %v4368_v44  ;;  %3951 = vmatprep.subr.bf16.mxu1 %v4370_v46 }
  0x37   : > { %3618 = vmatmul.mubr.msk.bf16.gmra.mrb[8].mxu0 %vm611_vm0, %v485_v38  ;;  %3628 = vmatmul.mubr.msk.bf16.gmra.mrb[8].mxu1 %vm611_vm0, %v485_v38 }
  0x38   : > { %704 = vmatprep.mubr.bf16.mxu0 %v4744_v2  ;;  %837 = vmatprep.mubr.bf16.mxu1 %v4744_v2 }
  0x39   : > { %3876 = vmatpush3.bf16.msra.mxu0 %v4369_v45  ;;  %3952 = vmatpush3.bf16.msra.mxu1 %v4371_v47 }
  0x3a   : > { %3877 = vmatprep.subr.bf16.mxu0 %v4372_v48  ;;  %3953 = vmatprep.subr.bf16.mxu1 %v4374_v51 }
  0x3d   : > { %3878 = vmatpush3.bf16.msra.mxu0 %v4373_v50  ;;  %3954 = vmatpush3.bf16.msra.mxu1 %v4375_v52 }
  0x3e   : > { %3879 = vmatprep.subr.bf16.mxu0 %v4376_v55  ;;  %3955 = vmatprep.subr.bf16.mxu1 %v4378_v57 }
  0x3f   : > { %3619 = vmatmul.mubr.msk.bf16.gmra.mrb[12].mxu0 %vm611_vm0, %v486_v49  ;;  %3629 = vmatmul.mubr.msk.bf16.gmra.mrb[12].mxu1 %vm611_vm0, %v486_v49 }
  0x40   : > { %714 = vmatprep.mubr.bf16.mxu0 %v4744_v2  ;;  %847 = vmatprep.mubr.bf16.mxu1 %v4744_v2 }
  0x41   : > { %3880 = vmatpush3.bf16.msra.mxu0 %v4377_v56  ;;  %3956 = vmatpush3.bf16.msra.mxu1 %v4379_v58 }
  0x42   : > { %3881 = vmatprep.subr.bf16.mxu0 %v4380_v12  ;;  %3957 = vmatprep.subr.bf16.mxu1 %v4382_v14 }
  0x45   : > { %3882 = vmatpush3.bf16.msra.mxu0 %v4381_v13  ;;  %3958 = vmatpush3.bf16.msra.mxu1 %v4383_v15  ;;  %v4390_v13 = vld [vmem:[%s5950_s6 + $0x20] ss:$16 sps:$4 sm:$0xff]  }
  0x46   : > { %1924 = vmatprep.subr.bf16.mxu0 %v4386_v16  ;;  %2057 = vmatprep.subr.bf16.mxu1 %v4389_v17  ;;  %v4393_v17 = vld [vmem:[%s5950_s6 + $0x28] ss:$16 sps:$4 sm:$0xff]  }
  0x47   : > { %3620 = vmatmul.mubr.msk.bf16.gmra.mrb[16].mxu0 %vm611_vm0, %v487_v59  ;;  %3630 = vmatmul.mubr.msk.bf16.gmra.mrb[16].mxu1 %vm611_vm0, %v487_v59  ;;  %v4384_v59 = vld [vmem:[%s5950_s6] ss:$16 sps:$4 sm:$0xff]  }
  0x48   : > { %724 = vmatprep.mubr.bf16.mxu0 %v4744_v2  ;;  %857 = vmatprep.mubr.bf16.mxu1 %v4744_v2 }
  0x4f   : > { %3621 = vmatmul.mubr.msk.bf16.gmra.mrb[20].mxu0 %vm611_vm0, %v488_v62  ;;  %3631 = vmatmul.mubr.msk.bf16.gmra.mrb[20].mxu1 %vm611_vm0, %v488_v62 }
  0x50   : > { %734 = vmatprep.mubr.bf16.mxu0 %v4744_v2  ;;  %867 = vmatprep.mubr.bf16.mxu1 %v4744_v2 }
  0x57   : > { %3622 = vmatmul.mubr.msk.bf16.gmra.mrb[24].mxu0 %vm611_vm0, %v489_v1  ;;  %3632 = vmatmul.mubr.msk.bf16.gmra.mrb[24].mxu1 %vm611_vm0, %v489_v1  ;;  %v4392_v1 = vld [vmem:[%s5950_s6 + $0x24] ss:$16 sps:$4 sm:$0xff]  }
  0x58   : > { %744 = vmatprep.mubr.bf16.mxu0 %v4744_v2  ;;  %877 = vmatprep.mubr.bf16.mxu1 %v4744_v2 }
  0x5f   : > { %3623 = vmatmul.mubr.msk.bf16.gmra.mrb[28].mxu0 %vm611_vm0, %v490_v5  ;;  %3633 = vmatmul.mubr.msk.bf16.gmra.mrb[28].mxu1 %vm611_vm0, %v490_v5 }
  0x60   : > { %754 = vmatprep.mubr.bf16.mxu0 %v4744_v2  ;;  %887 = vmatprep.mubr.bf16.mxu1 %v4744_v2 }
  0x67   : > { %3624 = vmatmul.mubr.msk.bf16.gmra.mrb[32].mxu0 %vm611_vm0, %v491_v8  ;;  %3634 = vmatmul.mubr.msk.bf16.gmra.mrb[32].mxu1 %vm611_vm0, %v491_v8 }
  0x68   : > { %764 = vmatprep.mubr.bf16.mxu0 %v4744_v2  ;;  %897 = vmatprep.mubr.bf16.mxu1 %v4744_v2 }
  0x6f   : > { %3625 = vmatmul.mubr.msk.bf16.gmra.mrb[36].mxu0 %vm611_vm0, %v492_v11  ;;  %3635 = vmatmul.mubr.msk.bf16.gmra.mrb[36].mxu1 %vm611_vm0, %v492_v11 }
  0xfa   : > { %v676_v29 = vpop.f32.mrb[0].mxu0  ;;  %v809_v30 = vpop.f32.mrb[0].mxu1 }
  0xfb   : > { %v677_v31 = vadd.f32 %v676_v29, %v5069_v25  ;;  %v810_v32 = vadd.f32 %v809_v30, %v5073_v26  ;;  %v678_v33 = vpop.f32.mrb[1].mxu0  ;;  %v811_v34 = vpop.f32.mrb[1].mxu1 }
  0xfc   : > { %v679_v35 = vadd.f32 %v678_v33, %v5077_v27  ;;  %v812_v36 = vadd.f32 %v811_v34, %v5081_v28  ;;  %v680_v37 = vpop.f32.mrb[2].mxu0  ;;  %v813_v38 = vpop.f32.mrb[2].mxu1 }
  0xfd   : > { %v910_v39 = vmax.f32 %v810_v32, 0.0  ;;  %v681_v40 = vadd.f32 %v680_v37, %v5069_v25  ;;  %v814_v41 = vadd.f32 %v813_v38, %v5073_v26  ;;  %v682_v42 = vpop.f32.mrb[3].mxu0  ;;  %v815_v43 = vpop.f32.mrb[3].mxu1  ;;  %v908_v47 = vmax.f32 %v677_v31, 0.0  ;;  %v4401_v32 = vld [vmem:[%s5950_s6 + $0x4c] ss:$16 sps:$4 sm:$0xff]  }
  0xfe   : > { %v911_v44 = vmax.f32 %v812_v36, 0.0  ;;  %v683_v45 = vadd.f32 %v682_v42, %v5077_v27  ;;  %v816_v46 = vadd.f32 %v815_v43, %v5081_v28  ;;  %v909_v50 = vmax.f32 %v679_v35, 0.0  ;;  %v4396_v42 = vld [vmem:[%s5950_s6 + $0x40] ss:$16 sps:$4 sm:$0xff]   ;;  %v4399_v43 = vld [vmem:[%s5950_s6 + $0x48] ss:$16 sps:$4 sm:$0xff]  }
  0xff   : > { %v912_v48 = vmax.f32 %v681_v40, 0.0  ;;  %v914_v49 = vmax.f32 %v814_v41, 0.0 }
 0x100   : > { %v913_v51 = vmax.f32 %v683_v45, 0.0  ;;  %v915_v52 = vmax.f32 %v816_v46, 0.0 }
 0x101   : > { %v988_v53 = vpack.c.bf16 %v912_v48, %v908_v47  ;;  %v990_v54 = vpack.c.bf16 %v914_v49, %v910_v39  ;;  %v4404_v48 = vld [vmem:[%s5950_s6 + $0x64] ss:$16 sps:$4 sm:$0xff]   ;;  %v4407_v49 = vld [vmem:[%s5950_s6 + $0x6c] ss:$16 sps:$4 sm:$0xff]  }
 0x102   : > { %v989_v55 = vpack.c.bf16 %v913_v51, %v909_v50  ;;  %v991_v56 = vpack.c.bf16 %v915_v52, %v911_v44  ;;  %v686_v57 = vpop.f32.mrb[4].mxu0  ;;  %v819_v58 = vpop.f32.mrb[4].mxu1 }
 0x103   : > { %v687_v61 = vadd.f32 %v686_v57, %v5069_v25  ;;  %v820_v62 = vadd.f32 %v819_v58, %v5073_v26  ;;  %v688_v63 = vpop.f32.mrb[5].mxu0  ;;  %v821_v0 = vpop.f32.mrb[5].mxu1 }
 0x104   : > { %v689_v4 = vadd.f32 %v688_v63, %v5077_v27  ;;  %v822_v5 = vadd.f32 %v821_v0, %v5081_v28  ;;  %v690_v6 = vpop.f32.mrb[6].mxu0  ;;  %v823_v7 = vpop.f32.mrb[6].mxu1  ;;  %1323 = vmatprep.mubr.bf16.mxu0 %v989_v55  ;;  %1436 = vmatprep.mubr.bf16.mxu1 %v991_v56  ;;  %v4405_v63 = vld [vmem:[%s5950_s6 + $0x68] ss:$16 sps:$4 sm:$0xff]   ;;  %v4410_v0 = vld [vmem:[%s5950_s6 + $0x84] ss:$16 sps:$4 sm:$0xff]  }
 0x105   : > { %v918_v8 = vmax.f32 %v820_v62, 0.0  ;;  %v691_v9 = vadd.f32 %v690_v6, %v5069_v25  ;;  %v824_v10 = vadd.f32 %v823_v7, %v5073_v26  ;;  %v692_v11 = vpop.f32.mrb[7].mxu0  ;;  %v825_v12 = vpop.f32.mrb[7].mxu1  ;;  %1324 = vmatmul.mubr.bf16.vlgmr.msra.gmra.mrb[40].mxu0 %v988_v53  ;;  %1437 = vmatmul.mubr.bf16.vlgmr.msra.gmra.mrb[40].mxu1 %v990_v54  ;;  %v916_v29 = vmax.f32 %v687_v61, 0.0 }
 0x106   : > { %v919_v14 = vmax.f32 %v822_v5, 0.0  ;;  %v693_v15 = vadd.f32 %v692_v11, %v5077_v27  ;;  %v826_v16 = vadd.f32 %v825_v12, %v5081_v28  ;;  %1925 = vmatpush1.bf16.msra.mxu0 %v4384_v59  ;;  %2058 = vmatpush1.bf16.msra.mxu1 %v4387_v60  ;;  %v917_v33 = vmax.f32 %v689_v4, 0.0  ;;  %v4402_v59 = vld [vmem:[%s5950_s6 + $0x60] ss:$16 sps:$4 sm:$0xff]   ;;  %v4413_v5 = vld [vmem:[%s5950_s6 + $0x8c] ss:$16 sps:$4 sm:$0xff]  }
 0x107   : > { %v920_v30 = vmax.f32 %v691_v9, 0.0  ;;  %v922_v31 = vmax.f32 %v824_v10, 0.0  ;;  %1926 = vmatprep.subr.bf16.mxu0 %v4392_v1  ;;  %2059 = vmatprep.subr.bf16.mxu1 %v4395_v3 }
 0x108   : > { %v921_v34 = vmax.f32 %v693_v15, 0.0  ;;  %v923_v35 = vmax.f32 %v826_v16, 0.0  ;;  %v4408_v15 = vld [vmem:[%s5950_s6 + $0x80] ss:$16 sps:$4 sm:$0xff]   ;;  %v4411_v16 = vld [vmem:[%s5950_s6 + $0x88] ss:$16 sps:$4 sm:$0xff]  }
 0x109   : > { %v992_v36 = vpack.c.bf16 %v920_v30, %v916_v29  ;;  %v994_v37 = vpack.c.bf16 %v922_v31, %v918_v8 }
 0x10a   : > { %v993_v38 = vpack.c.bf16 %v921_v34, %v917_v33  ;;  %v995_v39 = vpack.c.bf16 %v923_v35, %v919_v14  ;;  %v696_v40 = vpop.f32.mrb[8].mxu0  ;;  %v829_v41 = vpop.f32.mrb[8].mxu1  ;;  %1927 = vmatpush1.bf16.msra.mxu0 %v4390_v13  ;;  %2060 = vmatpush1.bf16.msra.mxu1 %v4393_v17 }
 0x10b   : > { %v697_v44 = vadd.f32 %v696_v40, %v5069_v25  ;;  %v830_v45 = vadd.f32 %v829_v41, %v5073_v26  ;;  %v698_v46 = vpop.f32.mrb[9].mxu0  ;;  %v831_v47 = vpop.f32.mrb[9].mxu1  ;;  %1928 = vmatprep.subr.bf16.mxu0 %v4398_v22  ;;  %2061 = vmatprep.subr.bf16.mxu1 %v4401_v32 }
 0x10c   : > { %v699_v50 = vadd.f32 %v698_v46, %v5077_v27  ;;  %v832_v51 = vadd.f32 %v831_v47, %v5081_v28  ;;  %v700_v52 = vpop.f32.mrb[10].mxu0  ;;  %v833_v53 = vpop.f32.mrb[10].mxu1  ;;  %1331 = vmatprep.mubr.bf16.mxu0 %v993_v38  ;;  %1444 = vmatprep.mubr.bf16.mxu1 %v995_v39 }
 0x10d   : > { %v926_v54 = vmax.f32 %v830_v45, 0.0  ;;  %v701_v55 = vadd.f32 %v700_v52, %v5069_v25  ;;  %v834_v56 = vadd.f32 %v833_v53, %v5073_v26  ;;  %v702_v57 = vpop.f32.mrb[11].mxu0  ;;  %v835_v58 = vpop.f32.mrb[11].mxu1  ;;  %1332 = vmatmul.mubr.bf16.gmra.mrb[44].mxu0 %v992_v36  ;;  %1445 = vmatmul.mubr.bf16.gmra.mrb[44].mxu1 %v994_v37  ;;  %v924_v1 = vmax.f32 %v697_v44, 0.0 }
 0x10e   : > { %v927_v60 = vmax.f32 %v832_v51, 0.0  ;;  %v703_v61 = vadd.f32 %v702_v57, %v5077_v27  ;;  %v836_v62 = vadd.f32 %v835_v58, %v5081_v28  ;;  %1929 = vmatpush1.bf16.msra.mxu0 %v4396_v42  ;;  %2062 = vmatpush1.bf16.msra.mxu1 %v4399_v43  ;;  %v925_v6 = vmax.f32 %v699_v50, 0.0 }
 0x10f   : > { %v928_v3 = vmax.f32 %v701_v55, 0.0  ;;  %v930_v4 = vmax.f32 %v834_v56, 0.0  ;;  %1930 = vmatprep.subr.bf16.mxu0 %v4404_v48  ;;  %2063 = vmatprep.subr.bf16.mxu1 %v4407_v49 }
 0x110   : > { %v929_v7 = vmax.f32 %v703_v61, 0.0  ;;  %v931_v8 = vmax.f32 %v836_v62, 0.0 }
 0x111   : > { %v996_v9 = vpack.c.bf16 %v928_v3, %v924_v1  ;;  %v998_v10 = vpack.c.bf16 %v930_v4, %v926_v54 }
 0x112   : > { %v997_v11 = vpack.c.bf16 %v929_v7, %v925_v6  ;;  %v999_v12 = vpack.c.bf16 %v931_v8, %v927_v60  ;;  %v706_v13 = vpop.f32.mrb[12].mxu0  ;;  %v839_v14 = vpop.f32.mrb[12].mxu1  ;;  %1931 = vmatpush1.bf16.msra.mxu0 %v4402_v59  ;;  %2064 = vmatpush1.bf16.msra.mxu1 %v4405_v63 }
 0x113   : > { %v707_v17 = vadd.f32 %v706_v13, %v5069_v25  ;;  %v840_v22 = vadd.f32 %v839_v14, %v5073_v26  ;;  %v708_v29 = vpop.f32.mrb[13].mxu0  ;;  %v841_v30 = vpop.f32.mrb[13].mxu1  ;;  %1932 = vmatprep.subr.bf16.mxu0 %v4410_v0  ;;  %2065 = vmatprep.subr.bf16.mxu1 %v4413_v5 }
 0x114   : > { %v709_v31 = vadd.f32 %v708_v29, %v5077_v27  ;;  %v842_v32 = vadd.f32 %v841_v30, %v5081_v28  ;;  %v710_v33 = vpop.f32.mrb[14].mxu0  ;;  %v843_v34 = vpop.f32.mrb[14].mxu1  ;;  %1339 = vmatprep.mubr.bf16.mxu0 %v997_v11  ;;  %1452 = vmatprep.mubr.bf16.mxu1 %v999_v12 }
 0x115   : > { %v934_v35 = vmax.f32 %v840_v22, 0.0  ;;  %v711_v36 = vadd.f32 %v710_v33, %v5069_v25  ;;  %v844_v37 = vadd.f32 %v843_v34, %v5073_v26  ;;  %v712_v38 = vpop.f32.mrb[15].mxu0  ;;  %v845_v39 = vpop.f32.mrb[15].mxu1  ;;  %1340 = vmatmul.mubr.bf16.gmra.mrb[48].mxu0 %v996_v9  ;;  %1453 = vmatmul.mubr.bf16.gmra.mrb[48].mxu1 %v998_v10  ;;  %v932_v43 = vmax.f32 %v707_v17, 0.0 }
 0x116   : > { %v935_v40 = vmax.f32 %v842_v32, 0.0  ;;  %v713_v41 = vadd.f32 %v712_v38, %v5077_v27  ;;  %v846_v42 = vadd.f32 %v845_v39, %v5081_v28  ;;  %1933 = vmatpush1.bf16.msra.mxu0 %v4408_v15  ;;  %2066 = vmatpush1.bf16.msra.mxu1 %v4411_v16  ;;  %v933_v46 = vmax.f32 %v709_v31, 0.0 }
 0x117   : > { %v936_v44 = vmax.f32 %v711_v36, 0.0  ;;  %v938_v45 = vmax.f32 %v844_v37, 0.0 }
 0x118   : > { %v937_v47 = vmax.f32 %v713_v41, 0.0  ;;  %v939_v48 = vmax.f32 %v846_v42, 0.0 }
 0x119   : > { %v1000_v49 = vpack.c.bf16 %v936_v44, %v932_v43  ;;  %v1002_v50 = vpack.c.bf16 %v938_v45, %v934_v35 }
 0x11a   : > { %v1001_v51 = vpack.c.bf16 %v937_v47, %v933_v46  ;;  %v1003_v52 = vpack.c.bf16 %v939_v48, %v935_v40  ;;  %v716_v53 = vpop.f32.mrb[16].mxu0  ;;  %v849_v54 = vpop.f32.mrb[16].mxu1 }
 0x11b   : > { %v717_v55 = vadd.f32 %v716_v53, %v5069_v25  ;;  %v850_v56 = vadd.f32 %v849_v54, %v5073_v26  ;;  %v718_v57 = vpop.f32.mrb[17].mxu0  ;;  %v851_v58 = vpop.f32.mrb[17].mxu1 }
 0x11c   : > { %v719_v59 = vadd.f32 %v718_v57, %v5077_v27  ;;  %v852_v60 = vadd.f32 %v851_v58, %v5081_v28  ;;  %v720_v61 = vpop.f32.mrb[18].mxu0  ;;  %v853_v62 = vpop.f32.mrb[18].mxu1  ;;  %1347 = vmatprep.mubr.bf16.mxu0 %v1001_v51  ;;  %1460 = vmatprep.mubr.bf16.mxu1 %v1003_v52 }
 0x11d   : > { %v942_v63 = vmax.f32 %v850_v56, 0.0  ;;  %v721_v0 = vadd.f32 %v720_v61, %v5069_v25  ;;  %v854_v1 = vadd.f32 %v853_v62, %v5073_v26  ;;  %v722_v3 = vpop.f32.mrb[19].mxu0  ;;  %v855_v4 = vpop.f32.mrb[19].mxu1  ;;  %1348 = vmatmul.mubr.bf16.gmra.mrb[52].mxu0 %v1000_v49  ;;  %1461 = vmatmul.mubr.bf16.gmra.mrb[52].mxu1 %v1002_v50  ;;  %v940_v8 = vmax.f32 %v717_v55, 0.0 }
 0x11e   : > { %v943_v5 = vmax.f32 %v852_v60, 0.0  ;;  %v723_v6 = vadd.f32 %v722_v3, %v5077_v27  ;;  %v856_v7 = vadd.f32 %v855_v4, %v5081_v28  ;;  %v941_v11 = vmax.f32 %v719_v59, 0.0 }
 0x11f   : > { %v944_v9 = vmax.f32 %v721_v0, 0.0  ;;  %v946_v10 = vmax.f32 %v854_v1, 0.0 }
 0x120   : > { %v945_v12 = vmax.f32 %v723_v6, 0.0  ;;  %v947_v13 = vmax.f32 %v856_v7, 0.0 }
 0x121   : > { %v1004_v14 = vpack.c.bf16 %v944_v9, %v940_v8  ;;  %v1006_v15 = vpack.c.bf16 %v946_v10, %v942_v63 }
 0x122   : > { %v1005_v16 = vpack.c.bf16 %v945_v12, %v941_v11  ;;  %v1007_v17 = vpack.c.bf16 %v947_v13, %v943_v5  ;;  %v726_v22 = vpop.f32.mrb[20].mxu0  ;;  %v859_v29 = vpop.f32.mrb[20].mxu1 }
 0x123   : > { %v727_v30 = vadd.f32 %v726_v22, %v5069_v25  ;;  %v860_v31 = vadd.f32 %v859_v29, %v5073_v26  ;;  %v728_v32 = vpop.f32.mrb[21].mxu0  ;;  %v861_v33 = vpop.f32.mrb[21].mxu1 }
 0x124   : > { %v729_v34 = vadd.f32 %v728_v32, %v5077_v27  ;;  %v862_v35 = vadd.f32 %v861_v33, %v5081_v28  ;;  %v730_v36 = vpop.f32.mrb[22].mxu0  ;;  %v863_v37 = vpop.f32.mrb[22].mxu1  ;;  %1355 = vmatprep.mubr.bf16.mxu0 %v1005_v16  ;;  %1468 = vmatprep.mubr.bf16.mxu1 %v1007_v17 }
 0x125   : > { %v950_v38 = vmax.f32 %v860_v31, 0.0  ;;  %v731_v39 = vadd.f32 %v730_v36, %v5069_v25  ;;  %v864_v40 = vadd.f32 %v863_v37, %v5073_v26  ;;  %v732_v41 = vpop.f32.mrb[23].mxu0  ;;  %v865_v42 = vpop.f32.mrb[23].mxu1  ;;  %1356 = vmatmul.mubr.bf16.gmra.mrb[56].mxu0 %v1004_v14  ;;  %1469 = vmatmul.mubr.bf16.gmra.mrb[56].mxu1 %v1006_v15  ;;  %v948_v46 = vmax.f32 %v727_v30, 0.0 }
 0x126   : > { %v951_v43 = vmax.f32 %v862_v35, 0.0  ;;  %v733_v44 = vadd.f32 %v732_v41, %v5077_v27  ;;  %v866_v45 = vadd.f32 %v865_v42, %v5081_v28  ;;  %v949_v49 = vmax.f32 %v729_v34, 0.0 }
 0x127   : > { %v952_v47 = vmax.f32 %v731_v39, 0.0  ;;  %v954_v48 = vmax.f32 %v864_v40, 0.0 }
 0x128   : > { %v953_v50 = vmax.f32 %v733_v44, 0.0  ;;  %v955_v51 = vmax.f32 %v866_v45, 0.0 }
 0x129   : > { %v1008_v52 = vpack.c.bf16 %v952_v47, %v948_v46  ;;  %v1010_v53 = vpack.c.bf16 %v954_v48, %v950_v38 }
 0x12a   : > { %v1009_v54 = vpack.c.bf16 %v953_v50, %v949_v49  ;;  %v1011_v55 = vpack.c.bf16 %v955_v51, %v951_v43  ;;  %v736_v56 = vpop.f32.mrb[24].mxu0  ;;  %v869_v57 = vpop.f32.mrb[24].mxu1 }
 0x12b   : > { %v737_v58 = vadd.f32 %v736_v56, %v5069_v25  ;;  %v870_v59 = vadd.f32 %v869_v57, %v5073_v26  ;;  %v738_v60 = vpop.f32.mrb[25].mxu0  ;;  %v871_v61 = vpop.f32.mrb[25].mxu1 }
 0x12c   : > { %v739_v62 = vadd.f32 %v738_v60, %v5077_v27  ;;  %v872_v63 = vadd.f32 %v871_v61, %v5081_v28  ;;  %v740_v0 = vpop.f32.mrb[26].mxu0  ;;  %v873_v1 = vpop.f32.mrb[26].mxu1  ;;  %1363 = vmatprep.mubr.bf16.mxu0 %v1009_v54  ;;  %1476 = vmatprep.mubr.bf16.mxu1 %v1011_v55 }
 0x12d   : > { %v958_v3 = vmax.f32 %v870_v59, 0.0  ;;  %v741_v4 = vadd.f32 %v740_v0, %v5069_v25  ;;  %v874_v5 = vadd.f32 %v873_v1, %v5073_v26  ;;  %v742_v6 = vpop.f32.mrb[27].mxu0  ;;  %v875_v7 = vpop.f32.mrb[27].mxu1  ;;  %1364 = vmatmul.mubr.bf16.gmra.mrb[60].mxu0 %v1008_v52  ;;  %1477 = vmatmul.mubr.bf16.gmra.mrb[60].mxu1 %v1010_v53  ;;  %v956_v11 = vmax.f32 %v737_v58, 0.0 }
 0x12e   : > { %v959_v8 = vmax.f32 %v872_v63, 0.0  ;;  %v743_v9 = vadd.f32 %v742_v6, %v5077_v27  ;;  %v876_v10 = vadd.f32 %v875_v7, %v5081_v28  ;;  %v957_v14 = vmax.f32 %v739_v62, 0.0 }
 0x12f   : > { %v960_v12 = vmax.f32 %v741_v4, 0.0  ;;  %v962_v13 = vmax.f32 %v874_v5, 0.0 }
 0x130   : > { %v961_v15 = vmax.f32 %v743_v9, 0.0  ;;  %v963_v16 = vmax.f32 %v876_v10, 0.0 }
 0x131   : > { %v1012_v17 = vpack.c.bf16 %v960_v12, %v956_v11  ;;  %v1014_v22 = vpack.c.bf16 %v962_v13, %v958_v3 }
 0x132   : > { %v1013_v29 = vpack.c.bf16 %v961_v15, %v957_v14  ;;  %v1015_v30 = vpack.c.bf16 %v963_v16, %v959_v8  ;;  %v746_v31 = vpop.f32.mrb[28].mxu0  ;;  %v879_v32 = vpop.f32.mrb[28].mxu1 }
 0x133   : > { %v747_v33 = vadd.f32 %v746_v31, %v5069_v25  ;;  %v880_v34 = vadd.f32 %v879_v32, %v5073_v26  ;;  %v748_v35 = vpop.f32.mrb[29].mxu0  ;;  %v881_v36 = vpop.f32.mrb[29].mxu1 }
 0x134   : > { %v749_v37 = vadd.f32 %v748_v35, %v5077_v27  ;;  %v882_v38 = vadd.f32 %v881_v36, %v5081_v28  ;;  %v750_v39 = vpop.f32.mrb[30].mxu0  ;;  %v883_v40 = vpop.f32.mrb[30].mxu1  ;;  %1371 = vmatprep.mubr.bf16.mxu0 %v1013_v29  ;;  %1484 = vmatprep.mubr.bf16.mxu1 %v1015_v30 }
 0x135   : > { %v966_v41 = vmax.f32 %v880_v34, 0.0  ;;  %v751_v42 = vadd.f32 %v750_v39, %v5069_v25  ;;  %v884_v43 = vadd.f32 %v883_v40, %v5073_v26  ;;  %v752_v44 = vpop.f32.mrb[31].mxu0  ;;  %v885_v45 = vpop.f32.mrb[31].mxu1  ;;  %1372 = vmatmul.mubr.bf16.gmra.mrb[64].mxu0 %v1012_v17  ;;  %1485 = vmatmul.mubr.bf16.gmra.mrb[64].mxu1 %v1014_v22  ;;  %v964_v49 = vmax.f32 %v747_v33, 0.0 }
 0x136   : > { %v967_v46 = vmax.f32 %v882_v38, 0.0  ;;  %v753_v47 = vadd.f32 %v752_v44, %v5077_v27  ;;  %v886_v48 = vadd.f32 %v885_v45, %v5081_v28  ;;  %v965_v52 = vmax.f32 %v749_v37, 0.0 }
 0x137   : > { %v968_v50 = vmax.f32 %v751_v42, 0.0  ;;  %v970_v51 = vmax.f32 %v884_v43, 0.0 }
 0x138   : > { %v969_v53 = vmax.f32 %v753_v47, 0.0  ;;  %v971_v54 = vmax.f32 %v886_v48, 0.0 }
 0x139   : > { %v1016_v55 = vpack.c.bf16 %v968_v50, %v964_v49  ;;  %v1018_v56 = vpack.c.bf16 %v970_v51, %v966_v41 }
 0x13a   : > { %v1017_v57 = vpack.c.bf16 %v969_v53, %v965_v52  ;;  %v1019_v58 = vpack.c.bf16 %v971_v54, %v967_v46  ;;  %v756_v59 = vpop.f32.mrb[32].mxu0  ;;  %v889_v60 = vpop.f32.mrb[32].mxu1 }
 0x13b   : > { %v757_v61 = vadd.f32 %v756_v59, %v5069_v25  ;;  %v890_v62 = vadd.f32 %v889_v60, %v5073_v26  ;;  %v758_v63 = vpop.f32.mrb[33].mxu0  ;;  %v891_v0 = vpop.f32.mrb[33].mxu1 }
 0x13c   : > { %v759_v1 = vadd.f32 %v758_v63, %v5077_v27  ;;  %v892_v3 = vadd.f32 %v891_v0, %v5081_v28  ;;  %v760_v4 = vpop.f32.mrb[34].mxu0  ;;  %v893_v5 = vpop.f32.mrb[34].mxu1  ;;  %1379 = vmatprep.mubr.bf16.mxu0 %v1017_v57  ;;  %1492 = vmatprep.mubr.bf16.mxu1 %v1019_v58  ;;  %v4425_v63 = vld [vmem:[%s5950_s6 + $0xcc] ss:$16 sps:$4 sm:$0xff]   ;;  %v4420_v0 = vld [vmem:[%s5950_s6 + $0xc0] ss:$16 sps:$4 sm:$0xff]  }
 0x13d   : > { %v974_v6 = vmax.f32 %v890_v62, 0.0  ;;  %v761_v7 = vadd.f32 %v760_v4, %v5069_v25  ;;  %v894_v8 = vadd.f32 %v893_v5, %v5073_v26  ;;  %v762_v9 = vpop.f32.mrb[35].mxu0  ;;  %v895_v10 = vpop.f32.mrb[35].mxu1  ;;  %1380 = vmatmul.mubr.bf16.gmra.mrb[68].mxu0 %v1016_v55  ;;  %1493 = vmatmul.mubr.bf16.gmra.mrb[68].mxu1 %v1018_v56  ;;  %v972_v14 = vmax.f32 %v757_v61, 0.0  ;;  %v4417_v61 = vld [vmem:[%s5950_s6 + $0xa8] ss:$16 sps:$4 sm:$0xff]  }
 0x13e   : > { %v975_v11 = vmax.f32 %v892_v3, 0.0  ;;  %v763_v12 = vadd.f32 %v762_v9, %v5077_v27  ;;  %v896_v13 = vadd.f32 %v895_v10, %v5081_v28  ;;  %v973_v17 = vmax.f32 %v759_v1, 0.0  ;;  %v4422_v62 = vld [vmem:[%s5950_s6 + $0xc4] ss:$16 sps:$4 sm:$0xff]   ;;  %v4423_v1 = vld [vmem:[%s5950_s6 + $0xc8] ss:$16 sps:$4 sm:$0xff]  }
 0x13f   : > { %v976_v15 = vmax.f32 %v761_v7, 0.0  ;;  %v978_v16 = vmax.f32 %v894_v8, 0.0  ;;  %v4428_v3 = vld [vmem:[%s5950_s6 + $0xe4] ss:$16 sps:$4 sm:$0xff]   ;;  %v4431_v4 = vld [vmem:[%s5950_s6 + $0xec] ss:$16 sps:$4 sm:$0xff]  }
 0x140   : > { %v977_v22 = vmax.f32 %v763_v12, 0.0  ;;  %v979_v29 = vmax.f32 %v896_v13, 0.0  ;;  %v4426_v5 = vld [vmem:[%s5950_s6 + $0xe0] ss:$16 sps:$4 sm:$0xff]  }
 0x141   : > { %v1020_v30 = vpack.c.bf16 %v976_v15, %v972_v14  ;;  %v1022_v31 = vpack.c.bf16 %v978_v16, %v974_v6  ;;  %v4429_v6 = vld [vmem:[%s5950_s6 + $0xe8] ss:$16 sps:$4 sm:$0xff]   ;;  %v4432_v7 = vld [vmem:[%s5952_s8 + $0x40] sm:$0xff]  }
 0x142   : > { %v1021_v32 = vpack.c.bf16 %v977_v22, %v973_v17  ;;  %v1023_v33 = vpack.c.bf16 %v979_v29, %v975_v11  ;;  %v766_v34 = vpop.f32.mrb[36].mxu0  ;;  %v899_v35 = vpop.f32.mrb[36].mxu1  ;;  %v4434_v8 = vld [vmem:[%s5952_s8 + $0xc0] sm:$0xff]  }
 0x143   : > { %v767_v36 = vadd.f32 %v766_v34, %v5069_v25  ;;  %v900_v37 = vadd.f32 %v899_v35, %v5073_v26  ;;  %v768_v38 = vpop.f32.mrb[37].mxu0  ;;  %v901_v39 = vpop.f32.mrb[37].mxu1  ;;  %v5265_v11 = vld [vmem:[%s5949_s5] ss:$0 sm:$0xff] }
 0x144   : > { %v769_v40 = vadd.f32 %v768_v38, %v5077_v27  ;;  %v902_v41 = vadd.f32 %v901_v39, %v5081_v28  ;;  %v770_v42 = vpop.f32.mrb[38].mxu0  ;;  %v903_v43 = vpop.f32.mrb[38].mxu1  ;;  %1387 = vmatprep.mubr.bf16.mxu0 %v1021_v32  ;;  %1500 = vmatprep.mubr.bf16.mxu1 %v1023_v33 }
 0x145   : > { %v982_v44 = vmax.f32 %v900_v37, 0.0  ;;  %v771_v45 = vadd.f32 %v770_v42, %v5069_v25  ;;  %v904_v46 = vadd.f32 %v903_v43, %v5073_v26  ;;  %v772_v47 = vpop.f32.mrb[39].mxu0  ;;  %v905_v48 = vpop.f32.mrb[39].mxu1  ;;  %1388 = vmatmul.mubr.bf16.gmra.mrb[72].mxu0 %v1020_v30  ;;  %1501 = vmatmul.mubr.bf16.gmra.mrb[72].mxu1 %v1022_v31  ;;  %v980_v52 = vmax.f32 %v767_v36, 0.0  ;;  %v4414_v26 = vld [vmem:[%s5950_s6 + $0xa0] ss:$16 sps:$4 sm:$0xff]  }
 0x146   : > { %v983_v49 = vmax.f32 %v902_v41, 0.0  ;;  %v773_v50 = vadd.f32 %v772_v47, %v5077_v27  ;;  %v906_v51 = vadd.f32 %v905_v48, %v5081_v28  ;;  %v981_v55 = vmax.f32 %v769_v40, 0.0  ;;  %v4416_v27 = vld [vmem:[%s5950_s6 + $0xa4] ss:$16 sps:$4 sm:$0xff]   ;;  %v4419_v28 = vld [vmem:[%s5950_s6 + $0xac] ss:$16 sps:$4 sm:$0xff]  }
 0x147   : > { %v984_v53 = vmax.f32 %v771_v45, 0.0  ;;  %v986_v54 = vmax.f32 %v904_v46, 0.0  ;;  %1934 = vmatprep.subr.bf16.mxu0 %v4416_v27  ;;  %2067 = vmatprep.subr.bf16.mxu1 %v4419_v28 }
 0x148   : > { %v985_v56 = vmax.f32 %v773_v50, 0.0  ;;  %v987_v57 = vmax.f32 %v906_v51, 0.0  ;;  %1935 = vmatpush1.bf16.msra.mxu0 %v4414_v26  ;;  %2068 = vmatpush1.bf16.msra.mxu1 %v4417_v61 }
 0x149   : > { %v1024_v58 = vpack.c.bf16 %v984_v53, %v980_v52  ;;  %v1026_v59 = vpack.c.bf16 %v986_v54, %v982_v44  ;;  %1936 = vmatprep.subr.bf16.mxu0 %v4422_v62  ;;  %2069 = vmatprep.subr.bf16.mxu1 %v4425_v63 }
 0x14a   : > { %v1025_v25 = vpack.c.bf16 %v985_v56, %v981_v55  ;;  %v1027_v60 = vpack.c.bf16 %v987_v57, %v983_v49  ;;  %v3819_v55 = vld [vmem:[%s5288_s29] sm:$0xff]  }
 0x14c   : > { %1395 = vmatprep.mubr.bf16.mxu0 %v1025_v25  ;;  %1508 = vmatprep.mubr.bf16.mxu1 %v1027_v60  ;;  %v5300_v25 = vand.u32 127, %v511_v18 }
 0x14d   : > { %1396 = vmatmul.mubr.bf16.gmra.mrb[76].mxu0 %v1024_v58  ;;  %1509 = vmatmul.mubr.bf16.gmra.mrb[76].mxu1 %v1026_v59 }
 0x14e   : > { %1956 = vmatprep.mubr.bf16.mxu0 %v4744_v2  ;;  %2089 = vmatprep.mubr.bf16.mxu1 %v4744_v2  ;;  %vm1539_vm1 = vcmp.lt.s32.totalorder %v5300_v25, 16  ;;  %v4462_v25 = vld [vmem:[%s5952_s8 + $0xf8] sm:$0xff]  }
 0x14f   : > { %1937 = vmatpush1.bf16.msra.mxu0 %v4420_v0  ;;  %2070 = vmatpush1.bf16.msra.mxu1 %v4423_v1  ;;  %v3820_v1 = vunpack.c.l.bf16 %v3819_v55 }
 0x150   : > { %1938 = vmatprep.subr.bf16.mxu0 %v4428_v3  ;;  %2071 = vmatprep.subr.bf16.mxu1 %v4431_v4 }
 0x153   : > { %1939 = vmatpush1.bf16.msra.mxu0 %v4426_v5  ;;  %2072 = vmatpush1.bf16.msra.mxu1 %v4429_v6 }
 0x154   : > { %4019 = vmatprep.subr.bf16.mxu0 %v4432_v7  ;;  %4095 = vmatprep.subr.bf16.mxu1 %v4434_v8  ;;  %v3821_v7 = vunpack.c.h.bf16 %v3819_v55 }
 0x1d8   : > { %v3883_v9 = vpop.f32.mrb[40].mxu0  ;;  %v3959_v10 = vpop.f32.mrb[40].mxu1 }
 0x1d9   : > { %v3884_v12 = vpop.f32.mrb[41].mxu0  ;;  %v3960_v13 = vpop.f32.mrb[41].mxu1 }
 0x1da   : > { %v3885_v14 = vadd.f32 %v3884_v12, %v3883_v9  ;;  %v3961_v15 = vadd.f32 %v3960_v13, %v3959_v10  ;;  %v3886_v16 = vpop.f32.mrb[42].mxu0  ;;  %v3962_v17 = vpop.f32.mrb[42].mxu1 }
 0x1db   : > { %v3887_v22 = vpop.f32.mrb[43].mxu0  ;;  %v3963_v29 = vpop.f32.mrb[43].mxu1 }
 0x1dc   : > { %v1326_v30 = vadd.f32 %v3885_v14, %v5265_v11  ;;  %v3888_v31 = vadd.f32 %v3887_v22, %v3886_v16  ;;  %v3964_v32 = vadd.f32 %v3963_v29, %v3962_v17  ;;  %v3858_v29 = vld [vmem:[%s5288_s29 + $0x8] sm:$0xff]  }
 0x1de   : > { %v5270_v33 = vadd.f32 %v3961_v15, %v1326_v30  ;;  %v1329_v34 = vadd.f32 %v3888_v31, %v5265_v11 }
 0x1e0   : > { %1517 = vst [vmem:[%s5273_s12] sm:$0xff] %v5270_v33  ;;  %v1600_v35 = vmul.f32 0.5, %v5270_v33  ;;  %v5278_v36 = vadd.f32 %v3964_v32, %v1329_v34  ;;  %v3889_v37 = vpop.f32.mrb[44].mxu0  ;;  %v3965_v38 = vpop.f32.mrb[44].mxu1  ;;  %v1540_v30 = vsel %vm1539_vm1, %v5270_v33, 0.0 }
 0x1e1   : > { %v3890_v39 = vpop.f32.mrb[45].mxu0  ;;  %v3966_v40 = vpop.f32.mrb[45].mxu1 }
 0x1e2   : > { %v1620_v41 = vmul.f32 1.442695, %v1600_v35  ;;  %1518 = vst [vmem:[%s5273_s12 + $0x8] sm:$0xff] %v5278_v36  ;;  %v1601_v42 = vmul.f32 0.5, %v5278_v36  ;;  %v3891_v43 = vadd.f32 %v3890_v39, %v3889_v37  ;;  %v3892_v44 = vpop.f32.mrb[46].mxu0  ;;  %v3968_v45 = vpop.f32.mrb[46].mxu1  ;;  %v3967_v46 = vadd.f32 %v3966_v40, %v3965_v38 }
 0x1e3   : > { %v3893_v47 = vpop.f32.mrb[47].mxu0  ;;  %v3969_v48 = vpop.f32.mrb[47].mxu1  ;;  %v1541_v31 = vsel %vm1539_vm1, %v5278_v36, 0.0 }
 0x1e4   : > { %4464 = vpow2.f32 %v1620_v41  ;;  %v1622_v49 = vmul.f32 1.442695, %v1601_v42  ;;  %v1334_v50 = vadd.f32 %v3891_v43, %v5265_v11  ;;  %v3894_v51 = vadd.f32 %v3893_v47, %v3892_v44 }
 0x1e5   : > { %v3970_v52 = vadd.f32 %v3969_v48, %v3968_v45 }
 0x1e6   : > { %4466 = vpow2.f32 %v1622_v49  ;;  %v5290_v53 = vadd.f32 %v3967_v46, %v1334_v50  ;;  %v1337_v54 = vadd.f32 %v3894_v51, %v5265_v11  ;;  %v3824_v46 = vunpack.c.l.bf16 %v3858_v29 }
 0x1e7   : > { %v3825_v51 = vunpack.c.h.bf16 %v3858_v29 }
 0x1e8   : > { %1519 = vst [vmem:[%s5273_s12 + $0x10] sm:$0xff] %v5290_v53  ;;  %v1602_v56 = vmul.f32 0.5, %v5290_v53  ;;  %v5297_v57 = vadd.f32 %v3970_v52, %v1337_v54  ;;  %v3895_v58 = vpop.f32.mrb[48].mxu0  ;;  %v3971_v59 = vpop.f32.mrb[48].mxu1  ;;  %v4433_v52 = vld [vmem:[%s5952_s8] sm:$0xff]  }
 0x1e9   : > { %v3896_v60 = vpop.f32.mrb[49].mxu0  ;;  %v3972_v26 = vpop.f32.mrb[49].mxu1  ;;  %v4435_v54 = vld [vmem:[%s5952_s8 + $0x80] sm:$0xff]  }
 0x1ea   : > { %v1624_v27 = vmul.f32 1.442695, %v1602_v56  ;;  %1520 = vst [vmem:[%s5273_s12 + $0x18] sm:$0xff] %v5297_v57  ;;  %v1603_v28 = vmul.f32 0.5, %v5297_v57  ;;  %v3897_v61 = vadd.f32 %v3896_v60, %v3895_v58  ;;  %v3973_v62 = vadd.f32 %v3972_v26, %v3971_v59  ;;  %v3898_v63 = vpop.f32.mrb[50].mxu0  ;;  %v3974_v0 = vpop.f32.mrb[50].mxu1 }
 0x1eb   : > { %v3899_v3 = vpop.f32.mrb[51].mxu0  ;;  %v3975_v4 = vpop.f32.mrb[51].mxu1  ;;  %v4436_v59 = vld [vmem:[%s5952_s8 + $0x48] sm:$0xff]  }
 0x1ec   : > { %4468 = vpow2.f32 %v1624_v27  ;;  %v1626_v5 = vmul.f32 1.442695, %v1603_v28  ;;  %v1342_v18 = vadd.f32 %v3897_v61, %v5265_v11  ;;  %v3900_v6 = vadd.f32 %v3899_v3, %v3898_v63  ;;  %v4438_v60 = vld [vmem:[%s5952_s8 + $0xc8] sm:$0xff]  }
 0x1ed   : > { %v3976_v8 = vadd.f32 %v3975_v4, %v3974_v0  ;;  %v5349_v0 = vld [vmem:[%s5288_s29 + $0x10] sm:$0xff]  }
 0x1ee   : > { %v4465_v9 = vpop.eup %4464  ;;  %4470 = vpow2.f32 %v1626_v5  ;;  %v5307_v10 = vadd.f32 %v3973_v62, %v1342_v18  ;;  %v1345_v12 = vadd.f32 %v3900_v6, %v5265_v11  ;;  %v1542_v5 = vsel %vm1539_vm1, %v5290_v53, 0.0 }
 0x1ef   : > { %v1660_v13 = vmul.f32 %v4465_v9, %v3820_v1  ;;  %v4437_v1 = vld [vmem:[%s5952_s8 + $0x8] sm:$0xff]   ;;  %v1543_v18 = vsel %vm1539_vm1, %v5297_v57, 0.0 }
 0x1f0   : > { %v4467_v14 = vpop.eup %4466  ;;  %1521 = vst [vmem:[%s5273_s12 + $0x20] sm:$0xff] %v5307_v10  ;;  %v1604_v15 = vmul.f32 0.5, %v5307_v10  ;;  %v5313_v16 = vadd.f32 %v3976_v8, %v1345_v12  ;;  %v3901_v17 = vpop.f32.mrb[52].mxu0  ;;  %v4440_v8 = vld [vmem:[%s5952_s8 + $0x50] sm:$0xff]  }
 0x1f1   : > { %v3977_v22 = vpop.f32.mrb[52].mxu1  ;;  %v1661_v32 = vmul.f32 %v4467_v14, %v3821_v7  ;;  %v3902_v34 = vpop.f32.mrb[53].mxu0  ;;  %v1680_v43 = vadd.f32 %v1660_v13, %v1540_v30  ;;  %v4439_v7 = vld [vmem:[%s5952_s8 + $0x88] sm:$0xff]  }
 0x1f2   : > { %v3978_v35 = vpop.f32.mrb[53].mxu1  ;;  %v1628_v37 = vmul.f32 1.442695, %v1604_v15  ;;  %1522 = vst [vmem:[%s5273_s12 + $0x28] sm:$0xff] %v5313_v16  ;;  %v1605_v38 = vmul.f32 0.5, %v5313_v16  ;;  %v3903_v39 = vadd.f32 %v3902_v34, %v3901_v17  ;;  %v3904_v41 = vpop.f32.mrb[54].mxu0 }
 0x1f3   : > { %v3979_v40 = vadd.f32 %v3978_v35, %v3977_v22  ;;  %v3980_v42 = vpop.f32.mrb[54].mxu1  ;;  %v1681_v44 = vadd.f32 %v1661_v32, %v1541_v31  ;;  %v3905_v45 = vpop.f32.mrb[55].mxu0  ;;  %v4442_v15 = vld [vmem:[%s5952_s8 + $0xd0] sm:$0xff]   ;;  %v3828_v31 = vunpack.c.l.bf16 %v5349_v0 }
 0x1f4   : > { %v3981_v33 = vpop.f32.mrb[55].mxu1  ;;  %4472 = vpow2.f32 %v1628_v37  ;;  %v1630_v47 = vmul.f32 1.442695, %v1605_v38  ;;  %v1350_v36 = vadd.f32 %v3903_v39, %v5265_v11  ;;  %v3906_v48 = vadd.f32 %v3905_v45, %v3904_v41  ;;  %v4443_v41 = vld [vmem:[%s5952_s8 + $0x90] sm:$0xff]   ;;  %v4444_v45 = vld [vmem:[%s5952_s8 + $0x58] sm:$0xff]  }
 0x1f5   : > { %v1700_v49 = vpack.c.bf16 %v1681_v44, %v1680_v43  ;;  %v3982_v50 = vadd.f32 %v3981_v33, %v3980_v42  ;;  %v3829_v39 = vunpack.c.h.bf16 %v5349_v0  ;;  %v4446_v33 = vld [vmem:[%s5952_s8 + $0xd8] sm:$0xff]  }
 0x1f6   : > { %v4469_v55 = vpop.eup %4468  ;;  %4474 = vpow2.f32 %v1630_v47  ;;  %v5332_v56 = vadd.f32 %v3979_v40, %v1350_v36  ;;  %v1353_v58 = vadd.f32 %v3906_v48, %v5265_v11  ;;  %v4441_v40 = vld [vmem:[%s5952_s8 + $0x10] sm:$0xff]  }
 0x1f7   : > { %1957 = vmatmul.mubr.bf16.vlgmr.msra.gmra.mrb[80].mxu0 %v1700_v49  ;;  %2090 = vmatmul.mubr.bf16.vlgmr.msra.gmra.mrb[80].mxu1 %v1700_v49  ;;  %v1662_v26 = vmul.f32 %v4469_v55, %v3824_v46 }
 0x1f8   : > { %v4471_v27 = vpop.eup %4470  ;;  %1523 = vst [vmem:[%s5273_s12 + $0x30] sm:$0xff] %v5332_v56  ;;  %v1606_v28 = vmul.f32 0.5, %v5332_v56  ;;  %v5344_v61 = vadd.f32 %v3982_v50, %v1353_v58  ;;  %v3907_v62 = vpop.f32.mrb[56].mxu0  ;;  %1966 = vmatprep.mubr.bf16.mxu0 %v4744_v2  ;;  %2099 = vmatprep.mubr.bf16.mxu1 %v4744_v2  ;;  %v1544_v58 = vsel %vm1539_vm1, %v5307_v10, 0.0 }
 0x1f9   : > { %v3983_v63 = vpop.f32.mrb[56].mxu1  ;;  %v3908_v3 = vpop.f32.mrb[57].mxu0  ;;  %v1663_v6 = vmul.f32 %v4471_v27, %v3825_v51  ;;  %4020 = vmatpush3.bf16.msra.mxu0 %v4433_v52  ;;  %4096 = vmatpush3.bf16.msra.mxu1 %v4435_v54  ;;  %v1682_v29 = vadd.f32 %v1662_v26, %v1542_v5  ;;  %v5398_v51 = vld [vmem:[%s5288_s29 + $0x18] sm:$0xff]   ;;  %v4448_v27 = vld [vmem:[%s5952_s8 + $0x60] sm:$0xff]  }
 0x1fa   : > { %v3984_v4 = vpop.f32.mrb[57].mxu1  ;;  %v1632_v9 = vmul.f32 1.442695, %v1606_v28  ;;  %1524 = vst [vmem:[%s5273_s12 + $0x38] sm:$0xff] %v5344_v61  ;;  %v1607_v53 = vmul.f32 0.5, %v5344_v61  ;;  %v3909_v12 = vadd.f32 %v3908_v3, %v3907_v62  ;;  %v3910_v14 = vpop.f32.mrb[58].mxu0  ;;  %4021 = vmatprep.subr.bf16.mxu0 %v4436_v59  ;;  %4097 = vmatprep.subr.bf16.mxu1 %v4438_v60 }
 0x1fb   : > { %v3985_v13 = vadd.f32 %v3984_v4, %v3983_v63  ;;  %v3986_v57 = vpop.f32.mrb[58].mxu1  ;;  %v3911_v17 = vpop.f32.mrb[59].mxu0  ;;  %v1683_v30 = vadd.f32 %v1663_v6, %v1543_v18  ;;  %v4445_v52 = vld [vmem:[%s5952_s8 + $0x18] sm:$0xff]   ;;  %v1545_v59 = vsel %vm1539_vm1, %v5313_v16, 0.0  ;;  %v3832_v6 = vunpack.c.l.bf16 %v5398_v51 }
 0x1fc   : > { %v3987_v22 = vpop.f32.mrb[59].mxu1  ;;  %4476 = vpow2.f32 %v1632_v9  ;;  %v1634_v32 = vmul.f32 1.442695, %v1607_v53  ;;  %v1358_v34 = vadd.f32 %v3909_v12, %v5265_v11  ;;  %v3912_v35 = vadd.f32 %v3911_v17, %v3910_v14  ;;  %v4447_v26 = vld [vmem:[%s5952_s8 + $0x98] sm:$0xff]   ;;  %v4449_v14 = vld [vmem:[%s5952_s8 + $0x20] sm:$0xff]  }
 0x1fd   : > { %v3988_v37 = vadd.f32 %v3987_v22, %v3986_v57  ;;  %v1701_v38 = vpack.c.bf16 %v1683_v30, %v1682_v29  ;;  %4022 = vmatpush3.bf16.msra.mxu0 %v4437_v1  ;;  %4098 = vmatpush3.bf16.msra.mxu1 %v4439_v7  ;;  %v4450_v1 = vld [vmem:[%s5952_s8 + $0xe0] sm:$0xff]   ;;  %v4452_v29 = vld [vmem:[%s5952_s8 + $0x68] sm:$0xff]  }
 0x1fe   : > { %v4473_v42 = vpop.eup %4472  ;;  %4478 = vpow2.f32 %v1634_v32  ;;  %v5381_v43 = vadd.f32 %v3985_v13, %v1358_v34  ;;  %v1361_v44 = vadd.f32 %v3912_v35, %v5265_v11  ;;  %4023 = vmatprep.subr.bf16.mxu0 %v4440_v8  ;;  %4099 = vmatprep.subr.bf16.mxu1 %v4442_v15  ;;  %v3833_v13 = vunpack.c.h.bf16 %v5398_v51  ;;  %v4451_v57 = vld [vmem:[%s5952_s8 + $0xa0] sm:$0xff]   ;;  %v4454_v30 = vld [vmem:[%s5952_s8 + $0xe8] sm:$0xff]  }
 0x1ff   : > { %1967 = vmatmul.mubr.bf16.gmra.mrb[84].mxu0 %v1701_v38  ;;  %2100 = vmatmul.mubr.bf16.gmra.mrb[84].mxu1 %v1701_v38  ;;  %v1664_v46 = vmul.f32 %v4473_v42, %v3828_v31 }
 0x200   : > { %v4475_v47 = vpop.eup %4474  ;;  %1525 = vst [vmem:[%s5273_s12 + $0x40] sm:$0xff] %v5381_v43  ;;  %v1608_v36 = vmul.f32 0.5, %v5381_v43  ;;  %v5393_v48 = vadd.f32 %v3988_v37, %v1361_v44  ;;  %v3913_v49 = vpop.f32.mrb[60].mxu0  ;;  %1976 = vmatprep.mubr.bf16.mxu0 %v4744_v2  ;;  %2109 = vmatprep.mubr.bf16.mxu1 %v4744_v2  ;;  %v1546_v44 = vsel %vm1539_vm1, %v5332_v56, 0.0 }
 0x201   : > { %v3989_v50 = vpop.f32.mrb[60].mxu1  ;;  %v3914_v54 = vpop.f32.mrb[61].mxu0  ;;  %v1665_v60 = vmul.f32 %v4475_v47, %v3829_v39  ;;  %4024 = vmatpush3.bf16.msra.mxu0 %v4441_v40  ;;  %4100 = vmatpush3.bf16.msra.mxu1 %v4443_v41  ;;  %v1684_v5 = vadd.f32 %v1664_v46, %v1544_v58  ;;  %v3861_v39 = vld [vmem:[%s5288_s29 + $0x20] sm:$0xff]   ;;  %v4453_v40 = vld [vmem:[%s5952_s8 + $0x28] sm:$0xff]   ;;  %v4456_v47 = vld [vmem:[%s5952_s8 + $0x70] sm:$0xff]  }
 0x202   : > { %v3990_v55 = vpop.f32.mrb[61].mxu1  ;;  %v1636_v28 = vmul.f32 1.442695, %v1608_v36  ;;  %1526 = vst [vmem:[%s5273_s12 + $0x48] sm:$0xff] %v5393_v48  ;;  %v1609_v10 = vmul.f32 0.5, %v5393_v48  ;;  %v3915_v62 = vadd.f32 %v3914_v54, %v3913_v49  ;;  %v3916_v0 = vpop.f32.mrb[62].mxu0  ;;  %4025 = vmatprep.subr.bf16.mxu0 %v4444_v45  ;;  %4101 = vmatprep.subr.bf16.mxu1 %v4446_v33 }
 0x203   : > { %v3991_v63 = vadd.f32 %v3990_v55, %v3989_v50  ;;  %v3992_v16 = vpop.f32.mrb[62].mxu1  ;;  %v3917_v3 = vpop.f32.mrb[63].mxu0  ;;  %v1685_v18 = vadd.f32 %v1665_v60, %v1545_v59  ;;  %v1547_v45 = vsel %vm1539_vm1, %v5344_v61, 0.0  ;;  %v4455_v46 = vld [vmem:[%s5952_s8 + $0xa8] sm:$0xff]   ;;  %v3836_v60 = vunpack.c.l.bf16 %v3861_v39 }
 0x204   : > { %v3993_v4 = vpop.f32.mrb[63].mxu1  ;;  %4480 = vpow2.f32 %v1636_v28  ;;  %v1638_v7 = vmul.f32 1.442695, %v1609_v10  ;;  %v1366_v8 = vadd.f32 %v3915_v62, %v5265_v11  ;;  %v3918_v9 = vadd.f32 %v3917_v3, %v3916_v0  ;;  %v4457_v0 = vld [vmem:[%s5952_s8 + $0x30] sm:$0xff]  }
 0x205   : > { %v3994_v53 = vadd.f32 %v3993_v4, %v3992_v16  ;;  %v1702_v12 = vpack.c.bf16 %v1685_v18, %v1684_v5  ;;  %4026 = vmatpush3.bf16.msra.mxu0 %v4445_v52  ;;  %4102 = vmatpush3.bf16.msra.mxu1 %v4447_v26  ;;  %v4458_v52 = vld [vmem:[%s5952_s8 + $0xf0] sm:$0xff]  }
 0x206   : > { %v4477_v15 = vpop.eup %4476  ;;  %4482 = vpow2.f32 %v1638_v7  ;;  %v5430_v17 = vadd.f32 %v3991_v63, %v1366_v8  ;;  %v1369_v22 = vadd.f32 %v3918_v9, %v5265_v11  ;;  %4027 = vmatprep.subr.bf16.mxu0 %v4448_v27  ;;  %4103 = vmatprep.subr.bf16.mxu1 %v4450_v1  ;;  %v3837_v63 = vunpack.c.h.bf16 %v3861_v39  ;;  %v4459_v16 = vld [vmem:[%s5952_s8 + $0xb0] sm:$0xff]  }
 0x207   : > { %1977 = vmatmul.mubr.bf16.gmra.mrb[88].mxu0 %v1702_v12  ;;  %2110 = vmatmul.mubr.bf16.gmra.mrb[88].mxu1 %v1702_v12  ;;  %v1666_v31 = vmul.f32 %v4477_v15, %v3832_v6 }
 0x208   : > { %v4479_v32 = vpop.eup %4478  ;;  %1527 = vst [vmem:[%s5273_s12 + $0x50] sm:$0xff] %v5430_v17  ;;  %v1610_v34 = vmul.f32 0.5, %v5430_v17  ;;  %v5442_v35 = vadd.f32 %v3994_v53, %v1369_v22  ;;  %v3919_v37 = vpop.f32.mrb[64].mxu0  ;;  %1986 = vmatprep.mubr.bf16.mxu0 %v4744_v2  ;;  %2119 = vmatprep.mubr.bf16.mxu1 %v4744_v2  ;;  %v3862_v53 = vld [vmem:[%s5288_s29 + $0x28] sm:$0xff]  }
 0x209   : > { %v3995_v38 = vpop.f32.mrb[64].mxu1  ;;  %v3920_v41 = vpop.f32.mrb[65].mxu0  ;;  %v1667_v33 = vmul.f32 %v4479_v32, %v3833_v13  ;;  %4028 = vmatpush3.bf16.msra.mxu0 %v4449_v14  ;;  %4104 = vmatpush3.bf16.msra.mxu1 %v4451_v57  ;;  %v1686_v58 = vadd.f32 %v1666_v31, %v1546_v44  ;;  %v1548_v14 = vsel %vm1539_vm1, %v5381_v43, 0.0  ;;  %v1549_v57 = vsel %vm1539_vm1, %v5393_v48, 0.0 }
 0x20a   : > { %v3996_v42 = vpop.f32.mrb[65].mxu1  ;;  %v1640_v36 = vmul.f32 1.442695, %v1610_v34  ;;  %1528 = vst [vmem:[%s5273_s12 + $0x58] sm:$0xff] %v5442_v35  ;;  %v1611_v56 = vmul.f32 0.5, %v5442_v35  ;;  %v3921_v49 = vadd.f32 %v3920_v41, %v3919_v37  ;;  %v3922_v51 = vpop.f32.mrb[66].mxu0  ;;  %4029 = vmatprep.subr.bf16.mxu0 %v4452_v29  ;;  %4105 = vmatprep.subr.bf16.mxu1 %v4454_v30 }
 0x20b   : > { %v3997_v50 = vadd.f32 %v3996_v42, %v3995_v38  ;;  %v3998_v61 = vpop.f32.mrb[66].mxu1  ;;  %v3923_v54 = vpop.f32.mrb[67].mxu0  ;;  %v1687_v59 = vadd.f32 %v1667_v33, %v1547_v45  ;;  %v3841_v33 = vunpack.c.h.bf16 %v3862_v53 }
 0x20c   : > { %v3999_v55 = vpop.f32.mrb[67].mxu1  ;;  %4484 = vpow2.f32 %v1640_v36  ;;  %v1642_v26 = vmul.f32 1.442695, %v1611_v56  ;;  %v1374_v27 = vadd.f32 %v3921_v49, %v5265_v11  ;;  %v3924_v28 = vadd.f32 %v3923_v54, %v3922_v51  ;;  %v3863_v54 = vld [vmem:[%s5288_s29 + $0x30] sm:$0xff]  }
 0x20d   : > { %v4000_v10 = vadd.f32 %v3999_v55, %v3998_v61  ;;  %v1703_v62 = vpack.c.bf16 %v1687_v59, %v1686_v58  ;;  %4030 = vmatpush3.bf16.msra.mxu0 %v4453_v40  ;;  %4106 = vmatpush3.bf16.msra.mxu1 %v4455_v46  ;;  %v3840_v40 = vunpack.c.l.bf16 %v3862_v53  ;;  %v1550_v59 = vsel %vm1539_vm1, %v5430_v17, 0.0 }
 0x20e   : > { %v4481_v1 = vpop.eup %4480  ;;  %4486 = vpow2.f32 %v1642_v26  ;;  %v5475_v3 = vadd.f32 %v3997_v50, %v1374_v27  ;;  %v1377_v4 = vadd.f32 %v3924_v28, %v5265_v11  ;;  %4031 = vmatprep.subr.bf16.mxu0 %v4456_v47  ;;  %4107 = vmatprep.subr.bf16.mxu1 %v4458_v52  ;;  %v3845_v53 = vunpack.c.h.bf16 %v3863_v54 }
 0x20f   : > { %1987 = vmatmul.mubr.bf16.gmra.mrb[92].mxu0 %v1703_v62  ;;  %2120 = vmatmul.mubr.bf16.gmra.mrb[92].mxu1 %v1703_v62  ;;  %v1668_v5 = vmul.f32 %v4481_v1, %v3836_v60  ;;  %v1551_v60 = vsel %vm1539_vm1, %v5442_v35, 0.0 }
 0x210   : > { %v4483_v18 = vpop.eup %4482  ;;  %1529 = vst [vmem:[%s5273_s12 + $0x60] sm:$0xff] %v5475_v3  ;;  %v1612_v6 = vmul.f32 0.5, %v5475_v3  ;;  %v5481_v7 = vadd.f32 %v4000_v10, %v1377_v4  ;;  %v3925_v8 = vpop.f32.mrb[68].mxu0  ;;  %1996 = vmatprep.mubr.bf16.mxu0 %v4744_v2  ;;  %2129 = vmatprep.mubr.bf16.mxu1 %v4744_v2 }
 0x211   : > { %v4001_v9 = vpop.f32.mrb[68].mxu1  ;;  %v3926_v12 = vpop.f32.mrb[69].mxu0  ;;  %v1669_v15 = vmul.f32 %v4483_v18, %v3837_v63  ;;  %4032 = vmatpush3.bf16.msra.mxu0 %v4457_v0  ;;  %4108 = vmatpush3.bf16.msra.mxu1 %v4459_v16  ;;  %v1688_v39 = vadd.f32 %v1668_v5, %v1548_v14  ;;  %v3844_v18 = vunpack.c.l.bf16 %v3863_v54 }
 0x212   : > { %v4002_v13 = vpop.f32.mrb[69].mxu1  ;;  %v1644_v22 = vmul.f32 1.442695, %v1612_v6  ;;  %1530 = vst [vmem:[%s5273_s12 + $0x68] sm:$0xff] %v5481_v7  ;;  %v1613_v29 = vmul.f32 0.5, %v5481_v7  ;;  %v3927_v30 = vadd.f32 %v3926_v12, %v3925_v8  ;;  %v3928_v32 = vpop.f32.mrb[70].mxu0  ;;  %4109 = vmatprep.subr.bf16.mxu1 %v4462_v25 }
 0x213   : > { %v4003_v31 = vadd.f32 %v4002_v13, %v4001_v9  ;;  %v4004_v34 = vpop.f32.mrb[70].mxu1  ;;  %v3929_v37 = vpop.f32.mrb[71].mxu0  ;;  %v1689_v43 = vadd.f32 %v1669_v15, %v1549_v57 }
 0x214   : > { %v4005_v38 = vpop.f32.mrb[71].mxu1  ;;  %4488 = vpow2.f32 %v1644_v22  ;;  %v1646_v48 = vmul.f32 1.442695, %v1613_v29  ;;  %v1382_v41 = vadd.f32 %v3927_v30, %v5265_v11  ;;  %v3930_v42 = vadd.f32 %v3929_v37, %v3928_v32  ;;  %v3864_v32 = vld [vmem:[%s5288_s29 + $0x38] sm:$0xff]  }
 0x215   : > { %v4006_v44 = vadd.f32 %v4005_v38, %v4004_v34  ;;  %v1704_v45 = vpack.c.bf16 %v1689_v43, %v1688_v39  ;;  %v1552_v38 = vsel %vm1539_vm1, %v5475_v3, 0.0  ;;  %v1553_v39 = vsel %vm1539_vm1, %v5481_v7, 0.0 }
 0x216   : > { %v4485_v46 = vpop.eup %4484  ;;  %4490 = vpow2.f32 %v1646_v48  ;;  %v5496_v47 = vadd.f32 %v4003_v31, %v1382_v41  ;;  %v1385_v36 = vadd.f32 %v3930_v42, %v5265_v11  ;;  %v3849_v54 = vunpack.c.h.bf16 %v3864_v32 }
 0x217   : > { %1997 = vmatmul.mubr.bf16.gmra.mrb[96].mxu0 %v1704_v45  ;;  %2130 = vmatmul.mubr.bf16.gmra.mrb[96].mxu1 %v1704_v45  ;;  %v1670_v56 = vmul.f32 %v4485_v46, %v3840_v40 }
 0x218   : > { %v4487_v49 = vpop.eup %4486  ;;  %1531 = vst [vmem:[%s5273_s12 + $0x70] sm:$0xff] %v5496_v47  ;;  %v1614_v50 = vmul.f32 0.5, %v5496_v47  ;;  %v5502_v51 = vadd.f32 %v4006_v44, %v1385_v36  ;;  %v3931_v61 = vpop.f32.mrb[72].mxu0  ;;  %2006 = vmatprep.mubr.bf16.mxu0 %v4744_v2  ;;  %2139 = vmatprep.mubr.bf16.mxu1 %v4744_v2 }
 0x219   : > { %v4007_v52 = vpop.f32.mrb[72].mxu1  ;;  %v3932_v55 = vpop.f32.mrb[73].mxu0  ;;  %v1671_v26 = vmul.f32 %v4487_v49, %v3841_v33  ;;  %v1690_v4 = vadd.f32 %v1670_v56, %v1550_v59  ;;  %v3848_v49 = vunpack.c.l.bf16 %v3864_v32 }
 0x21a   : > { %v4008_v58 = vpop.f32.mrb[73].mxu1  ;;  %v1648_v27 = vmul.f32 1.442695, %v1614_v50  ;;  %1532 = vst [vmem:[%s5273_s12 + $0x78] sm:$0xff] %v5502_v51  ;;  %v1615_v28 = vmul.f32 0.5, %v5502_v51  ;;  %v3933_v10 = vadd.f32 %v3932_v55, %v3931_v61  ;;  %v3934_v63 = vpop.f32.mrb[74].mxu0 }
 0x21b   : > { %v4009_v62 = vadd.f32 %v4008_v58, %v4007_v52  ;;  %v4010_v0 = vpop.f32.mrb[74].mxu1  ;;  %v3935_v16 = vpop.f32.mrb[75].mxu0  ;;  %v1691_v5 = vadd.f32 %v1671_v26, %v1551_v60 }
 0x21c   : > { %v4011_v1 = vpop.f32.mrb[75].mxu1  ;;  %4492 = vpow2.f32 %v1648_v27  ;;  %v1650_v17 = vmul.f32 1.442695, %v1615_v28  ;;  %v1390_v35 = vadd.f32 %v3933_v10, %v5265_v11  ;;  %v3936_v6 = vadd.f32 %v3935_v16, %v3934_v63  ;;  %v3865_v10 = vld [vmem:[%s5288_s29 + $0x40] sm:$0xff]  }
 0x21d   : > { %v4012_v8 = vadd.f32 %v4011_v1, %v4010_v0  ;;  %v1705_v9 = vpack.c.bf16 %v1691_v5, %v1690_v4  ;;  %v1555_v16 = vsel %vm1539_vm1, %v5502_v51, 0.0  ;;  %v3852_v5 = vunpack.c.l.bf16 %v3865_v10 }
 0x21e   : > { %v4489_v12 = vpop.eup %4488  ;;  %4494 = vpow2.f32 %v1650_v17  ;;  %v5517_v13 = vadd.f32 %v4009_v62, %v1390_v35  ;;  %v1393_v14 = vadd.f32 %v3936_v6, %v5265_v11  ;;  %v3853_v35 = vunpack.c.h.bf16 %v3865_v10 }
 0x21f   : > { %2007 = vmatmul.mubr.bf16.gmra.mrb[100].mxu0 %v1705_v9  ;;  %2140 = vmatmul.mubr.bf16.gmra.mrb[100].mxu1 %v1705_v9  ;;  %v1672_v57 = vmul.f32 %v4489_v12, %v3844_v18 }
 0x220   : > { %v4491_v15 = vpop.eup %4490  ;;  %1533 = vst [vmem:[%s5273_s12 + $0x80] sm:$0xff] %v5517_v13  ;;  %v1616_v22 = vmul.f32 0.5, %v5517_v13  ;;  %v5523_v29 = vadd.f32 %v4012_v8, %v1393_v14  ;;  %v3937_v30 = vpop.f32.mrb[76].mxu0  ;;  %2016 = vmatprep.mubr.bf16.mxu0 %v4744_v2  ;;  %2149 = vmatprep.mubr.bf16.mxu1 %v4744_v2 }
 0x221   : > { %v4013_v31 = vpop.f32.mrb[76].mxu1  ;;  %v3938_v34 = vpop.f32.mrb[77].mxu0  ;;  %v1673_v43 = vmul.f32 %v4491_v15, %v3845_v53  ;;  %v1692_v36 = vadd.f32 %v1672_v57, %v1552_v38  ;;  %v1556_v53 = vsel %vm1539_vm1, %v5517_v13, 0.0 }
 0x222   : > { %v4014_v37 = vpop.f32.mrb[77].mxu1  ;;  %v1652_v40 = vmul.f32 1.442695, %v1616_v22  ;;  %1534 = vst [vmem:[%s5273_s12 + $0x88] sm:$0xff] %v5523_v29  ;;  %v1617_v48 = vmul.f32 0.5, %v5523_v29  ;;  %v3939_v41 = vadd.f32 %v3938_v34, %v3937_v30  ;;  %v3940_v44 = vpop.f32.mrb[78].mxu0 }
 0x223   : > { %v4015_v42 = vadd.f32 %v4014_v37, %v4013_v31  ;;  %v4016_v45 = vpop.f32.mrb[78].mxu1  ;;  %v3941_v33 = vpop.f32.mrb[79].mxu0  ;;  %v1693_v56 = vadd.f32 %v1673_v43, %v1553_v39  ;;  %v1557_v12 = vsel %vm1539_vm1, %v5523_v29, 0.0 }
 0x224   : > { %v4017_v46 = vpop.f32.mrb[79].mxu1  ;;  %4496 = vpow2.f32 %v1652_v40  ;;  %v1654_v3 = vmul.f32 1.442695, %v1617_v48  ;;  %v1398_v7 = vadd.f32 %v3939_v41, %v5265_v11  ;;  %v3942_v50 = vadd.f32 %v3941_v33, %v3940_v44  ;;  %v4460_v40 = vld [vmem:[%s5952_s8 + $0x78] sm:$0xff]   ;;  %v1742_v41 = vld [vmem:[%s5951_s7] sm:$0xf] }
 0x225   : > { %v4018_v61 = vadd.f32 %v4017_v46, %v4016_v45  ;;  %v1706_v52 = vpack.c.bf16 %v1693_v56, %v1692_v36  ;;  %4033 = vmatprep.subr.bf16.mxu0 %v4460_v40  ;;  %v4463_v48 = vld [vmem:[%s5952_s8 + $0xb8] sm:$0xff]   ;;  %v5586_v44 = vrot.slane %v1742_v41, %v521_v21  ;;  %v5590_v45 = vrot.slane %v1742_v41, %v517_v23 }
 0x226   : > { %v4493_v55 = vpop.eup %4492  ;;  %4498 = vpow2.f32 %v1654_v3  ;;  %v1511_v58 = vadd.f32 %v4015_v42, %v1398_v7  ;;  %v1401_v59 = vadd.f32 %v3942_v50, %v5265_v11  ;;  %v1554_v11 = vsel %vm1539_vm1, %v5496_v47, 0.0  ;;  %v3866_v47 = vld [vmem:[%s5288_s29 + $0x48] sm:$0xff]   ;;  %4110 = vmatpush3.bf16.msra.mxu1 %v4463_v48 }
 0x227   : > { %2017 = vmatmul.mubr.bf16.gmra.mrb[104].mxu0 %v1706_v52  ;;  %2150 = vmatmul.mubr.bf16.gmra.mrb[104].mxu1 %v1706_v52  ;;  %v1674_v60 = vmul.f32 %v4493_v55, %v3848_v49  ;;  %v3856_v15 = vunpack.c.l.bf16 %v3866_v47  ;;  %v3857_v30 = vunpack.c.h.bf16 %v3866_v47  ;;  %v5582_v42 = vrot.slane %v1742_v41, %v513_v20 }
 0x228   : > { %v4495_v26 = vpop.eup %4494  ;;  %1535 = vst [vmem:[%s5273_s12 + $0x90] sm:$0xff] %v1511_v58  ;;  %v1618_v27 = vmul.f32 0.5, %v1511_v58  ;;  %v1514_v28 = vadd.f32 %v4018_v61, %v1401_v59  ;;  %2026 = vmatprep.mubr.bf16.mxu0 %v4744_v2  ;;  %2159 = vmatprep.mubr.bf16.mxu1 %v4744_v2  ;;  %v1558_v13 = vsel %vm1539_vm1, %v1511_v58, 0.0  ;;  %v5594_v33 = vrot.slane %v1742_v41, %v525_v24 }
 0x229   : > { %v1675_v62 = vmul.f32 %v4495_v26, %v3849_v54  ;;  %v1694_v1 = vadd.f32 %v1674_v60, %v1554_v11 }
 0x22a   : > { %v1656_v63 = vmul.f32 1.442695, %v1618_v27  ;;  %1536 = vst [vmem:[%s5273_s12 + $0x98] sm:$0xff] %v1514_v28  ;;  %v1619_v0 = vmul.f32 0.5, %v1514_v28  ;;  %v1559_v29 = vsel %vm1539_vm1, %v1514_v28, 0.0 }
 0x22b   : > { %v1695_v4 = vadd.f32 %v1675_v62, %v1555_v16 }
 0x22c   : > { %4500 = vpow2.f32 %v1656_v63  ;;  %v1658_v18 = vmul.f32 1.442695, %v1619_v0 }
 0x22d   : > { %v1707_v17 = vpack.c.bf16 %v1695_v4, %v1694_v1 }
 0x22e   : > { %v4497_v6 = vpop.eup %4496  ;;  %4502 = vpow2.f32 %v1658_v18 }
 0x22f   : > { %2027 = vmatmul.mubr.bf16.gmra.mrb[108].mxu0 %v1707_v17  ;;  %2160 = vmatmul.mubr.bf16.gmra.mrb[108].mxu1 %v1707_v17  ;;  %v1676_v8 = vmul.f32 %v4497_v6, %v3852_v5 }
 0x230   : > { %v4499_v9 = vpop.eup %4498  ;;  %2036 = vmatprep.mubr.bf16.mxu0 %v4744_v2  ;;  %2169 = vmatprep.mubr.bf16.mxu1 %v4744_v2 }
 0x231   : > { %v1677_v51 = vmul.f32 %v4499_v9, %v3853_v35  ;;  %v1696_v14 = vadd.f32 %v1676_v8, %v1556_v53 }
 0x233   : > { %v1697_v57 = vadd.f32 %v1677_v51, %v1557_v12 }
 0x235   : > { %v1708_v22 = vpack.c.bf16 %v1697_v57, %v1696_v14 }
 0x236   : > { %v4501_v31 = vpop.eup %4500 }
 0x237   : > { %2037 = vmatmul.mubr.bf16.gmra.mrb[112].mxu0 %v1708_v22  ;;  %2170 = vmatmul.mubr.bf16.gmra.mrb[112].mxu1 %v1708_v22  ;;  %v1678_v32 = vmul.f32 %v4501_v31, %v3856_v15 }
 0x238   : > { %v4503_v34 = vpop.eup %4502  ;;  %2046 = vmatprep.mubr.bf16.mxu0 %v4744_v2  ;;  %2179 = vmatprep.mubr.bf16.mxu1 %v4744_v2  ;;  %v4461_v2 = vld [vmem:[%s5952_s8 + $0x38] sm:$0xff]  }
 0x239   : > { %v1679_v37 = vmul.f32 %v4503_v34, %v3857_v30  ;;  %v1698_v38 = vadd.f32 %v1678_v32, %v1558_v13  ;;  %4034 = vmatpush3.bf16.msra.mxu0 %v4461_v2 }
 0x23b   : > { %v1699_v39 = vadd.f32 %v1679_v37, %v1559_v29 }
 0x23d   : > { %v1709_v43 = vpack.c.bf16 %v1699_v39, %v1698_v38 }
 0x23f   : > { %2047 = vmatmul.mubr.bf16.gmra.mrb[116].mxu0 %v1709_v43  ;;  %2180 = vmatmul.mubr.bf16.gmra.mrb[116].mxu1 %v1709_v43 }
 0x2ca   : > { %v1958_v46 = vpop.f32.mrb[80].mxu0  ;;  %v2091_v36 = vpop.f32.mrb[80].mxu1 }
 0x2cb   : > { %v1959_v56 = vadd.f32 %v1958_v46, %v5582_v42  ;;  %v2092_v49 = vadd.f32 %v2091_v36, %v5586_v44  ;;  %v1960_v20 = vpop.f32.mrb[81].mxu0  ;;  %v2093_v3 = vpop.f32.mrb[81].mxu1 }
 0x2cc   : > { %v1961_v7 = vadd.f32 %v1960_v20, %v5590_v45  ;;  %v2094_v21 = vadd.f32 %v2093_v3, %v5594_v33  ;;  %v1962_v50 = vpop.f32.mrb[82].mxu0  ;;  %v2095_v61 = vpop.f32.mrb[82].mxu1 }
 0x2cd   : > { %v1963_v23 = vadd.f32 %v1962_v50, %v5582_v42  ;;  %v2096_v19 = vadd.f32 %v2095_v61, %v5586_v44  ;;  %v1964_v24 = vpop.f32.mrb[83].mxu0  ;;  %v2097_v52 = vpop.f32.mrb[83].mxu1  ;;  %v2190_v58 = vmax.f32 %v1959_v56, 0.0  ;;  %v2192_v59 = vmax.f32 %v2092_v49, 0.0 }
 0x2ce   : > { %v1965_v54 = vadd.f32 %v1964_v24, %v5590_v45  ;;  %v2098_v55 = vadd.f32 %v2097_v52, %v5594_v33  ;;  %v2191_v27 = vmax.f32 %v1961_v7, 0.0  ;;  %v2193_v28 = vmax.f32 %v2094_v21, 0.0 }
 0x2cf   : > { %v2194_v60 = vmax.f32 %v1963_v23, 0.0  ;;  %v2196_v26 = vmax.f32 %v2096_v19, 0.0 }
 0x2d0   : > { %v2195_v10 = vmax.f32 %v1965_v54, 0.0  ;;  %v2197_v62 = vmax.f32 %v2098_v55, 0.0 }
 0x2d1   : > { %v2270_v63 = vpack.c.bf16 %v2194_v60, %v2190_v58  ;;  %v2272_v0 = vpack.c.bf16 %v2196_v26, %v2192_v59 }
 0x2d2   : > { %v2271_v11 = vpack.c.bf16 %v2195_v10, %v2191_v27  ;;  %v2273_v16 = vpack.c.bf16 %v2197_v62, %v2193_v28  ;;  %v1968_v1 = vpop.f32.mrb[84].mxu0  ;;  %v2101_v4 = vpop.f32.mrb[84].mxu1 }
 0x2d3   : > { %v1969_v5 = vadd.f32 %v1968_v1, %v5582_v42  ;;  %v2102_v18 = vadd.f32 %v2101_v4, %v5586_v44  ;;  %v1970_v17 = vpop.f32.mrb[85].mxu0  ;;  %v2103_v35 = vpop.f32.mrb[85].mxu1 }
 0x2d4   : > { %v1971_v6 = vadd.f32 %v1970_v17, %v5590_v45  ;;  %v2104_v8 = vadd.f32 %v2103_v35, %v5594_v33  ;;  %v1972_v9 = vpop.f32.mrb[86].mxu0  ;;  %v2105_v47 = vpop.f32.mrb[86].mxu1  ;;  %2605 = vmatprep.mubr.bf16.mxu0 %v2271_v11  ;;  %2718 = vmatprep.mubr.bf16.mxu1 %v2273_v16 }
 0x2d5   : > { %v1973_v51 = vadd.f32 %v1972_v9, %v5582_v42  ;;  %v2106_v53 = vadd.f32 %v2105_v47, %v5586_v44  ;;  %v1974_v12 = vpop.f32.mrb[87].mxu0  ;;  %v2107_v14 = vpop.f32.mrb[87].mxu1  ;;  %2606 = vmatmul.mubr.bf16.vlgmr.msra.gmra.mrb[120].mxu0 %v2270_v63  ;;  %2719 = vmatmul.mubr.bf16.vlgmr.msra.gmra.mrb[120].mxu1 %v2272_v0  ;;  %v2198_v22 = vmax.f32 %v1969_v5, 0.0  ;;  %v2200_v30 = vmax.f32 %v2102_v18, 0.0 }
 0x2d6   : > { %v1975_v57 = vadd.f32 %v1974_v12, %v5590_v45  ;;  %v2108_v15 = vadd.f32 %v2107_v14, %v5594_v33  ;;  %v2199_v34 = vmax.f32 %v1971_v6, 0.0  ;;  %v2201_v37 = vmax.f32 %v2104_v8, 0.0 }
 0x2d7   : > { %v2202_v31 = vmax.f32 %v1973_v51, 0.0  ;;  %v2204_v32 = vmax.f32 %v2106_v53, 0.0 }
 0x2d8   : > { %v2203_v13 = vmax.f32 %v1975_v57, 0.0  ;;  %v2205_v29 = vmax.f32 %v2108_v15, 0.0 }
 0x2d9   : > { %v2274_v38 = vpack.c.bf16 %v2202_v31, %v2198_v22  ;;  %v2276_v39 = vpack.c.bf16 %v2204_v32, %v2200_v30 }
 0x2da   : > { %v2275_v43 = vpack.c.bf16 %v2203_v13, %v2199_v34  ;;  %v2277_v40 = vpack.c.bf16 %v2205_v29, %v2201_v37  ;;  %v1978_v2 = vpop.f32.mrb[88].mxu0  ;;  %v2111_v25 = vpop.f32.mrb[88].mxu1 }
 0x2db   : > { %v1979_v48 = vadd.f32 %v1978_v2, %v5582_v42  ;;  %v2112_v41 = vadd.f32 %v2111_v25, %v5586_v44  ;;  %v1980_v46 = vpop.f32.mrb[89].mxu0  ;;  %v2113_v36 = vpop.f32.mrb[89].mxu1 }
 0x2dc   : > { %v1981_v56 = vadd.f32 %v1980_v46, %v5590_v45  ;;  %v2114_v49 = vadd.f32 %v2113_v36, %v5594_v33  ;;  %v1982_v20 = vpop.f32.mrb[90].mxu0  ;;  %v2115_v3 = vpop.f32.mrb[90].mxu1  ;;  %2613 = vmatprep.mubr.bf16.mxu0 %v2275_v43  ;;  %2726 = vmatprep.mubr.bf16.mxu1 %v2277_v40 }
 0x2dd   : > { %v1983_v7 = vadd.f32 %v1982_v20, %v5582_v42  ;;  %v2116_v21 = vadd.f32 %v2115_v3, %v5586_v44  ;;  %v1984_v50 = vpop.f32.mrb[91].mxu0  ;;  %v2117_v61 = vpop.f32.mrb[91].mxu1  ;;  %2614 = vmatmul.mubr.bf16.gmra.mrb[124].mxu0 %v2274_v38  ;;  %2727 = vmatmul.mubr.bf16.gmra.mrb[124].mxu1 %v2276_v39  ;;  %v2206_v24 = vmax.f32 %v1979_v48, 0.0  ;;  %v2208_v52 = vmax.f32 %v2112_v41, 0.0 }
 0x2de   : > { %v1985_v23 = vadd.f32 %v1984_v50, %v5590_v45  ;;  %v2118_v19 = vadd.f32 %v2117_v61, %v5594_v33  ;;  %v2207_v58 = vmax.f32 %v1981_v56, 0.0  ;;  %v2209_v59 = vmax.f32 %v2114_v49, 0.0 }
 0x2df   : > { %v2210_v54 = vmax.f32 %v1983_v7, 0.0  ;;  %v2212_v55 = vmax.f32 %v2116_v21, 0.0 }
 0x2e0   : > { %v2211_v60 = vmax.f32 %v1985_v23, 0.0  ;;  %v2213_v26 = vmax.f32 %v2118_v19, 0.0 }
 0x2e1   : > { %v2278_v27 = vpack.c.bf16 %v2210_v54, %v2206_v24  ;;  %v2280_v28 = vpack.c.bf16 %v2212_v55, %v2208_v52 }
 0x2e2   : > { %v2279_v10 = vpack.c.bf16 %v2211_v60, %v2207_v58  ;;  %v2281_v62 = vpack.c.bf16 %v2213_v26, %v2209_v59  ;;  %v1988_v63 = vpop.f32.mrb[92].mxu0  ;;  %v2121_v0 = vpop.f32.mrb[92].mxu1 }
 0x2e3   : > { %v1989_v11 = vadd.f32 %v1988_v63, %v5582_v42  ;;  %v2122_v16 = vadd.f32 %v2121_v0, %v5586_v44  ;;  %v1990_v1 = vpop.f32.mrb[93].mxu0  ;;  %v2123_v4 = vpop.f32.mrb[93].mxu1 }
 0x2e4   : > { %v1991_v5 = vadd.f32 %v1990_v1, %v5590_v45  ;;  %v2124_v18 = vadd.f32 %v2123_v4, %v5594_v33  ;;  %v1992_v17 = vpop.f32.mrb[94].mxu0  ;;  %v2125_v35 = vpop.f32.mrb[94].mxu1  ;;  %2621 = vmatprep.mubr.bf16.mxu0 %v2279_v10  ;;  %2734 = vmatprep.mubr.bf16.mxu1 %v2281_v62 }
 0x2e5   : > { %v1993_v6 = vadd.f32 %v1992_v17, %v5582_v42  ;;  %v2126_v8 = vadd.f32 %v2125_v35, %v5586_v44  ;;  %v1994_v9 = vpop.f32.mrb[95].mxu0  ;;  %v2127_v47 = vpop.f32.mrb[95].mxu1  ;;  %2622 = vmatmul.mubr.bf16.gmra.mrb[128].mxu0 %v2278_v27  ;;  %2735 = vmatmul.mubr.bf16.gmra.mrb[128].mxu1 %v2280_v28  ;;  %v2214_v12 = vmax.f32 %v1989_v11, 0.0  ;;  %v2216_v14 = vmax.f32 %v2122_v16, 0.0 }
 0x2e6   : > { %v1995_v51 = vadd.f32 %v1994_v9, %v5590_v45  ;;  %v2128_v53 = vadd.f32 %v2127_v47, %v5594_v33  ;;  %v2215_v22 = vmax.f32 %v1991_v5, 0.0  ;;  %v2217_v30 = vmax.f32 %v2124_v18, 0.0 }
 0x2e7   : > { %v2218_v57 = vmax.f32 %v1993_v6, 0.0  ;;  %v2220_v15 = vmax.f32 %v2126_v8, 0.0 }
 0x2e8   : > { %v2219_v31 = vmax.f32 %v1995_v51, 0.0  ;;  %v2221_v32 = vmax.f32 %v2128_v53, 0.0 }
 0x2e9   : > { %v2282_v34 = vpack.c.bf16 %v2218_v57, %v2214_v12  ;;  %v2284_v37 = vpack.c.bf16 %v2220_v15, %v2216_v14 }
 0x2ea   : > { %v2283_v13 = vpack.c.bf16 %v2219_v31, %v2215_v22  ;;  %v2285_v29 = vpack.c.bf16 %v2221_v32, %v2217_v30  ;;  %v1998_v38 = vpop.f32.mrb[96].mxu0  ;;  %v2131_v39 = vpop.f32.mrb[96].mxu1 }
 0x2eb   : > { %v1999_v43 = vadd.f32 %v1998_v38, %v5582_v42  ;;  %v2132_v40 = vadd.f32 %v2131_v39, %v5586_v44  ;;  %v2000_v2 = vpop.f32.mrb[97].mxu0  ;;  %v2133_v25 = vpop.f32.mrb[97].mxu1 }
 0x2ec   : > { %v2001_v48 = vadd.f32 %v2000_v2, %v5590_v45  ;;  %v2134_v41 = vadd.f32 %v2133_v25, %v5594_v33  ;;  %v2002_v46 = vpop.f32.mrb[98].mxu0  ;;  %v2135_v36 = vpop.f32.mrb[98].mxu1  ;;  %2629 = vmatprep.mubr.bf16.mxu0 %v2283_v13  ;;  %2742 = vmatprep.mubr.bf16.mxu1 %v2285_v29 }
 0x2ed   : > { %v2003_v56 = vadd.f32 %v2002_v46, %v5582_v42  ;;  %v2136_v49 = vadd.f32 %v2135_v36, %v5586_v44  ;;  %v2004_v20 = vpop.f32.mrb[99].mxu0  ;;  %v2137_v3 = vpop.f32.mrb[99].mxu1  ;;  %2630 = vmatmul.mubr.bf16.gmra.mrb[132].mxu0 %v2282_v34  ;;  %2743 = vmatmul.mubr.bf16.gmra.mrb[132].mxu1 %v2284_v37  ;;  %v2222_v50 = vmax.f32 %v1999_v43, 0.0  ;;  %v2224_v61 = vmax.f32 %v2132_v40, 0.0 }
 0x2ee   : > { %v2005_v7 = vadd.f32 %v2004_v20, %v5590_v45  ;;  %v2138_v21 = vadd.f32 %v2137_v3, %v5594_v33  ;;  %v2223_v24 = vmax.f32 %v2001_v48, 0.0  ;;  %v2225_v52 = vmax.f32 %v2134_v41, 0.0 }
 0x2ef   : > { %v2226_v23 = vmax.f32 %v2003_v56, 0.0  ;;  %v2228_v19 = vmax.f32 %v2136_v49, 0.0 }
 0x2f0   : > { %v2227_v54 = vmax.f32 %v2005_v7, 0.0  ;;  %v2229_v55 = vmax.f32 %v2138_v21, 0.0 }
 0x2f1   : > { %v2286_v58 = vpack.c.bf16 %v2226_v23, %v2222_v50  ;;  %v2288_v59 = vpack.c.bf16 %v2228_v19, %v2224_v61 }
 0x2f2   : > { %v2287_v60 = vpack.c.bf16 %v2227_v54, %v2223_v24  ;;  %v2289_v26 = vpack.c.bf16 %v2229_v55, %v2225_v52  ;;  %v2008_v27 = vpop.f32.mrb[100].mxu0  ;;  %v2141_v28 = vpop.f32.mrb[100].mxu1 }
 0x2f3   : > { %v2009_v10 = vadd.f32 %v2008_v27, %v5582_v42  ;;  %v2142_v62 = vadd.f32 %v2141_v28, %v5586_v44  ;;  %v2010_v63 = vpop.f32.mrb[101].mxu0  ;;  %v2143_v0 = vpop.f32.mrb[101].mxu1 }
 0x2f4   : > { %v2011_v11 = vadd.f32 %v2010_v63, %v5590_v45  ;;  %v2144_v16 = vadd.f32 %v2143_v0, %v5594_v33  ;;  %v2012_v1 = vpop.f32.mrb[102].mxu0  ;;  %v2145_v4 = vpop.f32.mrb[102].mxu1  ;;  %2637 = vmatprep.mubr.bf16.mxu0 %v2287_v60  ;;  %2750 = vmatprep.mubr.bf16.mxu1 %v2289_v26 }
 0x2f5   : > { %v2013_v5 = vadd.f32 %v2012_v1, %v5582_v42  ;;  %v2146_v18 = vadd.f32 %v2145_v4, %v5586_v44  ;;  %v2014_v17 = vpop.f32.mrb[103].mxu0  ;;  %v2147_v35 = vpop.f32.mrb[103].mxu1  ;;  %2638 = vmatmul.mubr.bf16.gmra.mrb[136].mxu0 %v2286_v58  ;;  %2751 = vmatmul.mubr.bf16.gmra.mrb[136].mxu1 %v2288_v59  ;;  %v2230_v9 = vmax.f32 %v2009_v10, 0.0  ;;  %v2232_v47 = vmax.f32 %v2142_v62, 0.0 }
 0x2f6   : > { %v2015_v6 = vadd.f32 %v2014_v17, %v5590_v45  ;;  %v2148_v8 = vadd.f32 %v2147_v35, %v5594_v33  ;;  %v2231_v12 = vmax.f32 %v2011_v11, 0.0  ;;  %v2233_v14 = vmax.f32 %v2144_v16, 0.0 }
 0x2f7   : > { %v2234_v51 = vmax.f32 %v2013_v5, 0.0  ;;  %v2236_v53 = vmax.f32 %v2146_v18, 0.0 }
 0x2f8   : > { %v2235_v57 = vmax.f32 %v2015_v6, 0.0  ;;  %v2237_v15 = vmax.f32 %v2148_v8, 0.0 }
 0x2f9   : > { %v2290_v22 = vpack.c.bf16 %v2234_v51, %v2230_v9  ;;  %v2292_v30 = vpack.c.bf16 %v2236_v53, %v2232_v47 }
 0x2fa   : > { %v2291_v31 = vpack.c.bf16 %v2235_v57, %v2231_v12  ;;  %v2293_v32 = vpack.c.bf16 %v2237_v15, %v2233_v14  ;;  %v2018_v34 = vpop.f32.mrb[104].mxu0  ;;  %v2151_v37 = vpop.f32.mrb[104].mxu1 }
 0x2fb   : > { %v2019_v13 = vadd.f32 %v2018_v34, %v5582_v42  ;;  %v2152_v29 = vadd.f32 %v2151_v37, %v5586_v44  ;;  %v2020_v38 = vpop.f32.mrb[105].mxu0  ;;  %v2153_v39 = vpop.f32.mrb[105].mxu1 }
 0x2fc   : > { %v2021_v43 = vadd.f32 %v2020_v38, %v5590_v45  ;;  %v2154_v40 = vadd.f32 %v2153_v39, %v5594_v33  ;;  %v2022_v2 = vpop.f32.mrb[106].mxu0  ;;  %v2155_v25 = vpop.f32.mrb[106].mxu1  ;;  %2645 = vmatprep.mubr.bf16.mxu0 %v2291_v31  ;;  %2758 = vmatprep.mubr.bf16.mxu1 %v2293_v32 }
 0x2fd   : > { %v2023_v48 = vadd.f32 %v2022_v2, %v5582_v42  ;;  %v2156_v41 = vadd.f32 %v2155_v25, %v5586_v44  ;;  %v2024_v46 = vpop.f32.mrb[107].mxu0  ;;  %v2157_v36 = vpop.f32.mrb[107].mxu1  ;;  %2646 = vmatmul.mubr.bf16.gmra.mrb[140].mxu0 %v2290_v22  ;;  %2759 = vmatmul.mubr.bf16.gmra.mrb[140].mxu1 %v2292_v30  ;;  %v2238_v20 = vmax.f32 %v2019_v13, 0.0  ;;  %v2240_v3 = vmax.f32 %v2152_v29, 0.0 }
 0x2fe   : > { %v2025_v56 = vadd.f32 %v2024_v46, %v5590_v45  ;;  %v2158_v49 = vadd.f32 %v2157_v36, %v5594_v33  ;;  %v2239_v50 = vmax.f32 %v2021_v43, 0.0  ;;  %v2241_v61 = vmax.f32 %v2154_v40, 0.0 }
 0x2ff   : > { %v2242_v7 = vmax.f32 %v2023_v48, 0.0  ;;  %v2244_v21 = vmax.f32 %v2156_v41, 0.0 }
 0x300   : > { %v2243_v23 = vmax.f32 %v2025_v56, 0.0  ;;  %v2245_v19 = vmax.f32 %v2158_v49, 0.0 }
 0x301   : > { %v2294_v24 = vpack.c.bf16 %v2242_v7, %v2238_v20  ;;  %v2296_v52 = vpack.c.bf16 %v2244_v21, %v2240_v3 }
 0x302   : > { %v2295_v54 = vpack.c.bf16 %v2243_v23, %v2239_v50  ;;  %v2297_v55 = vpack.c.bf16 %v2245_v19, %v2241_v61  ;;  %v2028_v58 = vpop.f32.mrb[108].mxu0  ;;  %v2161_v59 = vpop.f32.mrb[108].mxu1 }
 0x303   : > { %v2029_v60 = vadd.f32 %v2028_v58, %v5582_v42  ;;  %v2162_v26 = vadd.f32 %v2161_v59, %v5586_v44  ;;  %v2030_v27 = vpop.f32.mrb[109].mxu0  ;;  %v2163_v28 = vpop.f32.mrb[109].mxu1 }
 0x304   : > { %v2031_v10 = vadd.f32 %v2030_v27, %v5590_v45  ;;  %v2164_v62 = vadd.f32 %v2163_v28, %v5594_v33  ;;  %v2032_v63 = vpop.f32.mrb[110].mxu0  ;;  %v2165_v0 = vpop.f32.mrb[110].mxu1  ;;  %2653 = vmatprep.mubr.bf16.mxu0 %v2295_v54  ;;  %2766 = vmatprep.mubr.bf16.mxu1 %v2297_v55 }
 0x305   : > { %v2033_v11 = vadd.f32 %v2032_v63, %v5582_v42  ;;  %v2166_v16 = vadd.f32 %v2165_v0, %v5586_v44  ;;  %v2034_v1 = vpop.f32.mrb[111].mxu0  ;;  %v2167_v4 = vpop.f32.mrb[111].mxu1  ;;  %2654 = vmatmul.mubr.bf16.gmra.mrb[144].mxu0 %v2294_v24  ;;  %2767 = vmatmul.mubr.bf16.gmra.mrb[144].mxu1 %v2296_v52  ;;  %v2246_v17 = vmax.f32 %v2029_v60, 0.0  ;;  %v2248_v35 = vmax.f32 %v2162_v26, 0.0 }
 0x306   : > { %v2035_v5 = vadd.f32 %v2034_v1, %v5590_v45  ;;  %v2168_v18 = vadd.f32 %v2167_v4, %v5594_v33  ;;  %v2247_v9 = vmax.f32 %v2031_v10, 0.0  ;;  %v2249_v47 = vmax.f32 %v2164_v62, 0.0 }
 0x307   : > { %v2250_v6 = vmax.f32 %v2033_v11, 0.0  ;;  %v2252_v8 = vmax.f32 %v2166_v16, 0.0 }
 0x308   : > { %v2251_v51 = vmax.f32 %v2035_v5, 0.0  ;;  %v2253_v53 = vmax.f32 %v2168_v18, 0.0 }
 0x309   : > { %v2298_v12 = vpack.c.bf16 %v2250_v6, %v2246_v17  ;;  %v2300_v14 = vpack.c.bf16 %v2252_v8, %v2248_v35 }
 0x30a   : > { %v2299_v57 = vpack.c.bf16 %v2251_v51, %v2247_v9  ;;  %v2301_v15 = vpack.c.bf16 %v2253_v53, %v2249_v47  ;;  %v2038_v22 = vpop.f32.mrb[112].mxu0  ;;  %v2171_v30 = vpop.f32.mrb[112].mxu1 }
 0x30b   : > { %v2039_v31 = vadd.f32 %v2038_v22, %v5582_v42  ;;  %v2172_v32 = vadd.f32 %v2171_v30, %v5586_v44  ;;  %v2040_v34 = vpop.f32.mrb[113].mxu0  ;;  %v2173_v37 = vpop.f32.mrb[113].mxu1 }
 0x30c   : > { %v2041_v13 = vadd.f32 %v2040_v34, %v5590_v45  ;;  %v2174_v29 = vadd.f32 %v2173_v37, %v5594_v33  ;;  %v2042_v38 = vpop.f32.mrb[114].mxu0  ;;  %v2175_v39 = vpop.f32.mrb[114].mxu1  ;;  %2661 = vmatprep.mubr.bf16.mxu0 %v2299_v57  ;;  %2774 = vmatprep.mubr.bf16.mxu1 %v2301_v15 }
 0x30d   : > { %v2043_v43 = vadd.f32 %v2042_v38, %v5582_v42  ;;  %v2176_v40 = vadd.f32 %v2175_v39, %v5586_v44  ;;  %v2044_v2 = vpop.f32.mrb[115].mxu0  ;;  %v2177_v25 = vpop.f32.mrb[115].mxu1  ;;  %2662 = vmatmul.mubr.bf16.gmra.mrb[148].mxu0 %v2298_v12  ;;  %2775 = vmatmul.mubr.bf16.gmra.mrb[148].mxu1 %v2300_v14  ;;  %v2254_v46 = vmax.f32 %v2039_v31, 0.0  ;;  %v2256_v36 = vmax.f32 %v2172_v32, 0.0 }
 0x30e   : > { %v2045_v48 = vadd.f32 %v2044_v2, %v5590_v45  ;;  %v2178_v41 = vadd.f32 %v2177_v25, %v5594_v33  ;;  %v2255_v20 = vmax.f32 %v2041_v13, 0.0  ;;  %v2257_v3 = vmax.f32 %v2174_v29, 0.0 }
 0x30f   : > { %v2258_v56 = vmax.f32 %v2043_v43, 0.0  ;;  %v2260_v49 = vmax.f32 %v2176_v40, 0.0 }
 0x310   : > { %v2259_v7 = vmax.f32 %v2045_v48, 0.0  ;;  %v2261_v21 = vmax.f32 %v2178_v41, 0.0 }
 0x311   : > { %v2302_v50 = vpack.c.bf16 %v2258_v56, %v2254_v46  ;;  %v2304_v61 = vpack.c.bf16 %v2260_v49, %v2256_v36 }
 0x312   : > { %v2303_v23 = vpack.c.bf16 %v2259_v7, %v2255_v20  ;;  %v2305_v19 = vpack.c.bf16 %v2261_v21, %v2257_v3  ;;  %v2048_v24 = vpop.f32.mrb[116].mxu0  ;;  %v2181_v52 = vpop.f32.mrb[116].mxu1 }
 0x313   : > { %v2049_v54 = vadd.f32 %v2048_v24, %v5582_v42  ;;  %v2182_v55 = vadd.f32 %v2181_v52, %v5586_v44  ;;  %v2050_v58 = vpop.f32.mrb[117].mxu0  ;;  %v2183_v59 = vpop.f32.mrb[117].mxu1 }
 0x314   : > { %v2051_v60 = vadd.f32 %v2050_v58, %v5590_v45  ;;  %v2184_v26 = vadd.f32 %v2183_v59, %v5594_v33  ;;  %v2052_v27 = vpop.f32.mrb[118].mxu0  ;;  %v2185_v28 = vpop.f32.mrb[118].mxu1  ;;  %2669 = vmatprep.mubr.bf16.mxu0 %v2303_v23  ;;  %2782 = vmatprep.mubr.bf16.mxu1 %v2305_v19 }
 0x315   : > { %v2053_v10 = vadd.f32 %v2052_v27, %v5582_v42  ;;  %v2186_v62 = vadd.f32 %v2185_v28, %v5586_v44  ;;  %v2054_v63 = vpop.f32.mrb[119].mxu0  ;;  %v2187_v0 = vpop.f32.mrb[119].mxu1  ;;  %2670 = vmatmul.mubr.bf16.gmra.mrb[152].mxu0 %v2302_v50  ;;  %2783 = vmatmul.mubr.bf16.gmra.mrb[152].mxu1 %v2304_v61  ;;  %v2262_v1 = vmax.f32 %v2049_v54, 0.0  ;;  %v2264_v4 = vmax.f32 %v2182_v55, 0.0 }
 0x316   : > { %v2055_v11 = vadd.f32 %v2054_v63, %v5590_v45  ;;  %v2188_v16 = vadd.f32 %v2187_v0, %v5594_v33  ;;  %v2263_v17 = vmax.f32 %v2051_v60, 0.0  ;;  %v2265_v35 = vmax.f32 %v2184_v26, 0.0  ;;  %v5679_v33 = vld [vmem:[%s5953_s9] ss:$0 sm:$0xff] }
 0x317   : > { %v2266_v5 = vmax.f32 %v2053_v10, 0.0  ;;  %v2268_v18 = vmax.f32 %v2186_v62, 0.0 }
 0x318   : > { %v2267_v6 = vmax.f32 %v2055_v11, 0.0  ;;  %v2269_v8 = vmax.f32 %v2188_v16, 0.0 }
 0x319   : > { %v2306_v9 = vpack.c.bf16 %v2266_v5, %v2262_v1  ;;  %v2308_v42 = vpack.c.bf16 %v2268_v18, %v2264_v4 }
 0x31a   : > { %v2307_v47 = vpack.c.bf16 %v2267_v6, %v2263_v17  ;;  %v2309_v44 = vpack.c.bf16 %v2269_v8, %v2265_v35 }
 0x31c   : > { %2677 = vmatprep.mubr.bf16.mxu0 %v2307_v47  ;;  %2790 = vmatprep.mubr.bf16.mxu1 %v2309_v44 }
 0x31d   : > { %2678 = vmatmul.mubr.bf16.gmra.mrb[156].mxu0 %v2306_v9  ;;  %2791 = vmatmul.mubr.bf16.gmra.mrb[156].mxu1 %v2308_v42 }
 0x3a8   : > { %v4035_v51 = vpop.f32.mrb[120].mxu0  ;;  %v4111_v45 = vpop.f32.mrb[120].mxu1 }
 0x3a9   : > { %v4036_v53 = vpop.f32.mrb[121].mxu0  ;;  %v4112_v12 = vpop.f32.mrb[121].mxu1 }
 0x3aa   : > { %v4037_v14 = vadd.f32 %v4036_v53, %v4035_v51  ;;  %v4113_v57 = vadd.f32 %v4112_v12, %v4111_v45  ;;  %v4038_v15 = vpop.f32.mrb[122].mxu0  ;;  %v4114_v22 = vpop.f32.mrb[122].mxu1 }
 0x3ab   : > { %v4039_v30 = vpop.f32.mrb[123].mxu0  ;;  %v4115_v31 = vpop.f32.mrb[123].mxu1 }
 0x3ac   : > { %v2608_v32 = vadd.f32 %v4037_v14, %v5679_v33  ;;  %v4040_v34 = vadd.f32 %v4039_v30, %v4038_v15  ;;  %v4116_v37 = vadd.f32 %v4115_v31, %v4114_v22 }
 0x3ae   : > { %v2721_v13 = vadd.f32 %v4113_v57, %v2608_v32  ;;  %v2611_v29 = vadd.f32 %v4040_v34, %v5679_v33 }
 0x3b0   : > { %v3734_v38 = vmul.f32 -1.442695, %v2721_v13  ;;  %v2724_v39 = vadd.f32 %v4116_v37, %v2611_v29  ;;  %v4041_v43 = vpop.f32.mrb[124].mxu0  ;;  %v4117_v40 = vpop.f32.mrb[124].mxu1 }
 0x3b1   : > { %v4042_v2 = vpop.f32.mrb[125].mxu0  ;;  %v4118_v25 = vpop.f32.mrb[125].mxu1 }
 0x3b2   : > { %4504 = vpow2.f32 %v3734_v38  ;;  %v3735_v48 = vmul.f32 -1.442695, %v2724_v39  ;;  %v4043_v41 = vadd.f32 %v4042_v2, %v4041_v43  ;;  %v4119_v46 = vadd.f32 %v4118_v25, %v4117_v40  ;;  %v4044_v36 = vpop.f32.mrb[126].mxu0  ;;  %v4120_v56 = vpop.f32.mrb[126].mxu1 }
 0x3b3   : > { %v4045_v49 = vpop.f32.mrb[127].mxu0  ;;  %v4121_v20 = vpop.f32.mrb[127].mxu1 }
 0x3b4   : > { %4506 = vpow2.f32 %v3735_v48  ;;  %v2616_v3 = vadd.f32 %v4043_v41, %v5679_v33  ;;  %v4046_v7 = vadd.f32 %v4045_v49, %v4044_v36  ;;  %v4122_v21 = vadd.f32 %v4121_v20, %v4120_v56 }
 0x3b6   : > { %v2729_v50 = vadd.f32 %v4119_v46, %v2616_v3  ;;  %v2619_v61 = vadd.f32 %v4046_v7, %v5679_v33 }
 0x3b8   : > { %v3736_v23 = vmul.f32 -1.442695, %v2729_v50  ;;  %v2732_v19 = vadd.f32 %v4122_v21, %v2619_v61  ;;  %v4047_v24 = vpop.f32.mrb[128].mxu0  ;;  %v4123_v52 = vpop.f32.mrb[128].mxu1 }
 0x3b9   : > { %v4048_v54 = vpop.f32.mrb[129].mxu0  ;;  %v4124_v55 = vpop.f32.mrb[129].mxu1 }
 0x3ba   : > { %4508 = vpow2.f32 %v3736_v23  ;;  %v3737_v58 = vmul.f32 -1.442695, %v2732_v19  ;;  %v4049_v59 = vadd.f32 %v4048_v54, %v4047_v24  ;;  %v4125_v60 = vadd.f32 %v4124_v55, %v4123_v52  ;;  %v4050_v26 = vpop.f32.mrb[130].mxu0  ;;  %v4126_v27 = vpop.f32.mrb[130].mxu1 }
 0x3bb   : > { %v4051_v28 = vpop.f32.mrb[131].mxu0  ;;  %v4127_v10 = vpop.f32.mrb[131].mxu1 }
 0x3bc   : > { %v4505_v62 = vpop.eup %4504  ;;  %4510 = vpow2.f32 %v3737_v58  ;;  %v2624_v63 = vadd.f32 %v4049_v59, %v5679_v33  ;;  %v4052_v0 = vadd.f32 %v4051_v28, %v4050_v26  ;;  %v4128_v11 = vadd.f32 %v4127_v10, %v4126_v27 }
 0x3bd   : > { %v2859_v16 = vadd.f32 1.0, %v4505_v62 }
 0x3be   : > { %v4507_v1 = vpop.eup %4506  ;;  %v2737_v4 = vadd.f32 %v4125_v60, %v2624_v63  ;;  %v2627_v5 = vadd.f32 %v4052_v0, %v5679_v33 }
 0x3bf   : > { %4512 = vrcp.f32 %v2859_v16  ;;  %v2860_v18 = vadd.f32 1.0, %v4507_v1 }
 0x3c0   : > { %v3738_v17 = vmul.f32 -1.442695, %v2737_v4  ;;  %v2740_v35 = vadd.f32 %v4128_v11, %v2627_v5  ;;  %v4053_v6 = vpop.f32.mrb[132].mxu0  ;;  %v4129_v8 = vpop.f32.mrb[132].mxu1 }
 0x3c1   : > { %4514 = vrcp.f32 %v2860_v18  ;;  %v4054_v9 = vpop.f32.mrb[133].mxu0  ;;  %v4130_v42 = vpop.f32.mrb[133].mxu1 }
 0x3c2   : > { %4516 = vpow2.f32 %v3738_v17  ;;  %v3739_v47 = vmul.f32 -1.442695, %v2740_v35  ;;  %v4055_v44 = vadd.f32 %v4054_v9, %v4053_v6  ;;  %v4131_v51 = vadd.f32 %v4130_v42, %v4129_v8  ;;  %v4056_v45 = vpop.f32.mrb[134].mxu0  ;;  %v4132_v53 = vpop.f32.mrb[134].mxu1 }
 0x3c3   : > { %v4057_v12 = vpop.f32.mrb[135].mxu0  ;;  %v4133_v14 = vpop.f32.mrb[135].mxu1 }
 0x3c4   : > { %v4509_v57 = vpop.eup %4508  ;;  %4518 = vpow2.f32 %v3739_v47  ;;  %v2632_v15 = vadd.f32 %v4055_v44, %v5679_v33  ;;  %v4058_v22 = vadd.f32 %v4057_v12, %v4056_v45  ;;  %v4134_v30 = vadd.f32 %v4133_v14, %v4132_v53 }
 0x3c5   : > { %v2861_v31 = vadd.f32 1.0, %v4509_v57 }
 0x3c6   : > { %v4511_v32 = vpop.eup %4510  ;;  %v2745_v34 = vadd.f32 %v4131_v51, %v2632_v15  ;;  %v2635_v37 = vadd.f32 %v4058_v22, %v5679_v33 }
 0x3c7   : > { %4520 = vrcp.f32 %v2861_v31  ;;  %v2862_v13 = vadd.f32 1.0, %v4511_v32 }
 0x3c8   : > { %v3740_v29 = vmul.f32 -1.442695, %v2745_v34  ;;  %v2748_v38 = vadd.f32 %v4134_v30, %v2635_v37  ;;  %v4059_v39 = vpop.f32.mrb[136].mxu0  ;;  %v4135_v43 = vpop.f32.mrb[136].mxu1 }
 0x3c9   : > { %v4513_v40 = vpop.eup %4512  ;;  %4522 = vrcp.f32 %v2862_v13  ;;  %v4060_v2 = vpop.f32.mrb[137].mxu0 }
 0x3ca   : > { %v4136_v25 = vpop.f32.mrb[137].mxu1  ;;  %v3796_v48 = vpack.c.bf16 %v4513_v40, %v4513_v40  ;;  %4524 = vpow2.f32 %v3740_v29  ;;  %v3741_v41 = vmul.f32 -1.442695, %v2748_v38  ;;  %v4061_v46 = vadd.f32 %v4060_v2, %v4059_v39  ;;  %v4062_v36 = vpop.f32.mrb[138].mxu0 }
 0x3cb   : > { %v4138_v56 = vpop.f32.mrb[138].mxu1  ;;  %v4515_v49 = vpop.eup %4514  ;;  %v4137_v20 = vadd.f32 %v4136_v25, %v4135_v43 }
 0x3cc   : > { %v4063_v3 = vpop.f32.mrb[139].mxu0  ;;  %v4139_v7 = vpop.f32.mrb[139].mxu1  ;;  %3000 = vst.msk [vmem:[%s5691_s17] sm:$0xf] %vm2999_vm2, %v3796_v48  ;;  %v3797_v50 = vpack.c.bf16 %v4515_v49, %v4515_v49  ;;  %4526 = vpow2.f32 %v3741_v41  ;;  %v2640_v61 = vadd.f32 %v4061_v46, %v5679_v33 }
 0x3cd   : > { %v4517_v21 = vpop.eup %4516  ;;  %v4064_v23 = vadd.f32 %v4063_v3, %v4062_v36  ;;  %v4140_v24 = vadd.f32 %v4139_v7, %v4138_v56 }
 0x3ce   : > { %v2863_v19 = vadd.f32 1.0, %v4517_v21  ;;  %v4519_v52 = vpop.eup %4518  ;;  %3001 = vst.msk [vmem:[%s5691_s17 + $0x4] sm:$0xf] %vm2999_vm2, %v3797_v50  ;;  %v2753_v54 = vadd.f32 %v4137_v20, %v2640_v61 }
 0x3cf   : > { %v2643_v55 = vadd.f32 %v4064_v23, %v5679_v33  ;;  %v2864_v58 = vadd.f32 1.0, %v4519_v52 }
 0x3d0   : > { %4528 = vrcp.f32 %v2863_v19  ;;  %v3742_v59 = vmul.f32 -1.442695, %v2753_v54  ;;  %v4065_v26 = vpop.f32.mrb[140].mxu0  ;;  %v4141_v27 = vpop.f32.mrb[140].mxu1 }
 0x3d1   : > { %v2756_v60 = vadd.f32 %v4140_v24, %v2643_v55  ;;  %v4521_v28 = vpop.eup %4520  ;;  %4530 = vrcp.f32 %v2864_v58  ;;  %v4066_v10 = vpop.f32.mrb[141].mxu0 }
 0x3d2   : > { %v4142_v62 = vpop.f32.mrb[141].mxu1  ;;  %v3798_v63 = vpack.c.bf16 %v4521_v28, %v4521_v28  ;;  %4532 = vpow2.f32 %v3742_v59  ;;  %v4067_v11 = vadd.f32 %v4066_v10, %v4065_v26  ;;  %v4068_v16 = vpop.f32.mrb[142].mxu0 }
 0x3d3   : > { %v3743_v0 = vmul.f32 -1.442695, %v2756_v60  ;;  %v4144_v1 = vpop.f32.mrb[142].mxu1  ;;  %v4523_v4 = vpop.eup %4522  ;;  %v4143_v5 = vadd.f32 %v4142_v62, %v4141_v27 }
 0x3d4   : > { %v4069_v18 = vpop.f32.mrb[143].mxu0  ;;  %v4145_v17 = vpop.f32.mrb[143].mxu1  ;;  %3002 = vst.msk [vmem:[%s5691_s17 + $0x8] sm:$0xf] %vm2999_vm2, %v3798_v63  ;;  %v3799_v6 = vpack.c.bf16 %v4523_v4, %v4523_v4  ;;  %v2648_v8 = vadd.f32 %v4067_v11, %v5679_v33 }
 0x3d5   : > { %v4525_v35 = vpop.eup %4524  ;;  %4534 = vpow2.f32 %v3743_v0  ;;  %v4070_v9 = vadd.f32 %v4069_v18, %v4068_v16  ;;  %v4146_v47 = vadd.f32 %v4145_v17, %v4144_v1 }
 0x3d6   : > { %v2865_v42 = vadd.f32 1.0, %v4525_v35  ;;  %v4527_v44 = vpop.eup %4526  ;;  %3003 = vst.msk [vmem:[%s5691_s17 + $0xc] sm:$0xf] %vm2999_vm2, %v3799_v6  ;;  %v2761_v51 = vadd.f32 %v4143_v5, %v2648_v8 }
 0x3d7   : > { %v2651_v45 = vadd.f32 %v4070_v9, %v5679_v33  ;;  %v2866_v53 = vadd.f32 1.0, %v4527_v44 }
 0x3d8   : > { %4536 = vrcp.f32 %v2865_v42  ;;  %v3744_v12 = vmul.f32 -1.442695, %v2761_v51  ;;  %v4071_v57 = vpop.f32.mrb[144].mxu0  ;;  %v4147_v15 = vpop.f32.mrb[144].mxu1 }
 0x3d9   : > { %v2764_v14 = vadd.f32 %v4146_v47, %v2651_v45  ;;  %4538 = vrcp.f32 %v2866_v53  ;;  %v4072_v30 = vpop.f32.mrb[145].mxu0  ;;  %v4148_v31 = vpop.f32.mrb[145].mxu1 }
 0x3da   : > { %v4529_v22 = vpop.eup %4528  ;;  %4540 = vpow2.f32 %v3744_v12  ;;  %v4073_v37 = vadd.f32 %v4072_v30, %v4071_v57  ;;  %v4074_v13 = vpop.f32.mrb[146].mxu0  ;;  %v4149_v39 = vadd.f32 %v4148_v31, %v4147_v15 }
 0x3db   : > { %v3800_v32 = vpack.c.bf16 %v4529_v22, %v4529_v22  ;;  %v3745_v34 = vmul.f32 -1.442695, %v2764_v14  ;;  %v4150_v29 = vpop.f32.mrb[146].mxu1  ;;  %v4531_v38 = vpop.eup %4530 }
 0x3dc   : > { %v4075_v43 = vpop.f32.mrb[147].mxu0  ;;  %v4151_v40 = vpop.f32.mrb[147].mxu1  ;;  %v3801_v25 = vpack.c.bf16 %v4531_v38, %v4531_v38  ;;  %v2656_v48 = vadd.f32 %v4073_v37, %v5679_v33 }
 0x3dd   : > { %v4533_v2 = vpop.eup %4532  ;;  %3004 = vst.msk [vmem:[%s5691_s17 + $0x10] sm:$0xf] %vm2999_vm2, %v3800_v32  ;;  %4542 = vpow2.f32 %v3745_v34  ;;  %v4076_v41 = vadd.f32 %v4075_v43, %v4074_v13  ;;  %v4152_v36 = vadd.f32 %v4151_v40, %v4150_v29 }
 0x3de   : > { %v2867_v46 = vadd.f32 1.0, %v4533_v2  ;;  %3005 = vst.msk [vmem:[%s5691_s17 + $0x14] sm:$0xf] %vm2999_vm2, %v3801_v25  ;;  %v2769_v49 = vadd.f32 %v4149_v39, %v2656_v48 }
 0x3df   : > { %v4535_v56 = vpop.eup %4534  ;;  %v2659_v20 = vadd.f32 %v4076_v41, %v5679_v33 }
 0x3e0   : > { %4544 = vrcp.f32 %v2867_v46  ;;  %v2868_v3 = vadd.f32 1.0, %v4535_v56  ;;  %v3746_v7 = vmul.f32 -1.442695, %v2769_v49  ;;  %v4077_v50 = vpop.f32.mrb[148].mxu0  ;;  %v4153_v61 = vpop.f32.mrb[148].mxu1 }
 0x3e1   : > { %v2772_v21 = vadd.f32 %v4152_v36, %v2659_v20  ;;  %v4078_v19 = vpop.f32.mrb[149].mxu0  ;;  %v4154_v24 = vpop.f32.mrb[149].mxu1 }
 0x3e2   : > { %v4537_v23 = vpop.eup %4536  ;;  %4546 = vrcp.f32 %v2868_v3  ;;  %v4079_v55 = vadd.f32 %v4078_v19, %v4077_v50  ;;  %v4080_v58 = vpop.f32.mrb[150].mxu0  ;;  %v4155_v26 = vadd.f32 %v4154_v24, %v4153_v61 }
 0x3e3   : > { %v3802_v52 = vpack.c.bf16 %v4537_v23, %v4537_v23  ;;  %4548 = vpow2.f32 %v3746_v7  ;;  %v3747_v54 = vmul.f32 -1.442695, %v2772_v21  ;;  %v4156_v59 = vpop.f32.mrb[150].mxu1  ;;  %v4539_v60 = vpop.eup %4538 }
 0x3e4   : > { %v4081_v27 = vpop.f32.mrb[151].mxu0  ;;  %v4157_v28 = vpop.f32.mrb[151].mxu1  ;;  %v3803_v62 = vpack.c.bf16 %v4539_v60, %v4539_v60  ;;  %v2664_v63 = vadd.f32 %v4079_v55, %v5679_v33 }
 0x3e5   : > { %v4541_v10 = vpop.eup %4540  ;;  %3006 = vst.msk [vmem:[%s5691_s17 + $0x18] sm:$0xf] %vm2999_vm2, %v3802_v52  ;;  %4550 = vpow2.f32 %v3747_v54  ;;  %v4082_v0 = vadd.f32 %v4081_v27, %v4080_v58  ;;  %v4158_v16 = vadd.f32 %v4157_v28, %v4156_v59 }
 0x3e6   : > { %v2869_v11 = vadd.f32 1.0, %v4541_v10  ;;  %3007 = vst.msk [vmem:[%s5691_s17 + $0x1c] sm:$0xf] %vm2999_vm2, %v3803_v62  ;;  %v2777_v4 = vadd.f32 %v4155_v26, %v2664_v63 }
 0x3e7   : > { %v4543_v1 = vpop.eup %4542  ;;  %v2667_v5 = vadd.f32 %v4082_v0, %v5679_v33 }
 0x3e8   : > { %4552 = vrcp.f32 %v2869_v11  ;;  %v2870_v18 = vadd.f32 1.0, %v4543_v1  ;;  %v3748_v17 = vmul.f32 -1.442695, %v2777_v4  ;;  %v4083_v6 = vpop.f32.mrb[152].mxu0  ;;  %v4159_v8 = vpop.f32.mrb[152].mxu1 }
 0x3e9   : > { %v2780_v35 = vadd.f32 %v4158_v16, %v2667_v5  ;;  %v4084_v42 = vpop.f32.mrb[153].mxu0  ;;  %v4160_v47 = vpop.f32.mrb[153].mxu1 }
 0x3ea   : > { %v4545_v9 = vpop.eup %4544  ;;  %4554 = vrcp.f32 %v2870_v18  ;;  %v4085_v45 = vadd.f32 %v4084_v42, %v4083_v6  ;;  %v4086_v53 = vpop.f32.mrb[154].mxu0  ;;  %v4161_v57 = vadd.f32 %v4160_v47, %v4159_v8 }
 0x3eb   : > { %v3804_v44 = vpack.c.bf16 %v4545_v9, %v4545_v9  ;;  %4556 = vpow2.f32 %v3748_v17  ;;  %v3749_v51 = vmul.f32 -1.442695, %v2780_v35  ;;  %v4162_v12 = vpop.f32.mrb[154].mxu1  ;;  %v4087_v15 = vpop.f32.mrb[155].mxu0 }
 0x3ec   : > { %v4547_v14 = vpop.eup %4546  ;;  %v4163_v22 = vpop.f32.mrb[155].mxu1  ;;  %v2672_v32 = vadd.f32 %v4085_v45, %v5679_v33  ;;  %v4088_v34 = vadd.f32 %v4087_v15, %v4086_v53 }
 0x3ed   : > { %v4549_v30 = vpop.eup %4548  ;;  %3008 = vst.msk [vmem:[%s5691_s17 + $0x20] sm:$0xf] %vm2999_vm2, %v3804_v44  ;;  %v3805_v31 = vpack.c.bf16 %v4547_v14, %v4547_v14  ;;  %4558 = vpow2.f32 %v3749_v51  ;;  %v4164_v13 = vadd.f32 %v4163_v22, %v4162_v12 }
 0x3ee   : > { %v2871_v37 = vadd.f32 1.0, %v4549_v30  ;;  %v2785_v38 = vadd.f32 %v4161_v57, %v2672_v32  ;;  %v2675_v39 = vadd.f32 %v4088_v34, %v5679_v33 }
 0x3ef   : > { %v4551_v29 = vpop.eup %4550  ;;  %3009 = vst.msk [vmem:[%s5691_s17 + $0x24] sm:$0xf] %vm2999_vm2, %v3805_v31 }
 0x3f0   : > { %4560 = vrcp.f32 %v2871_v37  ;;  %v2872_v43 = vadd.f32 1.0, %v4551_v29  ;;  %v3750_v40 = vmul.f32 -1.442695, %v2785_v38  ;;  %v2788_v2 = vadd.f32 %v4164_v13, %v2675_v39  ;;  %v4089_v25 = vpop.f32.mrb[156].mxu0  ;;  %v4165_v48 = vpop.f32.mrb[156].mxu1 }
 0x3f1   : > { %v4090_v46 = vpop.f32.mrb[157].mxu0  ;;  %v4166_v36 = vpop.f32.mrb[157].mxu1 }
 0x3f2   : > { %v4553_v41 = vpop.eup %4552  ;;  %4562 = vrcp.f32 %v2872_v43  ;;  %v3751_v49 = vmul.f32 -1.442695, %v2788_v2  ;;  %v4091_v20 = vadd.f32 %v4090_v46, %v4089_v25  ;;  %v4092_v3 = vpop.f32.mrb[158].mxu0  ;;  %v4167_v50 = vadd.f32 %v4166_v36, %v4165_v48 }
 0x3f3   : > { %v3806_v56 = vpack.c.bf16 %v4553_v41, %v4553_v41  ;;  %4564 = vpow2.f32 %v3750_v40  ;;  %v4168_v7 = vpop.f32.mrb[158].mxu1  ;;  %v4093_v61 = vpop.f32.mrb[159].mxu0 }
 0x3f4   : > { %v4555_v21 = vpop.eup %4554  ;;  %v4169_v23 = vpop.f32.mrb[159].mxu1  ;;  %4566 = vpow2.f32 %v3751_v49  ;;  %v2680_v52 = vadd.f32 %v4091_v20, %v5679_v33  ;;  %v4094_v54 = vadd.f32 %v4093_v61, %v4092_v3 }
 0x3f5   : > { %v4557_v19 = vpop.eup %4556  ;;  %3010 = vst.msk [vmem:[%s5691_s17 + $0x28] sm:$0xf] %vm2999_vm2, %v3806_v56  ;;  %v3807_v24 = vpack.c.bf16 %v4555_v21, %v4555_v21  ;;  %v4170_v58 = vadd.f32 %v4169_v23, %v4168_v7 }
 0x3f6   : > { %v2873_v55 = vadd.f32 1.0, %v4557_v19  ;;  %v2793_v60 = vadd.f32 %v4167_v50, %v2680_v52  ;;  %v2683_v26 = vadd.f32 %v4094_v54, %v5679_v33 }
 0x3f7   : > { %v4559_v59 = vpop.eup %4558  ;;  %3011 = vst.msk [vmem:[%s5691_s17 + $0x2c] sm:$0xf] %vm2999_vm2, %v3807_v24 }
 0x3f8   : > { %4568 = vrcp.f32 %v2873_v55  ;;  %v2874_v27 = vadd.f32 1.0, %v4559_v59  ;;  %v3752_v28 = vmul.f32 -1.442695, %v2793_v60  ;;  %v2796_v10 = vadd.f32 %v4170_v58, %v2683_v26 }
 0x3fa   : > { %v4561_v62 = vpop.eup %4560  ;;  %4570 = vrcp.f32 %v2874_v27  ;;  %v3753_v0 = vmul.f32 -1.442695, %v2796_v10 }
 0x3fb   : > { %v3808_v63 = vpack.c.bf16 %v4561_v62, %v4561_v62  ;;  %4572 = vpow2.f32 %v3752_v28 }
 0x3fc   : > { %v4563_v11 = vpop.eup %4562  ;;  %4574 = vpow2.f32 %v3753_v0 }
 0x3fd   : > { %v4565_v16 = vpop.eup %4564  ;;  %3012 = vst.msk [vmem:[%s5691_s17 + $0x30] sm:$0xf] %vm2999_vm2, %v3808_v63  ;;  %v3809_v1 = vpack.c.bf16 %v4563_v11, %v4563_v11 }
 0x3fe   : > { %v2875_v4 = vadd.f32 1.0, %v4565_v16  ;;  %v4567_v33 = vpop.eup %4566 }
 0x3ff   : > { %3013 = vst.msk [vmem:[%s5691_s17 + $0x34] sm:$0xf] %vm2999_vm2, %v3809_v1  ;;  %v2876_v5 = vadd.f32 1.0, %v4567_v33 }
 0x400   : > { %4576 = vrcp.f32 %v2875_v4 }
 0x401   : > { %4578 = vrcp.f32 %v2876_v5 }
 0x402   : > { %v4569_v18 = vpop.eup %4568 }
 0x403   : > { %v3810_v17 = vpack.c.bf16 %v4569_v18, %v4569_v18 }
 0x404   : > { %v4571_v35 = vpop.eup %4570 }
 0x405   : > { %v4573_v6 = vpop.eup %4572  ;;  %3014 = vst.msk [vmem:[%s5691_s17 + $0x38] sm:$0xf] %vm2999_vm2, %v3810_v17  ;;  %v3811_v8 = vpack.c.bf16 %v4571_v35, %v4571_v35 }
 0x406   : > { %v2877_v9 = vadd.f32 1.0, %v4573_v6  ;;  %v4575_v42 = vpop.eup %4574 }
 0x407   : > { %3015 = vst.msk [vmem:[%s5691_s17 + $0x3c] sm:$0xf] %vm2999_vm2, %v3811_v8  ;;  %v2878_v47 = vadd.f32 1.0, %v4575_v42 }
 0x408   : > { %4580 = vrcp.f32 %v2877_v9 }
 0x409   : > { %4582 = vrcp.f32 %v2878_v47 }
 0x40a   : > { %v4577_v44 = vpop.eup %4576 }
 0x40b   : > { %v3812_v51 = vpack.c.bf16 %v4577_v44, %v4577_v44  ;;  %v4579_v45 = vpop.eup %4578 }
 0x40c   : > { %v3813_v53 = vpack.c.bf16 %v4579_v45, %v4579_v45 }
 0x40d   : > { %3016 = vst.msk [vmem:[%s5691_s17 + $0x40] sm:$0xf] %vm2999_vm2, %v3812_v51 }
 0x40e   : > { %3017 = vst.msk [vmem:[%s5691_s17 + $0x44] sm:$0xf] %vm2999_vm2, %v3813_v53 }
 0x410   : > { %3030 = sbr.rel (!%p4830_p4) target bundleno = 1122 (0x462), region = 64 }
 0x412   : > { %v4581_v12 = vpop.eup %4580 }
 0x413   : > { %v3814_v14 = vpack.c.bf16 %v4581_v12, %v4581_v12  ;;  %v4583_v57 = vpop.eup %4582 }
 0x414   : > { %v3815_v15 = vpack.c.bf16 %v4583_v57, %v4583_v57 }
 0x415   : > { %3018 = vst.msk [vmem:[%s5691_s17 + $0x48] sm:$0xf] %vm2999_vm2, %v3814_v14 }
 0x416   : > { %3019 = vst.msk [vmem:[%s5691_s17 + $0x4c] sm:$0xf] %vm2999_vm2, %v3815_v15 }
 0x417   : > { %s5977_s26 = smov (!%p3033_p8, %s3032_s26), 20 }
 0x418   : > { %s3774_s30 = sshll.u32 %s5977_s26, 6 }
 0x419   : > { %p3777_p9 = scmp.eq.s32.totalorder %s3774_s30, 0 }
 0x41a   : > { %4584 = sdivrem.u32 (!%p3777_p9), %s5977_s26, 20 }
 0x41b   : > { %3041 = sbr.rel (%p3777_p9) target bundleno = 1122 (0x462), region = 68 }
 0x423   : > { %s5758_s15 = spop.drf %4584 }
 0x424   : > { %p3778_p10 = scmp.le.s32.totalorder %s5758_s15, 0 }
 0x425   : > { %s5967_s22 = smov (!%p3778_p10), %s5752_s27  ;;  %s5968_s29 = smov (!%p3778_p10), %s5691_s17 }
 0x426   : > { %3507 = sbr.rel (%p3778_p10) target bundleno = 1093 (0x445), region = 215  ;;  %s5767_s13 = smov (!%p3778_p10), 0  }
 0x427   : > { %s5769_s14 = smov (!%p3778_p10), 0  }
 0x42d LB: >> { %v3058_v22 = vld [vmem:[%s4686_s29] sm:$0xf]  ;;  %v3060_v30 = vld [vmem:[%s4686_s29 + $0x4] sm:$0xf]  ;;  %v3062_v31 = vld [vmem:[%s4686_s29 + $0x8] sm:$0xf]  ;;  %s4694_s14 = sphi %s5769_s14, %s3052_s14   ;;  %s4690_s13 = sphi %s5767_s13, %s5969_s13   ;;  %s4686_s29 = sphi %s5968_s29, %s3103_s29   ;;  %s4682_s22 = sphi %s5967_s22, %s3104_s22  }
 0x42e   : >> { %3059 = vst [vmem:[%s4682_s22] sm:$0xf] %v3058_v22  ;;  %3061 = vst [vmem:[%s4682_s22 + $0x4] sm:$0xf] %v3060_v30  ;;  %v3064_v32 = vld [vmem:[%s4686_s29 + $0xc] sm:$0xf]  ;;  %s3098_s16 = sadd.s32 1, %s4690_s13 }
 0x42f   : >> { %3063 = vst [vmem:[%s4682_s22 + $0x8] sm:$0xf] %v3062_v31  ;;  %v3066_v34 = vld [vmem:[%s4686_s29 + $0x10] sm:$0xf]  ;;  %v3068_v37 = vld [vmem:[%s4686_s29 + $0x14] sm:$0xf]  ;;  %p3099_p11 = scmp.ge.s32.totalorder %s3098_s16, %s5758_s15 }
 0x430   : >> { %3065 = vst [vmem:[%s4682_s22 + $0xc] sm:$0xf] %v3064_v32  ;;  %3067 = vst [vmem:[%s4682_s22 + $0x10] sm:$0xf] %v3066_v34  ;;  %v3070_v13 = vld [vmem:[%s4686_s29 + $0x18] sm:$0xf] }
 0x431   : >> { %3069 = vst [vmem:[%s4682_s22 + $0x14] sm:$0xf] %v3068_v37  ;;  %v3072_v29 = vld [vmem:[%s4686_s29 + $0x1c] sm:$0xf]  ;;  %v3074_v38 = vld [vmem:[%s4686_s29 + $0x20] sm:$0xf] }
 0x432   : >> { %3071 = vst [vmem:[%s4682_s22 + $0x18] sm:$0xf] %v3070_v13  ;;  %3073 = vst [vmem:[%s4682_s22 + $0x1c] sm:$0xf] %v3072_v29  ;;  %v3076_v39 = vld [vmem:[%s4686_s29 + $0x24] sm:$0xf] }
 0x433   : >> { %3075 = vst [vmem:[%s4682_s22 + $0x20] sm:$0xf] %v3074_v38  ;;  %v3078_v43 = vld [vmem:[%s4686_s29 + $0x28] sm:$0xf]  ;;  %v3080_v40 = vld [vmem:[%s4686_s29 + $0x2c] sm:$0xf] }
 0x434   : >> { %3077 = vst [vmem:[%s4682_s22 + $0x24] sm:$0xf] %v3076_v39  ;;  %3079 = vst [vmem:[%s4682_s22 + $0x28] sm:$0xf] %v3078_v43  ;;  %v3082_v2 = vld [vmem:[%s4686_s29 + $0x30] sm:$0xf] }
 0x435   : >> { %3081 = vst [vmem:[%s4682_s22 + $0x2c] sm:$0xf] %v3080_v40  ;;  %v3084_v25 = vld [vmem:[%s4686_s29 + $0x34] sm:$0xf]  ;;  %v3086_v48 = vld [vmem:[%s4686_s29 + $0x38] sm:$0xf] }
 0x436   : >> { %3083 = vst [vmem:[%s4682_s22 + $0x30] sm:$0xf] %v3082_v2  ;;  %3085 = vst [vmem:[%s4682_s22 + $0x34] sm:$0xf] %v3084_v25  ;;  %v3088_v41 = vld [vmem:[%s4686_s29 + $0x3c] sm:$0xf] }
 0x437   : >> { %3087 = vst [vmem:[%s4682_s22 + $0x38] sm:$0xf] %v3086_v48  ;;  %v3090_v46 = vld [vmem:[%s4686_s29 + $0x40] sm:$0xf]  ;;  %v3092_v36 = vld [vmem:[%s4686_s29 + $0x44] sm:$0xf] }
 0x438   : >> { %3089 = vst [vmem:[%s4682_s22 + $0x3c] sm:$0xf] %v3088_v41  ;;  %3091 = vst [vmem:[%s4682_s22 + $0x40] sm:$0xf] %v3090_v46  ;;  %v3094_v56 = vld [vmem:[%s4686_s29 + $0x48] sm:$0xf] }
 0x439   : >> { %3093 = vst [vmem:[%s4682_s22 + $0x44] sm:$0xf] %v3092_v36  ;;  %v3096_v49 = vld [vmem:[%s4686_s29 + $0x4c] sm:$0xf]  ;;  %3095 = vst [vmem:[%s4682_s22 + $0x48] sm:$0xf] %v3094_v56 }
 0x43a   : >> { %3097 = vst [vmem:[%s4682_s22 + $0x4c] sm:$0xf] %v3096_v49  ;;  %s5979_s16 = smov (%p3099_p11, %s3098_s16), 0  ;;  %s3052_s14 = sadd.s32 1, %s4694_s14  }
 0x43b   : >> { %s3101_s19 = smul.u32 80, %s5979_s16  ;;  %p3051_p12 = scmp.ge.s32.totalorder %s3052_s14, %s5758_s15 }
 0x43c   : >> { %s5969_s13 = smov %s5979_s16 }
 0x43d   : >> { %s3103_s29 = scalar_lea.vmem %s5691_s17, %s3101_s19 [#allocation2]   ;;  %s3104_s22 = scalar_lea.vmem %s5752_s27, %s3101_s19  }
 0x43e   : > { %3054 = sbr.rel (!%p3051_p12) target bundleno = 1069 (0x42d), region = 221 }
 0x445 PF: > { %4586 = sdivrem.u32 %s5977_s26, 20 }
 0x446   : > { %s3779_s23 = smul.u32 80, %s5758_s15 }
 0x448   : > { %s3109_s30 = scalar_lea.vmem %s5691_s17, %s3779_s23 [#allocation2]   ;;  %s3111_s19 = scalar_lea.vmem %s5752_s27, %s3779_s23  }
 0x44e   : > { %s4587_s0 = spop.drf %4586 }
 0x44f   : > { %p3781_p13 = scmp.le.s32.totalorder %s4587_s0, 0 }
 0x450   : > { %s4696_s1 = smov (!%p3781_p13), %s3111_s19   ;;  %s4700_s2 = smov (!%p3781_p13), %s3109_s30  }
 0x451   : > { %3521 = sbr.rel (%p3781_p13) target bundleno = 1122 (0x462), region = 226  ;;  %s4704_s3 = smov (!%p3781_p13), 0  }
 0x452   : > { %s4708_s4 = smov (!%p3781_p13), 0  }
 0x458 LB: >> { %v3121_v20 = vld [vmem:[%s4702_s2] sm:$0xf]  ;;  %s3123_s22 = sadd.s32 1, %s4706_s3  ;;  %s3115_s4 = sadd.s32 1, %s4710_s4   ;;  %s4710_s4 = sphi %s4708_s4, %s3115_s4   ;;  %s4706_s3 = sphi %s4704_s3, %s4705_s3   ;;  %s4702_s2 = sphi %s4700_s2, %s3128_s2   ;;  %s4698_s1 = sphi %s4696_s1, %s3129_s1  }
 0x459   : >> { %3122 = vst [vmem:[%s4698_s1] sm:$0xf] %v3121_v20  ;;  %p3124_p0 = scmp.ge.s32.totalorder %s3123_s22, %s4587_s0  ;;  %p3114_p1 = scmp.ge.s32.totalorder %s3115_s4, %s4587_s0 }
 0x45b   : >> { %s5981_s22 = smov (%p3124_p0, %s3123_s22), 0  ;;  %3117 = sbr.rel (!%p3114_p1) target bundleno = 1112 (0x458), region = 232 }
 0x45c   : >> { %s3782_s17 = sshll.u32 %s5981_s22, 2  ;;  %s4705_s3 = smov %s5981_s22  }
 0x45d   : >> { %s3128_s2 = scalar_lea.vmem %s3109_s30, %s3782_s17 [#allocation2]   ;;  %s3129_s1 = scalar_lea.vmem %s3111_s19, %s3782_s17  }
 0x462 PF: > { %3219 = sbr.rel (!%p4830_p4) target bundleno = 1192 (0x4a8), region = 112  ;;  %s3221_s3 = ssub.s32 (%p4830_p4), 38, %s4838_s28 }
 0x463   : > { %s3817_s26 = smul.u32 (%p4830_p4), 160, %s4818_s20  ;;  %p3222_p2 = scmp.lt.s32.totalorder (%p4830_p4), %s3221_s3, 20 }
 0x465   : > { %s5848_s29 = scalar_lea.vmem (%p4830_p4), %s5955_s11, %s3817_s26  }
 0x469   : > { %s5983_s3 = smov (!%p3222_p2, %s3221_s3), 20 }
 0x46a   : > { %s3784_s1 = sshll.u32 %s5983_s3, 7 }
 0x46b   : > { %p3787_p3 = scmp.eq.s32.totalorder %s3784_s1, 0 }
 0x46c   : > { %4588 = sdivrem.u32 (!%p3787_p3), %s5983_s3, 20 }
 0x46d   : > { %3230 = sbr.rel (%p3787_p3) target bundleno = 1192 (0x4a8), region = 116 }
 0x475   : > { %s5854_s0 = spop.drf %4588 }
 0x476   : > { %p3788_p4 = scmp.le.s32.totalorder %s5854_s0, 0 }
 0x477   : > { %s5970_s2 = smov (!%p3788_p4), %s5848_s29  ;;  %s5971_s4 = smov (!%p3788_p4), %s5273_s12 }
 0x478   : > { %3535 = sbr.rel (%p3788_p4) target bundleno = 1163 (0x48b), region = 237  ;;  %s5863_s20 = smov (!%p3788_p4), 0  }
 0x479   : > { %s5865_s25 = smov (!%p3788_p4), 0  }
 0x47f LB: >> { %v3332_v3 = vld [vmem:[%s4718_s4] sm:$0xff]  ;;  %v3334_v7 = vld [vmem:[%s4718_s4 + $0x8] sm:$0xff]  ;;  %v3336_v21 = vld [vmem:[%s4718_s4 + $0x10] sm:$0xff]  ;;  %s3372_s28 = sadd.s32 1, %s4722_s20  ;;  %s3326_s25 = sadd.s32 1, %s4726_s25   ;;  %s4726_s25 = sphi %s5865_s25, %s3326_s25   ;;  %s4722_s20 = sphi %s5863_s20, %s5972_s20   ;;  %s4718_s4 = sphi %s5971_s4, %s3377_s4   ;;  %s4714_s2 = sphi %s5970_s2, %s3378_s2  }
 0x480   : >> { %3333 = vst [vmem:[%s4714_s2] sm:$0xff] %v3332_v3  ;;  %3335 = vst [vmem:[%s4714_s2 + $0x8] sm:$0xff] %v3334_v7  ;;  %v3338_v50 = vld [vmem:[%s4718_s4 + $0x18] sm:$0xff]  ;;  %v3340_v61 = vld [vmem:[%s4718_s4 + $0x20] sm:$0xff]  ;;  %p3373_p5 = scmp.ge.s32.totalorder %s3372_s28, %s5854_s0  ;;  %p3325_p6 = scmp.ge.s32.totalorder %s3326_s25, %s5854_s0 }
 0x481   : >> { %3337 = vst [vmem:[%s4714_s2 + $0x10] sm:$0xff] %v3336_v21  ;;  %v3342_v23 = vld [vmem:[%s4718_s4 + $0x28] sm:$0xff]  ;;  %3339 = vst [vmem:[%s4714_s2 + $0x18] sm:$0xff] %v3338_v50  ;;  %v3344_v19 = vld [vmem:[%s4718_s4 + $0x30] sm:$0xff] }
 0x482   : >> { %3341 = vst [vmem:[%s4714_s2 + $0x20] sm:$0xff] %v3340_v61  ;;  %3343 = vst [vmem:[%s4714_s2 + $0x28] sm:$0xff] %v3342_v23  ;;  %v3346_v24 = vld [vmem:[%s4718_s4 + $0x38] sm:$0xff]  ;;  %v3348_v52 = vld [vmem:[%s4718_s4 + $0x40] sm:$0xff]  ;;  %s5985_s28 = smov (%p3373_p5, %s3372_s28), 0 }
 0x483   : >> { %3345 = vst [vmem:[%s4714_s2 + $0x30] sm:$0xff] %v3344_v19  ;;  %3347 = vst [vmem:[%s4714_s2 + $0x38] sm:$0xff] %v3346_v24  ;;  %v3350_v54 = vld [vmem:[%s4718_s4 + $0x48] sm:$0xff]  ;;  %v3352_v55 = vld [vmem:[%s4718_s4 + $0x50] sm:$0xff]  ;;  %s3375_s13 = smul.u32 160, %s5985_s28  ;;  %s5972_s20 = smov %s5985_s28 }
 0x484   : >> { %3349 = vst [vmem:[%s4714_s2 + $0x40] sm:$0xff] %v3348_v52  ;;  %v3354_v58 = vld [vmem:[%s4718_s4 + $0x58] sm:$0xff]  ;;  %3351 = vst [vmem:[%s4714_s2 + $0x48] sm:$0xff] %v3350_v54  ;;  %v3356_v59 = vld [vmem:[%s4718_s4 + $0x60] sm:$0xff]  ;;  %3328 = sbr.rel (!%p3325_p6) target bundleno = 1151 (0x47f), region = 243 }
 0x485   : >> { %3353 = vst [vmem:[%s4714_s2 + $0x50] sm:$0xff] %v3352_v55  ;;  %3355 = vst [vmem:[%s4714_s2 + $0x58] sm:$0xff] %v3354_v58  ;;  %v3358_v60 = vld [vmem:[%s4718_s4 + $0x68] sm:$0xff]  ;;  %v3360_v26 = vld [vmem:[%s4718_s4 + $0x70] sm:$0xff] }
 0x486   : >> { %3357 = vst [vmem:[%s4714_s2 + $0x60] sm:$0xff] %v3356_v59  ;;  %3359 = vst [vmem:[%s4714_s2 + $0x68] sm:$0xff] %v3358_v60  ;;  %v3362_v27 = vld [vmem:[%s4718_s4 + $0x78] sm:$0xff]  ;;  %v3364_v28 = vld [vmem:[%s4718_s4 + $0x80] sm:$0xff] }
 0x487   : >> { %3361 = vst [vmem:[%s4714_s2 + $0x70] sm:$0xff] %v3360_v26  ;;  %v3366_v10 = vld [vmem:[%s4718_s4 + $0x88] sm:$0xff]  ;;  %3363 = vst [vmem:[%s4714_s2 + $0x78] sm:$0xff] %v3362_v27  ;;  %v3368_v62 = vld [vmem:[%s4718_s4 + $0x90] sm:$0xff] }
 0x488   : >> { %3365 = vst [vmem:[%s4714_s2 + $0x80] sm:$0xff] %v3364_v28  ;;  %3367 = vst [vmem:[%s4714_s2 + $0x88] sm:$0xff] %v3366_v10  ;;  %v3370_v63 = vld [vmem:[%s4718_s4 + $0x98] sm:$0xff]  ;;  %s3377_s4 = scalar_lea.vmem %s5273_s12, %s3375_s13 [#allocation3]  }
 0x489   : >> { %3369 = vst [vmem:[%s4714_s2 + $0x90] sm:$0xff] %v3368_v62  ;;  %3371 = vst [vmem:[%s4714_s2 + $0x98] sm:$0xff] %v3370_v63  ;;  %s3378_s2 = scalar_lea.vmem %s5848_s29, %s3375_s13  }
 0x48b PF: > { %4590 = sdivrem.u32 %s5983_s3, 20 }
 0x48c   : > { %s3789_s14 = smul.u32 160, %s5854_s0 }
 0x48e   : > { %s3383_s16 = scalar_lea.vmem %s5273_s12, %s3789_s14 [#allocation3]   ;;  %s3385_s23 = scalar_lea.vmem %s5848_s29, %s3789_s14  }
 0x494   : > { %s4591_s30 = spop.drf %4590 }
 0x495   : > { %p3791_p7 = scmp.le.s32.totalorder %s4591_s30, 0 }
 0x496   : > { %s4728_s19 = smov (!%p3791_p7), %s3385_s23   ;;  %s4732_s22 = smov (!%p3791_p7), %s3383_s16  }
 0x497   : > { %3549 = sbr.rel (%p3791_p7) target bundleno = 1192 (0x4a8), region = 248  ;;  %s4736_s17 = smov (!%p3791_p7), 0  }
 0x498   : > { %s4740_s26 = smov (!%p3791_p7), 0  }
 0x49e LB: >> { %v3395_v0 = vld [vmem:[%s4734_s22] sm:$0xff]  ;;  %s3397_s27 = sadd.s32 1, %s4738_s17  ;;  %s3389_s26 = sadd.s32 1, %s4742_s26   ;;  %s4742_s26 = sphi %s4740_s26, %s3389_s26   ;;  %s4738_s17 = sphi %s4736_s17, %s4737_s17   ;;  %s4734_s22 = sphi %s4732_s22, %s3402_s22   ;;  %s4730_s19 = sphi %s4728_s19, %s3403_s19  }
 0x49f   : >> { %3396 = vst [vmem:[%s4730_s19] sm:$0xff] %v3395_v0  ;;  %p3398_p8 = scmp.ge.s32.totalorder %s3397_s27, %s4591_s30  ;;  %p3388_p9 = scmp.ge.s32.totalorder %s3389_s26, %s4591_s30 }
 0x4a1   : >> { %s5987_s27 = smov (%p3398_p8, %s3397_s27), 0  ;;  %3391 = sbr.rel (!%p3388_p9) target bundleno = 1182 (0x49e), region = 254 }
 0x4a2   : >> { %s3792_s12 = sshll.u32 %s5987_s27, 3  ;;  %s4737_s17 = smov %s5987_s27  }
 0x4a3   : >> { %s3402_s22 = scalar_lea.vmem %s3383_s16, %s3792_s12 [#allocation3]   ;;  %s3403_s19 = scalar_lea.vmem %s3385_s23, %s3792_s12  }
 0x4a8 PF: > { %p19_p10 = scmp.ge.s32.totalorder %s4820_s21, 4   ;;  %s5973_s17 = smov %s4674_s18 }
 0x4a9   : > { %s5974_s18 = smov %s4828_s24  ;;  %s5975_s19 = smov %s4820_s21 }
 0x4aa   :  { %21 = sbr.rel (!%p19_p10) target bundleno = 8 (0x8), region = 265 }

</bundles_post_ra>
